<compile_context>
chip_gen: v6e
topology: v6e:2x2x1
jax: 0.10.0
libtpu: 0.0.40
codegen_flags: <defaults>
</compile_context>

<pallas_src>
import functools
import math

import jax
import jax.numpy as jnp
from jax import lax
from jax.experimental import pallas as pl
from jax.experimental.pallas import tpu as pltpu

_EPS = 1e-6
_VMEM_LIMIT = 32 * 1024 * 1024  # explicit scoped-VMEM budget (safe on v5e/v6e/v7x)


# ----------------------------------------------------------------------------
# helpers
# ----------------------------------------------------------------------------

def _compiler_params(sem):
    return pltpu.CompilerParams(dimension_semantics=sem,
                                vmem_limit_bytes=_VMEM_LIMIT)


def _pick_tile(n, cap, align):
    """Largest tile <= cap that divides n and is `align`-aligned; else the full dim."""
    if n <= cap:
        return n
    t = (cap // align) * align
    while t >= align:
        if n % t == 0:
            return t
        t -= align
    return n


def _layernorm_rows(x, g, b, eps):
    # annotated-transformer LayerNorm: a_2 * (x - mean) / (unbiased_std + eps) + b_2
    # Exact divide (feeds every sublayer), f32 statistics.
    x = x.astype(jnp.float32)
    d = x.shape[-1]
    mean = jnp.mean(x, axis=-1, keepdims=True)
    diff = x - mean
    var = jnp.sum(diff * diff, axis=-1, keepdims=True) * (1.0 / (d - 1))
    return g * (diff / (jnp.sqrt(var) + eps)) + b


# ----------------------------------------------------------------------------
# Pallas kernels
# ----------------------------------------------------------------------------

def _ln_linear_kernel(x_ref, g_ref, b_ref, w_ref, bias_ref, o_ref, *, eps):
    # o = LN(x) @ W + bias   (self-attention K|V projection; bf16 MXU, f32 acc)
    nx = _layernorm_rows(x_ref[...], g_ref[...], b_ref[...], eps).astype(jnp.bfloat16)
    y = jnp.dot(nx, w_ref[...], preferred_element_type=jnp.float32) + bias_ref[...]
    o_ref[...] = y.astype(o_ref.dtype)


def _linear_kernel(x_ref, w_ref, bias_ref, o_ref):
    # o = x @ W + bias   (cross-attention K|V projection of the bf16 memory)
    y = jnp.dot(x_ref[...], w_ref[...], preferred_element_type=jnp.float32) + bias_ref[...]
    o_ref[...] = y.astype(o_ref.dtype)


def _mha_kernel(x_ref, g_ref, b_ref, wq_ref, bq_ref, kv_ref, bias_ref,
                wo_ref, bo_ref, o_ref, o_scr, *, h, dk, eps):
    # Fused: LN(x) -> Q proj -> per-head attention -> out proj -> +bias -> +residual.
    # x: (1, tq, D) f32, kv: (1, Tk, 2D) bf16, bias: (1, 1|tq, Tk) f32 additive,
    # wq/wo: (D, D) bf16, bq/bo: (1, D) f32, out: (1, tq, D) f32,
    # o_scr: (tq, D) bf16 scratch holding the concatenated head outputs.
    d_model = h * dk
    x = x_ref[0].astype(jnp.float32)                              # residual tile
    nx = _layernorm_rows(x, g_ref[...], b_ref[...], eps).astype(jnp.bfloat16)
    # Q projection; softmax scale 1/sqrt(dk) is already folded into wq / bq.
    q = (jnp.dot(nx, wq_ref[...], preferred_element_type=jnp.float32)
         + bq_ref[...]).astype(jnp.bfloat16)                      # (tq, D)
    mask_bias = bias_ref[0]                                       # (1|tq, Tk)

    # 128-lane-aligned head groups (dk=32/64 heads packed 4/2 per group).
    if dk < 128 and 128 % dk == 0 and d_model % 128 == 0:
        gw = 128
    else:
        gw = dk
    hg = gw // dk

    # TODO(synk): for very long memory sequences add flash-style Tk chunking
    # (online softmax) inside this kernel; not needed at these sizes.
    for gi in range(d_model // gw):
        goff = gi * gw
        kg = kv_ref[0, :, goff:goff + gw]                          # (Tk, gw) aligned
        vg = kv_ref[0, :, d_model + goff:d_model + goff + gw]      # (Tk, gw) aligned
        for hj in range(hg):
            off = goff + hj * dk
            qh = q[:, off:off + dk]
            kh = kg[:, hj * dk:hj * dk + dk]
            vh = vg[:, hj * dk:hj * dk + dk]
            s = lax.dot_general(qh, kh, (((1,), (1,)), ((), ())),
                                preferred_element_type=jnp.float32)   # (tq, Tk)
            s = s + mask_bias                                      # additive -1e9 mask
            s = s - jnp.max(s, axis=-1, keepdims=True)             # stable softmax
            p = jnp.exp(s)
            p = p * pl.reciprocal(jnp.sum(p, axis=-1, keepdims=True), approx=True)
            # Direct store (no concat); bounds the per-head live set.
            o_scr[:, off:off + dk] = jnp.dot(
                p.astype(jnp.bfloat16), vh,
                preferred_element_type=jnp.float32).astype(jnp.bfloat16)

    # Output projection: full-depth (K = D) matmul, fused bias + residual.
    out = jnp.dot(o_scr[...], wo_ref[...], preferred_element_type=jnp.float32)
    o_ref[0] = (x + out + bo_ref[...]).astype(o_ref.dtype)


def _ln_ffn_kernel(x_ref, g_ref, bln_ref, w1_ref, b1_ref, w2_ref, b2_ref,
                   o_ref, nx_scr, acc_scr, *, eps):
    # o = x + W2(relu(W1(LN(x)) + b1)) + b2, accumulated over d_ff chunks (axis 1).
    j = pl.program_id(1)

    @pl.when(j == 0)
    def _():
        x = x_ref[...].astype(jnp.float32)
        nx_scr[...] = _layernorm_rows(x, g_ref[...], bln_ref[...], eps).astype(jnp.bfloat16)
        acc_scr[...] = x + b2_ref[...]            # residual + final bias

    h1 = jnp.dot(nx_scr[...], w1_ref[...], preferred_element_type=jnp.float32)
    h1 = jnp.maximum(h1 + b1_ref[...], 0.0).astype(jnp.bfloat16)
    acc_scr[...] += jnp.dot(h1, w2_ref[...], preferred_element_type=jnp.float32)

    @pl.when(j == pl.num_programs(1) - 1)
    def _():
        o_ref[...] = acc_scr[...].astype(o_ref.dtype)


def _layernorm_kernel(x_ref, g_ref, b_ref, o_ref, *, eps):
    o_ref[...] = _layernorm_rows(x_ref[...], g_ref[...], b_ref[...], eps).astype(o_ref.dtype)


# ----------------------------------------------------------------------------
# pallas_call wrappers
# ----------------------------------------------------------------------------

def ln_linear(x2d, gamma, beta, w, bias, out_dtype=jnp.bfloat16, eps=_EPS):
    M, D = x2d.shape
    N = w.shape[1]
    tm = _pick_tile(M, 512, 16)
    return pl.pallas_call(
        functools.partial(_ln_linear_kernel, eps=eps),
        out_shape=jax.ShapeDtypeStruct((M, N), out_dtype),
        grid=(M // tm,),
        in_specs=[pl.BlockSpec((tm, D), lambda i: (i, 0)),
                  pl.BlockSpec((1, D), lambda i: (0, 0)),
                  pl.BlockSpec((1, D), lambda i: (0, 0)),
                  pl.BlockSpec((D, N), lambda i: (0, 0)),
                  pl.BlockSpec((1, N), lambda i: (0, 0))],
        out_specs=pl.BlockSpec((tm, N), lambda i: (i, 0)),
        compiler_params=_compiler_params(("parallel",)),
    )(x2d, gamma.reshape(1, D), beta.reshape(1, D), w, bias.reshape(1, N))


def linear_bf16(x2d, w, bias):
    M, D = x2d.shape
    N = w.shape[1]
    tm = _pick_tile(M, 512, 16)
    return pl.pallas_call(
        _linear_kernel,
        out_shape=jax.ShapeDtypeStruct((M, N), jnp.bfloat16),
        grid=(M // tm,),
        in_specs=[pl.BlockSpec((tm, D), lambda i: (i, 0)),
                  pl.BlockSpec((D, N), lambda i: (0, 0)),
                  pl.BlockSpec((1, N), lambda i: (0, 0))],
        out_specs=pl.BlockSpec((tm, N), lambda i: (i, 0)),
        compiler_params=_compiler_params(("parallel",)),
    )(x2d, w, bias.reshape(1, N))


def mha_fused(x, kv, mask_bias, ln_g, ln_b, wq, bq, wo, bo, h, eps=_EPS):
    """x: (B, Tq, D) f32 residual stream, kv: (B, Tk, 2D) bf16,
    mask_bias: (B, 1|Tq, Tk) f32 additive (0 / -1e9). Returns (B, Tq, D) f32."""
    B, Tq, D = x.shape
    Tk = kv.shape[1]
    dk = D // h
    mq = mask_bias.shape[1]
    tq = _pick_tile(Tq, 256, 16)
    grid = (B, Tq // tq)
    if mq == 1:
        m_spec = pl.BlockSpec((1, 1, Tk), lambda b, i: (b, 0, 0))
    else:
        m_spec = pl.BlockSpec((1, tq, Tk), lambda b, i: (b, i, 0))
    return pl.pallas_call(
        functools.partial(_mha_kernel, h=h, dk=dk, eps=eps),
        out_shape=jax.ShapeDtypeStruct((B, Tq, D), jnp.float32),
        grid=grid,
        in_specs=[pl.BlockSpec((1, tq, D), lambda b, i: (b, i, 0)),
                  pl.BlockSpec((1, D), lambda b, i: (0, 0)),
                  pl.BlockSpec((1, D), lambda b, i: (0, 0)),
                  pl.BlockSpec((D, D), lambda b, i: (0, 0)),
                  pl.BlockSpec((1, D), lambda b, i: (0, 0)),
                  pl.BlockSpec((1, Tk, 2 * D), lambda b, i: (b, 0, 0)),
                  m_spec,
                  pl.BlockSpec((D, D), lambda b, i: (0, 0)),
                  pl.BlockSpec((1, D), lambda b, i: (0, 0))],
        out_specs=pl.BlockSpec((1, tq, D), lambda b, i: (b, i, 0)),
        scratch_shapes=[pltpu.VMEM((tq, D), jnp.bfloat16)],
        compiler_params=_compiler_params(("parallel", "parallel")),
    )(x, ln_g.reshape(1, D), ln_b.reshape(1, D), wq, bq.reshape(1, D),
      kv, mask_bias, wo, bo.reshape(1, D))


def ln_ffn_residual(x2d, gamma, beta, w1, b1, w2, b2, eps=_EPS):
    M, D = x2d.shape
    F = w1.shape[1]
    tm = _pick_tile(M, 512, 16)
    tff = _pick_tile(F, 2048, 128)          # full d_ff at module defaults
    grid = (M // tm, F // tff)
    return pl.pallas_call(
        functools.partial(_ln_ffn_kernel, eps=eps),
        out_shape=jax.ShapeDtypeStruct((M, D), jnp.float32),
        grid=grid,
        in_specs=[pl.BlockSpec((tm, D), lambda i, j: (i, 0)),
                  pl.BlockSpec((1, D), lambda i, j: (0, 0)),
                  pl.BlockSpec((1, D), lambda i, j: (0, 0)),
                  pl.BlockSpec((D, tff), lambda i, j: (0, j)),
                  pl.BlockSpec((1, tff), lambda i, j: (0, j)),
                  pl.BlockSpec((tff, D), lambda i, j: (j, 0)),
                  pl.BlockSpec((1, D), lambda i, j: (0, 0))],
        out_specs=pl.BlockSpec((tm, D), lambda i, j: (i, 0)),
        scratch_shapes=[pltpu.VMEM((tm, D), jnp.bfloat16),
                        pltpu.VMEM((tm, D), jnp.float32)],
        compiler_params=_compiler_params(("parallel", "arbitrary")),
    )(x2d, gamma.reshape(1, D), beta.reshape(1, D),
      w1, b1.reshape(1, F), w2, b2.reshape(1, D))


def layer_norm(x2d, gamma, beta, eps=_EPS):
    M, D = x2d.shape
    tm = _pick_tile(M, 512, 16)
    return pl.pallas_call(
        functools.partial(_layernorm_kernel, eps=eps),
        out_shape=jax.ShapeDtypeStruct((M, D), jnp.float32),
        grid=(M // tm,),
        in_specs=[pl.BlockSpec((tm, D), lambda i: (i, 0)),
                  pl.BlockSpec((1, D), lambda i: (0, 0)),
                  pl.BlockSpec((1, D), lambda i: (0, 0))],
        out_specs=pl.BlockSpec((tm, D), lambda i: (i, 0)),
        compiler_params=_compiler_params(("parallel",)),
    )(x2d, gamma.reshape(1, D), beta.reshape(1, D))


# ----------------------------------------------------------------------------
# Model glue (plain JAX reshapes only)
# ----------------------------------------------------------------------------

def _self_attn_sublayer(lp, x, mask_bias, h):
    B, T, D = x.shape
    x2d = x.reshape(B * T, D)
    # K|V projection of LN0(x) once for the whole sequence; Q proj fused into MHA.
    kv2d = ln_linear(x2d, lp["ln0_g"], lp["ln0_b"], lp["sa_wkv"], lp["sa_bkv"])
    return mha_fused(x, kv2d.reshape(B, T, 2 * D), mask_bias,
                     lp["ln0_g"], lp["ln0_b"], lp["sa_wq"], lp["sa_bq"],
                     lp["sa_wo"], lp["sa_bo"], h)


def _cross_attn_sublayer(lp, x, memory_bf16, mask_bias, h):
    Bm, Tk, D = memory_bf16.shape
    kv2d = linear_bf16(memory_bf16.reshape(Bm * Tk, D), lp["ca_wkv"], lp["ca_bkv"])
    return mha_fused(x, kv2d.reshape(Bm, Tk, 2 * D), mask_bias,
                     lp["ln1_g"], lp["ln1_b"], lp["ca_wq"], lp["ca_bq"],
                     lp["ca_wo"], lp["ca_bo"], h)


def _ffn_sublayer(lp, x):
    B, T, D = x.shape
    out = ln_ffn_residual(x.reshape(B * T, D), lp["ln2_g"], lp["ln2_b"],
                          lp["ff_w1"], lp["ff_b1"], lp["ff_w2"], lp["ff_b2"])
    return out.reshape(B, T, D)


def cross_attention_forward(prepared, src_trj, src_vsn, src_mask, obd_enc_mask, h):
    x = src_trj.astype(jnp.float32)
    memory_bf16 = src_vsn.astype(jnp.bfloat16)                 # cast once, reused per layer
    src_bias = (src_mask.astype(jnp.float32) - 1.0) * 1e9      # additive mask (0 / -1e9)
    obd_bias = (obd_enc_mask.astype(jnp.float32) - 1.0) * 1e9
    for lp in prepared["layers"]:
        x = _self_attn_sublayer(lp, x, obd_bias, h)
        x = _cross_attn_sublayer(lp, x, memory_bf16, src_bias, h)
        x = _ffn_sublayer(lp, x)
    B, T, D = x.shape
    x2d = layer_norm(x.reshape(B * T, D), prepared["final_ln_g"], prepared["final_ln_b"])
    return x2d.reshape(B, T, D)


# ----------------------------------------------------------------------------
# Parameter construction (torch-like layout) + kernel-ready preparation
# ----------------------------------------------------------------------------

def init_params(key, N, d_model, d_ff):
    def lin(key, fan_in, fan_out):
        kw, _ = jax.random.split(key)
        w = jax.random.normal(kw, (fan_in, fan_out), jnp.float32) * 0.02
        b = jnp.zeros((fan_out,), jnp.float32)
        return w, b

    def mha_params(key):
        ks = jax.random.split(key, 4)
        wq, bq = lin(ks[0], d_model, d_model)
        wk, bk = lin(ks[1], d_model, d_model)
        wv, bv = lin(ks[2], d_model, d_model)
        wo, bo = lin(ks[3], d_model, d_model)
        return dict(wq=wq, bq=bq, wk=wk, bk=bk, wv=wv, bv=bv, wo=wo, bo=bo)

    layers = []
    for _ in range(N):
        key, k_self, k_src, k_ff1, k_ff2 = jax.random.split(key, 5)
        ff_w1, ff_b1 = lin(k_ff1, d_model, d_ff)
        ff_w2, ff_b2 = lin(k_ff2, d_ff, d_model)
        layers.append(dict(
            self_attn=mha_params(k_self), src_attn=mha_params(k_src),
            ff_w1=ff_w1, ff_b1=ff_b1, ff_w2=ff_w2, ff_b2=ff_b2,
            ln0_g=jnp.ones((d_model,), jnp.float32), ln0_b=jnp.zeros((d_model,), jnp.float32),
            ln1_g=jnp.ones((d_model,), jnp.float32), ln1_b=jnp.zeros((d_model,), jnp.float32),
            ln2_g=jnp.ones((d_model,), jnp.float32), ln2_b=jnp.zeros((d_model,), jnp.float32),
        ))
    return dict(layers=layers,
                final_ln_g=jnp.ones((d_model,), jnp.float32),
                final_ln_b=jnp.zeros((d_model,), jnp.float32))


def prepare_params(params, d_model, h):
    """Fuse K|V weights, fold the 1/sqrt(dk) softmax scale into the Q projections,
    and cast matmul weights to bf16 (biases / LN params stay f32)."""
    dk = d_model // h
    scale = 1.0 / math.sqrt(dk)
    bf16 = jnp.bfloat16
    layers = []
    for lp in params["layers"]:
        sa, ca = lp["self_attn"], lp["src_attn"]
        layers.append(dict(
            ln0_g=lp["ln0_g"], ln0_b=lp["ln0_b"],
            ln1_g=lp["ln1_g"], ln1_b=lp["ln1_b"],
            ln2_g=lp["ln2_g"], ln2_b=lp["ln2_b"],
            sa_wq=(sa["wq"] * scale).astype(bf16), sa_bq=sa["bq"] * scale,
            sa_wkv=jnp.concatenate([sa["wk"], sa["wv"]], axis=1).astype(bf16),
            sa_bkv=jnp.concatenate([sa["bk"], sa["bv"]], axis=0),
            sa_wo=sa["wo"].astype(bf16), sa_bo=sa["bo"],
            ca_wq=(ca["wq"] * scale).astype(bf16), ca_bq=ca["bq"] * scale,
            ca_wkv=jnp.concatenate([ca["wk"], ca["wv"]], axis=1).astype(bf16),
            ca_bkv=jnp.concatenate([ca["bk"], ca["bv"]], axis=0),
            ca_wo=ca["wo"].astype(bf16), ca_bo=ca["bo"],
            ff_w1=lp["ff_w1"].astype(bf16), ff_b1=lp["ff_b1"],
            ff_w2=lp["ff_w2"].astype(bf16), ff_b2=lp["ff_b2"],
        ))
    return dict(layers=layers,
                final_ln_g=params["final_ln_g"], final_ln_b=params["final_ln_b"])


# ----------------------------------------------------------------------------
# Demo
# ----------------------------------------------------------------------------

if __name__ == "__main__":
    # Small shapes consistent with the module (module defaults: d_model=256, d_ff=2048, h=8).
    N, d_model, d_ff, h = 1, 128, 256, 4
    B, T_trj, T_vsn = 2, 8, 16

    key = jax.random.PRNGKey(0)
    k_p, k_trj, k_vsn = jax.random.split(key, 3)

    raw_params = init_params(k_p, N, d_model, d_ff)
    params = prepare_params(raw_params, d_model, h)

    src_trj = jax.random.normal(k_trj, (B, T_trj, d_model), jnp.float32)
    src_vsn = jax.random.normal(k_vsn, (B, T_vsn, d_model), jnp.float32)

    # 0/1 masks (keyed on key length; broadcast over query positions / heads in-kernel).
    src_mask = jnp.ones((B, 1, T_vsn), jnp.float32).at[1, 0, -2:].set(0.0)      # cross-attn
    obd_enc_mask = jnp.ones((B, 1, T_trj), jnp.float32).at[0, 0, -1:].set(0.0)  # self-attn

    # TODO(synk): dropout layers run in inference mode (identity); PositionalEncoding
    # is constructed in the torch __init__ but never applied in forward, so omitted.
    fwd = jax.jit(functools.partial(cross_attention_forward, h=h))
    out = jax.block_until_ready(fwd(params, src_trj, src_vsn, src_mask, obd_enc_mask))
    assert out.shape == (B, T_trj, d_model)
    assert bool(jnp.all(jnp.isfinite(out)))
    print("KERNEL_OK")
</pallas_src>

<mosaic_0001>
module attributes {stable_mosaic.version = 11 : i64} {
  func.func @_mha_kernel(%arg0: i32, %arg1: i32, %arg2: memref<1x8x128xf32, #tpu.memory_space<vmem>>, %arg3: memref<1x128xf32, #tpu.memory_space<vmem>>, %arg4: memref<1x128xf32, #tpu.memory_space<vmem>>, %arg5: memref<128x128xbf16, #tpu.memory_space<vmem>>, %arg6: memref<1x128xf32, #tpu.memory_space<vmem>>, %arg7: memref<1x8x256xbf16, #tpu.memory_space<vmem>>, %arg8: memref<1x1x8xf32, #tpu.memory_space<vmem>>, %arg9: memref<128x128xbf16, #tpu.memory_space<vmem>>, %arg10: memref<1x128xf32, #tpu.memory_space<vmem>>, %arg11: memref<1x8x128xf32, #tpu.memory_space<vmem>>, %arg12: memref<8x128xbf16, #tpu.memory_space<vmem>>) attributes {dimension_semantics = [#tpu.dimension_semantics<parallel>, #tpu.dimension_semantics<parallel>], iteration_bounds = array<i64: 2, 1>, scalar_prefetch = 0 : i64, scratch_operands = 1 : i64, tpu.core_type = #tpu.core_type<tc>, window_params = [{transform_indices = @transform_0, window_bounds = array<i64: 1, 8, 128>}, {pipeline_mode = #tpu.pipeline_mode<synchronous>, transform_indices = @transform_1, window_bounds = array<i64: 1, 128>}, {pipeline_mode = #tpu.pipeline_mode<synchronous>, transform_indices = @transform_2, window_bounds = array<i64: 1, 128>}, {pipeline_mode = #tpu.pipeline_mode<synchronous>, transform_indices = @transform_3, window_bounds = array<i64: 128, 128>}, {pipeline_mode = #tpu.pipeline_mode<synchronous>, transform_indices = @transform_4, window_bounds = array<i64: 1, 128>}, {transform_indices = @transform_5, window_bounds = array<i64: 1, 8, 256>}, {transform_indices = @transform_6, window_bounds = array<i64: 1, 1, 8>}, {pipeline_mode = #tpu.pipeline_mode<synchronous>, transform_indices = @transform_7, window_bounds = array<i64: 128, 128>}, {pipeline_mode = #tpu.pipeline_mode<synchronous>, transform_indices = @transform_8, window_bounds = array<i64: 1, 128>}, {transform_indices = @transform_9, window_bounds = array<i64: 1, 8, 128>}]} {
    %c0 = arith.constant 0 : index
    %c0_0 = arith.constant 0 : index
    %c0_1 = arith.constant 0 : index
    %0 = vector.load %arg2[%c0, %c0_0, %c0_1] : memref<1x8x128xf32, #tpu.memory_space<vmem>>, vector<1x8x128xf32>
    %1 = vector.shape_cast %0 : vector<1x8x128xf32> to vector<8x128xf32>
    %c0_2 = arith.constant 0 : index
    %c0_3 = arith.constant 0 : index
    %2 = vector.load %arg3[%c0_2, %c0_3] : memref<1x128xf32, #tpu.memory_space<vmem>>, vector<1x128xf32>
    %c0_4 = arith.constant 0 : index
    %c0_5 = arith.constant 0 : index
    %3 = vector.load %arg4[%c0_4, %c0_5] : memref<1x128xf32, #tpu.memory_space<vmem>>, vector<1x128xf32>
    %cst = arith.constant dense<0.000000e+00> : vector<8xf32>
    %4 = vector.multi_reduction <add>, %1, %cst [1] : vector<8x128xf32> to vector<8xf32>
    %5 = vector.shape_cast %4 : vector<8xf32> to vector<8x1xf32>
    %cst_6 = arith.constant 1.280000e+02 : f32
    %6 = vector.broadcast %cst_6 : f32 to vector<8x1xf32>
    %7 = arith.divf %5, %6 : vector<8x1xf32>
    %8 = vector.broadcast %7 : vector<8x1xf32> to vector<8x128xf32>
    %9 = arith.subf %1, %8 : vector<8x128xf32>
    %10 = arith.mulf %9, %9 : vector<8x128xf32>
    %cst_7 = arith.constant dense<0.000000e+00> : vector<8xf32>
    %11 = vector.multi_reduction <add>, %10, %cst_7 [1] : vector<8x128xf32> to vector<8xf32>
    %12 = vector.shape_cast %11 : vector<8xf32> to vector<8x1xf32>
    %cst_8 = arith.constant 0.00787401571 : f32
    %13 = vector.broadcast %cst_8 : f32 to vector<8x1xf32>
    %14 = arith.mulf %12, %13 : vector<8x1xf32>
    %15 = math.sqrt %14 : vector<8x1xf32>
    %cst_9 = arith.constant 9.99999997E-7 : f32
    %16 = vector.broadcast %cst_9 : f32 to vector<8x1xf32>
    %17 = arith.addf %15, %16 : vector<8x1xf32>
    %18 = vector.broadcast %17 : vector<8x1xf32> to vector<8x128xf32>
    %19 = arith.divf %9, %18 : vector<8x128xf32>
    %20 = vector.broadcast %2 : vector<1x128xf32> to vector<8x128xf32>
    %21 = arith.mulf %20, %19 : vector<8x128xf32>
    %22 = vector.broadcast %3 : vector<1x128xf32> to vector<8x128xf32>
    %23 = arith.addf %21, %22 : vector<8x128xf32>
    %24 = arith.truncf %23 : vector<8x128xf32> to vector<8x128xbf16>
    %c0_10 = arith.constant 0 : index
    %c0_11 = arith.constant 0 : index
    %25 = vector.load %arg5[%c0_10, %c0_11] : memref<128x128xbf16, #tpu.memory_space<vmem>>, vector<128x128xbf16>
    %cst_12 = arith.constant dense<0.000000e+00> : vector<8x128xf32>
    %26 = tpu.matmul %24, %25, %cst_12 {dimension_numbers = #tpu.dot_dimension_numbers<[1], [0], [0], [1], [0, 0, 1, 1], [], []>} : vector<8x128xbf16>, vector<128x128xbf16>, vector<8x128xf32> -> vector<8x128xf32>
    %c0_13 = arith.constant 0 : index
    %c0_14 = arith.constant 0 : index
    %27 = vector.load %arg6[%c0_13, %c0_14] : memref<1x128xf32, #tpu.memory_space<vmem>>, vector<1x128xf32>
    %28 = vector.broadcast %27 : vector<1x128xf32> to vector<8x128xf32>
    %29 = arith.addf %26, %28 : vector<8x128xf32>
    %30 = arith.truncf %29 : vector<8x128xf32> to vector<8x128xbf16>
    %c0_15 = arith.constant 0 : index
    %c0_16 = arith.constant 0 : index
    %c0_17 = arith.constant 0 : index
    %31 = vector.load %arg8[%c0_15, %c0_16, %c0_17] : memref<1x1x8xf32, #tpu.memory_space<vmem>>, vector<1x1x8xf32>
    %32 = vector.shape_cast %31 : vector<1x1x8xf32> to vector<1x8xf32>
    %c0_18 = arith.constant 0 : index
    %c0_19 = arith.constant 0 : index
    %c0_20 = arith.constant 0 : index
    %33 = vector.load %arg7[%c0_18, %c0_19, %c0_20] : memref<1x8x256xbf16, #tpu.memory_space<vmem>>, vector<1x8x128xbf16>
    %34 = vector.shape_cast %33 : vector<1x8x128xbf16> to vector<8x128xbf16>
    %c0_21 = arith.constant 0 : index
    %c0_22 = arith.constant 0 : index
    %c128 = arith.constant 128 : index
    %35 = vector.load %arg7[%c0_21, %c0_22, %c128] : memref<1x8x256xbf16, #tpu.memory_space<vmem>>, vector<1x8x128xbf16>
    %36 = vector.shape_cast %35 : vector<1x8x128xbf16> to vector<8x128xbf16>
    %37 = vector.extract_strided_slice %30 {offsets = [0, 0], sizes = [8, 32], strides = [1, 1]} : vector<8x128xbf16> to vector<8x32xbf16>
    %38 = vector.extract_strided_slice %34 {offsets = [0, 0], sizes = [8, 32], strides = [1, 1]} : vector<8x128xbf16> to vector<8x32xbf16>
    %39 = vector.extract_strided_slice %36 {offsets = [0, 0], sizes = [8, 32], strides = [1, 1]} : vector<8x128xbf16> to vector<8x32xbf16>
    %cst_23 = arith.constant dense<0.000000e+00> : vector<8x8xf32>
    %40 = tpu.matmul %37, %38, %cst_23 {dimension_numbers = #tpu.dot_dimension_numbers<[1], [1], [0], [0], [0, 0, 1, 0], [], []>} : vector<8x32xbf16>, vector<8x32xbf16>, vector<8x8xf32> -> vector<8x8xf32>
    %41 = vector.broadcast %32 : vector<1x8xf32> to vector<8x8xf32>
    %42 = arith.addf %40, %41 : vector<8x8xf32>
    %cst_24 = arith.constant dense<0xFF800000> : vector<8xf32>
    %43 = vector.multi_reduction <maximumf>, %42, %cst_24 [1] : vector<8x8xf32> to vector<8xf32>
    %44 = vector.shape_cast %43 : vector<8xf32> to vector<8x1xf32>
    %45 = vector.broadcast %44 : vector<8x1xf32> to vector<8x8xf32>
    %46 = arith.subf %42, %45 : vector<8x8xf32>
    %47 = math.exp %46 : vector<8x8xf32>
    %cst_25 = arith.constant dense<0.000000e+00> : vector<8xf32>
    %48 = vector.multi_reduction <add>, %47, %cst_25 [1] : vector<8x8xf32> to vector<8xf32>
    %49 = vector.shape_cast %48 : vector<8xf32> to vector<8x1xf32>
    %50 = tpu.reciprocal %49 {approx = true} : vector<8x1xf32> -> vector<8x1xf32>
    %51 = vector.broadcast %50 : vector<8x1xf32> to vector<8x8xf32>
    %52 = arith.mulf %47, %51 : vector<8x8xf32>
    %53 = arith.truncf %52 : vector<8x8xf32> to vector<8x8xbf16>
    %cst_26 = arith.constant dense<0.000000e+00> : vector<8x32xf32>
    %54 = tpu.matmul %53, %39, %cst_26 {dimension_numbers = #tpu.dot_dimension_numbers<[1], [0], [0], [1], [0, 0, 1, 1], [], []>} : vector<8x8xbf16>, vector<8x32xbf16>, vector<8x32xf32> -> vector<8x32xf32>
    %55 = arith.truncf %54 : vector<8x32xf32> to vector<8x32xbf16>
    %c0_27 = arith.constant 0 : index
    %c0_28 = arith.constant 0 : index
    %56 = vector.load %arg12[%c0_27, %c0_28] : memref<8x128xbf16, #tpu.memory_space<vmem>>, vector<8x32xbf16>
    tpu.vector_store %arg12[%c0_27, %c0_28], %55 {strides = array<i32>} : memref<8x128xbf16, #tpu.memory_space<vmem>>, vector<8x32xbf16>,
    %57 = vector.extract_strided_slice %30 {offsets = [0, 32], sizes = [8, 32], strides = [1, 1]} : vector<8x128xbf16> to vector<8x32xbf16>
    %58 = vector.extract_strided_slice %34 {offsets = [0, 32], sizes = [8, 32], strides = [1, 1]} : vector<8x128xbf16> to vector<8x32xbf16>
    %59 = vector.extract_strided_slice %36 {offsets = [0, 32], sizes = [8, 32], strides = [1, 1]} : vector<8x128xbf16> to vector<8x32xbf16>
    %cst_29 = arith.constant dense<0.000000e+00> : vector<8x8xf32>
    %60 = tpu.matmul %57, %58, %cst_29 {dimension_numbers = #tpu.dot_dimension_numbers<[1], [1], [0], [0], [0, 0, 1, 0], [], []>} : vector<8x32xbf16>, vector<8x32xbf16>, vector<8x8xf32> -> vector<8x8xf32>
    %61 = vector.broadcast %32 : vector<1x8xf32> to vector<8x8xf32>
    %62 = arith.addf %60, %61 : vector<8x8xf32>
    %cst_30 = arith.constant dense<0xFF800000> : vector<8xf32>
    %63 = vector.multi_reduction <maximumf>, %62, %cst_30 [1] : vector<8x8xf32> to vector<8xf32>
    %64 = vector.shape_cast %63 : vector<8xf32> to vector<8x1xf32>
    %65 = vector.broadcast %64 : vector<8x1xf32> to vector<8x8xf32>
    %66 = arith.subf %62, %65 : vector<8x8xf32>
    %67 = math.exp %66 : vector<8x8xf32>
    %cst_31 = arith.constant dense<0.000000e+00> : vector<8xf32>
    %68 = vector.multi_reduction <add>, %67, %cst_31 [1] : vector<8x8xf32> to vector<8xf32>
    %69 = vector.shape_cast %68 : vector<8xf32> to vector<8x1xf32>
    %70 = tpu.reciprocal %69 {approx = true} : vector<8x1xf32> -> vector<8x1xf32>
    %71 = vector.broadcast %70 : vector<8x1xf32> to vector<8x8xf32>
    %72 = arith.mulf %67, %71 : vector<8x8xf32>
    %73 = arith.truncf %72 : vector<8x8xf32> to vector<8x8xbf16>
    %cst_32 = arith.constant dense<0.000000e+00> : vector<8x32xf32>
    %74 = tpu.matmul %73, %59, %cst_32 {dimension_numbers = #tpu.dot_dimension_numbers<[1], [0], [0], [1], [0, 0, 1, 1], [], []>} : vector<8x8xbf16>, vector<8x32xbf16>, vector<8x32xf32> -> vector<8x32xf32>
    %75 = arith.truncf %74 : vector<8x32xf32> to vector<8x32xbf16>
    %c0_33 = arith.constant 0 : index
    %c32 = arith.constant 32 : index
    %76 = vector.load %arg12[%c0_33, %c32] : memref<8x128xbf16, #tpu.memory_space<vmem>>, vector<8x32xbf16>
    tpu.vector_store %arg12[%c0_33, %c32], %75 {strides = array<i32>} : memref<8x128xbf16, #tpu.memory_space<vmem>>, vector<8x32xbf16>,
    %77 = vector.extract_strided_slice %30 {offsets = [0, 64], sizes = [8, 32], strides = [1, 1]} : vector<8x128xbf16> to vector<8x32xbf16>
    %78 = vector.extract_strided_slice %34 {offsets = [0, 64], sizes = [8, 32], strides = [1, 1]} : vector<8x128xbf16> to vector<8x32xbf16>
    %79 = vector.extract_strided_slice %36 {offsets = [0, 64], sizes = [8, 32], strides = [1, 1]} : vector<8x128xbf16> to vector<8x32xbf16>
    %cst_34 = arith.constant dense<0.000000e+00> : vector<8x8xf32>
    %80 = tpu.matmul %77, %78, %cst_34 {dimension_numbers = #tpu.dot_dimension_numbers<[1], [1], [0], [0], [0, 0, 1, 0], [], []>} : vector<8x32xbf16>, vector<8x32xbf16>, vector<8x8xf32> -> vector<8x8xf32>
    %81 = vector.broadcast %32 : vector<1x8xf32> to vector<8x8xf32>
    %82 = arith.addf %80, %81 : vector<8x8xf32>
    %cst_35 = arith.constant dense<0xFF800000> : vector<8xf32>
    %83 = vector.multi_reduction <maximumf>, %82, %cst_35 [1] : vector<8x8xf32> to vector<8xf32>
    %84 = vector.shape_cast %83 : vector<8xf32> to vector<8x1xf32>
    %85 = vector.broadcast %84 : vector<8x1xf32> to vector<8x8xf32>
    %86 = arith.subf %82, %85 : vector<8x8xf32>
    %87 = math.exp %86 : vector<8x8xf32>
    %cst_36 = arith.constant dense<0.000000e+00> : vector<8xf32>
    %88 = vector.multi_reduction <add>, %87, %cst_36 [1] : vector<8x8xf32> to vector<8xf32>
    %89 = vector.shape_cast %88 : vector<8xf32> to vector<8x1xf32>
    %90 = tpu.reciprocal %89 {approx = true} : vector<8x1xf32> -> vector<8x1xf32>
    %91 = vector.broadcast %90 : vector<8x1xf32> to vector<8x8xf32>
    %92 = arith.mulf %87, %91 : vector<8x8xf32>
    %93 = arith.truncf %92 : vector<8x8xf32> to vector<8x8xbf16>
    %cst_37 = arith.constant dense<0.000000e+00> : vector<8x32xf32>
    %94 = tpu.matmul %93, %79, %cst_37 {dimension_numbers = #tpu.dot_dimension_numbers<[1], [0], [0], [1], [0, 0, 1, 1], [], []>} : vector<8x8xbf16>, vector<8x32xbf16>, vector<8x32xf32> -> vector<8x32xf32>
    %95 = arith.truncf %94 : vector<8x32xf32> to vector<8x32xbf16>
    %c0_38 = arith.constant 0 : index
    %c64 = arith.constant 64 : index
    %96 = vector.load %arg12[%c0_38, %c64] : memref<8x128xbf16, #tpu.memory_space<vmem>>, vector<8x32xbf16>
    tpu.vector_store %arg12[%c0_38, %c64], %95 {strides = array<i32>} : memref<8x128xbf16, #tpu.memory_space<vmem>>, vector<8x32xbf16>,
    %97 = vector.extract_strided_slice %30 {offsets = [0, 96], sizes = [8, 32], strides = [1, 1]} : vector<8x128xbf16> to vector<8x32xbf16>
    %98 = vector.extract_strided_slice %34 {offsets = [0, 96], sizes = [8, 32], strides = [1, 1]} : vector<8x128xbf16> to vector<8x32xbf16>
    %99 = vector.extract_strided_slice %36 {offsets = [0, 96], sizes = [8, 32], strides = [1, 1]} : vector<8x128xbf16> to vector<8x32xbf16>
    %cst_39 = arith.constant dense<0.000000e+00> : vector<8x8xf32>
    %100 = tpu.matmul %97, %98, %cst_39 {dimension_numbers = #tpu.dot_dimension_numbers<[1], [1], [0], [0], [0, 0, 1, 0], [], []>} : vector<8x32xbf16>, vector<8x32xbf16>, vector<8x8xf32> -> vector<8x8xf32>
    %101 = vector.broadcast %32 : vector<1x8xf32> to vector<8x8xf32>
    %102 = arith.addf %100, %101 : vector<8x8xf32>
    %cst_40 = arith.constant dense<0xFF800000> : vector<8xf32>
    %103 = vector.multi_reduction <maximumf>, %102, %cst_40 [1] : vector<8x8xf32> to vector<8xf32>
    %104 = vector.shape_cast %103 : vector<8xf32> to vector<8x1xf32>
    %105 = vector.broadcast %104 : vector<8x1xf32> to vector<8x8xf32>
    %106 = arith.subf %102, %105 : vector<8x8xf32>
    %107 = math.exp %106 : vector<8x8xf32>
    %cst_41 = arith.constant dense<0.000000e+00> : vector<8xf32>
    %108 = vector.multi_reduction <add>, %107, %cst_41 [1] : vector<8x8xf32> to vector<8xf32>
    %109 = vector.shape_cast %108 : vector<8xf32> to vector<8x1xf32>
    %110 = tpu.reciprocal %109 {approx = true} : vector<8x1xf32> -> vector<8x1xf32>
    %111 = vector.broadcast %110 : vector<8x1xf32> to vector<8x8xf32>
    %112 = arith.mulf %107, %111 : vector<8x8xf32>
    %113 = arith.truncf %112 : vector<8x8xf32> to vector<8x8xbf16>
    %cst_42 = arith.constant dense<0.000000e+00> : vector<8x32xf32>
    %114 = tpu.matmul %113, %99, %cst_42 {dimension_numbers = #tpu.dot_dimension_numbers<[1], [0], [0], [1], [0, 0, 1, 1], [], []>} : vector<8x8xbf16>, vector<8x32xbf16>, vector<8x32xf32> -> vector<8x32xf32>
    %115 = arith.truncf %114 : vector<8x32xf32> to vector<8x32xbf16>
    %c0_43 = arith.constant 0 : index
    %c96 = arith.constant 96 : index
    %116 = vector.load %arg12[%c0_43, %c96] : memref<8x128xbf16, #tpu.memory_space<vmem>>, vector<8x32xbf16>
    tpu.vector_store %arg12[%c0_43, %c96], %115 {strides = array<i32>} : memref<8x128xbf16, #tpu.memory_space<vmem>>, vector<8x32xbf16>,
    %c0_44 = arith.constant 0 : index
    %c0_45 = arith.constant 0 : index
    %117 = vector.load %arg12[%c0_44, %c0_45] : memref<8x128xbf16, #tpu.memory_space<vmem>>, vector<8x128xbf16>
    %c0_46 = arith.constant 0 : index
    %c0_47 = arith.constant 0 : index
    %118 = vector.load %arg9[%c0_46, %c0_47] : memref<128x128xbf16, #tpu.memory_space<vmem>>, vector<128x128xbf16>
    %cst_48 = arith.constant dense<0.000000e+00> : vector<8x128xf32>
    %119 = tpu.matmul %117, %118, %cst_48 {dimension_numbers = #tpu.dot_dimension_numbers<[1], [0], [0], [1], [0, 0, 1, 1], [], []>} : vector<8x128xbf16>, vector<128x128xbf16>, vector<8x128xf32> -> vector<8x128xf32>
    %120 = arith.addf %1, %119 : vector<8x128xf32>
    %c0_49 = arith.constant 0 : index
    %c0_50 = arith.constant 0 : index
    %121 = vector.load %arg10[%c0_49, %c0_50] : memref<1x128xf32, #tpu.memory_space<vmem>>, vector<1x128xf32>
    %122 = vector.broadcast %121 : vector<1x128xf32> to vector<8x128xf32>
    %123 = arith.addf %120, %122 : vector<8x128xf32>
    %c0_51 = arith.constant 0 : index
    %c0_52 = arith.constant 0 : index
    %c0_53 = arith.constant 0 : index
    %124 = vector.load %arg11[%c0_51, %c0_52, %c0_53] : memref<1x8x128xf32, #tpu.memory_space<vmem>>, vector<1x8x128xf32>
    %125 = vector.shape_cast %124 : vector<1x8x128xf32> to vector<8x128xf32>
    %126 = vector.shape_cast %123 : vector<8x128xf32> to vector<1x8x128xf32>
    tpu.vector_store %arg11[%c0_51, %c0_52, %c0_53], %126 {strides = array<i32>} : memref<1x8x128xf32, #tpu.memory_space<vmem>>, vector<1x8x128xf32>,
    return
  }
  func.func @transform_0(%arg0: i32, %arg1: i32) -> (i32, i32, i32) {
    %c0_i32 = arith.constant 0 : i32
    %c0_i32_0 = arith.constant 0 : i32
    return %arg0, %arg1, %c0_i32 : i32, i32, i32
  }
  func.func @transform_1(%arg0: i32, %arg1: i32) -> (i32, i32) {
    %c0_i32 = arith.constant 0 : i32
    %c0_i32_0 = arith.constant 0 : i32
    %c0_i32_1 = arith.constant 0 : i32
    return %c0_i32, %c0_i32_0 : i32, i32
  }
  func.func @transform_2(%arg0: i32, %arg1: i32) -> (i32, i32) {
    %c0_i32 = arith.constant 0 : i32
    %c0_i32_0 = arith.constant 0 : i32
    %c0_i32_1 = arith.constant 0 : i32
    return %c0_i32, %c0_i32_0 : i32, i32
  }
  func.func @transform_3(%arg0: i32, %arg1: i32) -> (i32, i32) {
    %c0_i32 = arith.constant 0 : i32
    %c0_i32_0 = arith.constant 0 : i32
    %c0_i32_1 = arith.constant 0 : i32
    return %c0_i32, %c0_i32_0 : i32, i32
  }
  func.func @transform_4(%arg0: i32, %arg1: i32) -> (i32, i32) {
    %c0_i32 = arith.constant 0 : i32
    %c0_i32_0 = arith.constant 0 : i32
    %c0_i32_1 = arith.constant 0 : i32
    return %c0_i32, %c0_i32_0 : i32, i32
  }
  func.func @transform_5(%arg0: i32, %arg1: i32) -> (i32, i32, i32) {
    %c0_i32 = arith.constant 0 : i32
    %c0_i32_0 = arith.constant 0 : i32
    %c0_i32_1 = arith.constant 0 : i32
    return %arg0, %c0_i32, %c0_i32_0 : i32, i32, i32
  }
  func.func @transform_6(%arg0: i32, %arg1: i32) -> (i32, i32, i32) {
    %c0_i32 = arith.constant 0 : i32
    %c0_i32_0 = arith.constant 0 : i32
    %c0_i32_1 = arith.constant 0 : i32
    return %arg0, %c0_i32, %c0_i32_0 : i32, i32, i32
  }
  func.func @transform_7(%arg0: i32, %arg1: i32) -> (i32, i32) {
    %c0_i32 = arith.constant 0 : i32
    %c0_i32_0 = arith.constant 0 : i32
    %c0_i32_1 = arith.constant 0 : i32
    return %c0_i32, %c0_i32_0 : i32, i32
  }
  func.func @transform_8(%arg0: i32, %arg1: i32) -> (i32, i32) {
    %c0_i32 = arith.constant 0 : i32
    %c0_i32_0 = arith.constant 0 : i32
    %c0_i32_1 = arith.constant 0 : i32
    return %c0_i32, %c0_i32_0 : i32, i32
  }
  func.func @transform_9(%arg0: i32, %arg1: i32) -> (i32, i32, i32) {
    %c0_i32 = arith.constant 0 : i32
    %c0_i32_0 = arith.constant 0 : i32
    return %arg0, %arg1, %c0_i32 : i32, i32, i32
  }
}

module attributes {stable_mosaic.version = 11 : i64} {
  func.func @_ln_linear_kernel(%arg0: i32, %arg1: memref<16x128xf32, #tpu.memory_space<vmem>>, %arg2: memref<1x128xf32, #tpu.memory_space<vmem>>, %arg3: memref<1x128xf32, #tpu.memory_space<vmem>>, %arg4: memref<128x256xbf16, #tpu.memory_space<vmem>>, %arg5: memref<1x256xf32, #tpu.memory_space<vmem>>, %arg6: memref<16x256xbf16, #tpu.memory_space<vmem>>) attributes {dimension_semantics = [#tpu.dimension_semantics<parallel>], iteration_bounds = array<i64: 1>, scalar_prefetch = 0 : i64, scratch_operands = 0 : i64, tpu.core_type = #tpu.core_type<tc>, window_params = [{transform_indices = @transform_0, window_bounds = array<i64: 16, 128>}, {pipeline_mode = #tpu.pipeline_mode<synchronous>, transform_indices = @transform_1, window_bounds = array<i64: 1, 128>}, {pipeline_mode = #tpu.pipeline_mode<synchronous>, transform_indices = @transform_2, window_bounds = array<i64: 1, 128>}, {pipeline_mode = #tpu.pipeline_mode<synchronous>, transform_indices = @transform_3, window_bounds = array<i64: 128, 256>}, {pipeline_mode = #tpu.pipeline_mode<synchronous>, transform_indices = @transform_4, window_bounds = array<i64: 1, 256>}, {transform_indices = @transform_5, window_bounds = array<i64: 16, 256>}]} {
    %c0 = arith.constant 0 : index
    %c0_0 = arith.constant 0 : index
    %0 = vector.load %arg1[%c0, %c0_0] : memref<16x128xf32, #tpu.memory_space<vmem>>, vector<16x128xf32>
    %c0_1 = arith.constant 0 : index
    %c0_2 = arith.constant 0 : index
    %1 = vector.load %arg2[%c0_1, %c0_2] : memref<1x128xf32, #tpu.memory_space<vmem>>, vector<1x128xf32>
    %c0_3 = arith.constant 0 : index
    %c0_4 = arith.constant 0 : index
    %2 = vector.load %arg3[%c0_3, %c0_4] : memref<1x128xf32, #tpu.memory_space<vmem>>, vector<1x128xf32>
    %cst = arith.constant dense<0.000000e+00> : vector<16xf32>
    %3 = vector.multi_reduction <add>, %0, %cst [1] : vector<16x128xf32> to vector<16xf32>
    %4 = vector.shape_cast %3 : vector<16xf32> to vector<16x1xf32>
    %cst_5 = arith.constant 1.280000e+02 : f32
    %5 = vector.broadcast %cst_5 : f32 to vector<16x1xf32>
    %6 = arith.divf %4, %5 : vector<16x1xf32>
    %7 = vector.broadcast %6 : vector<16x1xf32> to vector<16x128xf32>
    %8 = arith.subf %0, %7 : vector<16x128xf32>
    %9 = arith.mulf %8, %8 : vector<16x128xf32>
    %cst_6 = arith.constant dense<0.000000e+00> : vector<16xf32>
    %10 = vector.multi_reduction <add>, %9, %cst_6 [1] : vector<16x128xf32> to vector<16xf32>
    %11 = vector.shape_cast %10 : vector<16xf32> to vector<16x1xf32>
    %cst_7 = arith.constant 0.00787401571 : f32
    %12 = vector.broadcast %cst_7 : f32 to vector<16x1xf32>
    %13 = arith.mulf %11, %12 : vector<16x1xf32>
    %14 = math.sqrt %13 : vector<16x1xf32>
    %cst_8 = arith.constant 9.99999997E-7 : f32
    %15 = vector.broadcast %cst_8 : f32 to vector<16x1xf32>
    %16 = arith.addf %14, %15 : vector<16x1xf32>
    %17 = vector.broadcast %16 : vector<16x1xf32> to vector<16x128xf32>
    %18 = arith.divf %8, %17 : vector<16x128xf32>
    %19 = vector.broadcast %1 : vector<1x128xf32> to vector<16x128xf32>
    %20 = arith.mulf %19, %18 : vector<16x128xf32>
    %21 = vector.broadcast %2 : vector<1x128xf32> to vector<16x128xf32>
    %22 = arith.addf %20, %21 : vector<16x128xf32>
    %23 = arith.truncf %22 : vector<16x128xf32> to vector<16x128xbf16>
    %c0_9 = arith.constant 0 : index
    %c0_10 = arith.constant 0 : index
    %24 = vector.load %arg4[%c0_9, %c0_10] : memref<128x256xbf16, #tpu.memory_space<vmem>>, vector<128x256xbf16>
    %cst_11 = arith.constant dense<0.000000e+00> : vector<16x256xf32>
    %25 = tpu.matmul %23, %24, %cst_11 {dimension_numbers = #tpu.dot_dimension_numbers<[1], [0], [0], [1], [0, 0, 1, 1], [], []>} : vector<16x128xbf16>, vector<128x256xbf16>, vector<16x256xf32> -> vector<16x256xf32>
    %c0_12 = arith.constant 0 : index
    %c0_13 = arith.constant 0 : index
    %26 = vector.load %arg5[%c0_12, %c0_13] : memref<1x256xf32, #tpu.memory_space<vmem>>, vector<1x256xf32>
    %27 = vector.broadcast %26 : vector<1x256xf32> to vector<16x256xf32>
    %28 = arith.addf %25, %27 : vector<16x256xf32>
    %29 = arith.truncf %28 : vector<16x256xf32> to vector<16x256xbf16>
    %c0_14 = arith.constant 0 : index
    %c0_15 = arith.constant 0 : index
    %30 = vector.load %arg6[%c0_14, %c0_15] : memref<16x256xbf16, #tpu.memory_space<vmem>>, vector<16x256xbf16>
    tpu.vector_store %arg6[%c0_14, %c0_15], %29 {strides = array<i32>} : memref<16x256xbf16, #tpu.memory_space<vmem>>, vector<16x256xbf16>,
    return
  }
  func.func @transform_0(%arg0: i32) -> (i32, i32) {
    %c0_i32 = arith.constant 0 : i32
    %c0_i32_0 = arith.constant 0 : i32
    return %arg0, %c0_i32 : i32, i32
  }
  func.func @transform_1(%arg0: i32) -> (i32, i32) {
    %c0_i32 = arith.constant 0 : i32
    %c0_i32_0 = arith.constant 0 : i32
    %c0_i32_1 = arith.constant 0 : i32
    return %c0_i32, %c0_i32_0 : i32, i32
  }
  func.func @transform_2(%arg0: i32) -> (i32, i32) {
    %c0_i32 = arith.constant 0 : i32
    %c0_i32_0 = arith.constant 0 : i32
    %c0_i32_1 = arith.constant 0 : i32
    return %c0_i32, %c0_i32_0 : i32, i32
  }
  func.func @transform_3(%arg0: i32) -> (i32, i32) {
    %c0_i32 = arith.constant 0 : i32
    %c0_i32_0 = arith.constant 0 : i32
    %c0_i32_1 = arith.constant 0 : i32
    return %c0_i32, %c0_i32_0 : i32, i32
  }
  func.func @transform_4(%arg0: i32) -> (i32, i32) {
    %c0_i32 = arith.constant 0 : i32
    %c0_i32_0 = arith.constant 0 : i32
    %c0_i32_1 = arith.constant 0 : i32
    return %c0_i32, %c0_i32_0 : i32, i32
  }
  func.func @transform_5(%arg0: i32) -> (i32, i32) {
    %c0_i32 = arith.constant 0 : i32
    %c0_i32_0 = arith.constant 0 : i32
    return %arg0, %c0_i32 : i32, i32
  }
}

module attributes {stable_mosaic.version = 11 : i64} {
  func.func @_linear_kernel(%arg0: i32, %arg1: memref<32x128xbf16, #tpu.memory_space<vmem>>, %arg2: memref<128x256xbf16, #tpu.memory_space<vmem>>, %arg3: memref<1x256xf32, #tpu.memory_space<vmem>>, %arg4: memref<32x256xbf16, #tpu.memory_space<vmem>>) attributes {dimension_semantics = [#tpu.dimension_semantics<parallel>], iteration_bounds = array<i64: 1>, scalar_prefetch = 0 : i64, scratch_operands = 0 : i64, tpu.core_type = #tpu.core_type<tc>, window_params = [{transform_indices = @transform_0, window_bounds = array<i64: 32, 128>}, {pipeline_mode = #tpu.pipeline_mode<synchronous>, transform_indices = @transform_1, window_bounds = array<i64: 128, 256>}, {pipeline_mode = #tpu.pipeline_mode<synchronous>, transform_indices = @transform_2, window_bounds = array<i64: 1, 256>}, {transform_indices = @transform_3, window_bounds = array<i64: 32, 256>}]} {
    %c0 = arith.constant 0 : index
    %c0_0 = arith.constant 0 : index
    %0 = vector.load %arg1[%c0, %c0_0] : memref<32x128xbf16, #tpu.memory_space<vmem>>, vector<32x128xbf16>
    %c0_1 = arith.constant 0 : index
    %c0_2 = arith.constant 0 : index
    %1 = vector.load %arg2[%c0_1, %c0_2] : memref<128x256xbf16, #tpu.memory_space<vmem>>, vector<128x256xbf16>
    %cst = arith.constant dense<0.000000e+00> : vector<32x256xf32>
    %2 = tpu.matmul %0, %1, %cst {dimension_numbers = #tpu.dot_dimension_numbers<[1], [0], [0], [1], [0, 0, 1, 1], [], []>} : vector<32x128xbf16>, vector<128x256xbf16>, vector<32x256xf32> -> vector<32x256xf32>
    %c0_3 = arith.constant 0 : index
    %c0_4 = arith.constant 0 : index
    %3 = vector.load %arg3[%c0_3, %c0_4] : memref<1x256xf32, #tpu.memory_space<vmem>>, vector<1x256xf32>
    %4 = vector.broadcast %3 : vector<1x256xf32> to vector<32x256xf32>
    %5 = arith.addf %2, %4 : vector<32x256xf32>
    %6 = arith.truncf %5 : vector<32x256xf32> to vector<32x256xbf16>
    %c0_5 = arith.constant 0 : index
    %c0_6 = arith.constant 0 : index
    %7 = vector.load %arg4[%c0_5, %c0_6] : memref<32x256xbf16, #tpu.memory_space<vmem>>, vector<32x256xbf16>
    tpu.vector_store %arg4[%c0_5, %c0_6], %6 {strides = array<i32>} : memref<32x256xbf16, #tpu.memory_space<vmem>>, vector<32x256xbf16>,
    return
  }
  func.func @transform_0(%arg0: i32) -> (i32, i32) {
    %c0_i32 = arith.constant 0 : i32
    %c0_i32_0 = arith.constant 0 : i32
    return %arg0, %c0_i32 : i32, i32
  }
  func.func @transform_1(%arg0: i32) -> (i32, i32) {
    %c0_i32 = arith.constant 0 : i32
    %c0_i32_0 = arith.constant 0 : i32
    %c0_i32_1 = arith.constant 0 : i32
    return %c0_i32, %c0_i32_0 : i32, i32
  }
  func.func @transform_2(%arg0: i32) -> (i32, i32) {
    %c0_i32 = arith.constant 0 : i32
    %c0_i32_0 = arith.constant 0 : i32
    %c0_i32_1 = arith.constant 0 : i32
    return %c0_i32, %c0_i32_0 : i32, i32
  }
  func.func @transform_3(%arg0: i32) -> (i32, i32) {
    %c0_i32 = arith.constant 0 : i32
    %c0_i32_0 = arith.constant 0 : i32
    return %arg0, %c0_i32 : i32, i32
  }
}

module attributes {stable_mosaic.version = 11 : i64} {
  func.func @_mha_kernel(%arg0: i32, %arg1: i32, %arg2: memref<1x8x128xf32, #tpu.memory_space<vmem>>, %arg3: memref<1x128xf32, #tpu.memory_space<vmem>>, %arg4: memref<1x128xf32, #tpu.memory_space<vmem>>, %arg5: memref<128x128xbf16, #tpu.memory_space<vmem>>, %arg6: memref<1x128xf32, #tpu.memory_space<vmem>>, %arg7: memref<1x16x256xbf16, #tpu.memory_space<vmem>>, %arg8: memref<1x1x16xf32, #tpu.memory_space<vmem>>, %arg9: memref<128x128xbf16, #tpu.memory_space<vmem>>, %arg10: memref<1x128xf32, #tpu.memory_space<vmem>>, %arg11: memref<1x8x128xf32, #tpu.memory_space<vmem>>, %arg12: memref<8x128xbf16, #tpu.memory_space<vmem>>) attributes {dimension_semantics = [#tpu.dimension_semantics<parallel>, #tpu.dimension_semantics<parallel>], iteration_bounds = array<i64: 2, 1>, scalar_prefetch = 0 : i64, scratch_operands = 1 : i64, tpu.core_type = #tpu.core_type<tc>, window_params = [{transform_indices = @transform_0, window_bounds = array<i64: 1, 8, 128>}, {pipeline_mode = #tpu.pipeline_mode<synchronous>, transform_indices = @transform_1, window_bounds = array<i64: 1, 128>}, {pipeline_mode = #tpu.pipeline_mode<synchronous>, transform_indices = @transform_2, window_bounds = array<i64: 1, 128>}, {pipeline_mode = #tpu.pipeline_mode<synchronous>, transform_indices = @transform_3, window_bounds = array<i64: 128, 128>}, {pipeline_mode = #tpu.pipeline_mode<synchronous>, transform_indices = @transform_4, window_bounds = array<i64: 1, 128>}, {transform_indices = @transform_5, window_bounds = array<i64: 1, 16, 256>}, {transform_indices = @transform_6, window_bounds = array<i64: 1, 1, 16>}, {pipeline_mode = #tpu.pipeline_mode<synchronous>, transform_indices = @transform_7, window_bounds = array<i64: 128, 128>}, {pipeline_mode = #tpu.pipeline_mode<synchronous>, transform_indices = @transform_8, window_bounds = array<i64: 1, 128>}, {transform_indices = @transform_9, window_bounds = array<i64: 1, 8, 128>}]} {
    %c0 = arith.constant 0 : index
    %c0_0 = arith.constant 0 : index
    %c0_1 = arith.constant 0 : index
    %0 = vector.load %arg2[%c0, %c0_0, %c0_1] : memref<1x8x128xf32, #tpu.memory_space<vmem>>, vector<1x8x128xf32>
    %1 = vector.shape_cast %0 : vector<1x8x128xf32> to vector<8x128xf32>
    %c0_2 = arith.constant 0 : index
    %c0_3 = arith.constant 0 : index
    %2 = vector.load %arg3[%c0_2, %c0_3] : memref<1x128xf32, #tpu.memory_space<vmem>>, vector<1x128xf32>
    %c0_4 = arith.constant 0 : index
    %c0_5 = arith.constant 0 : index
    %3 = vector.load %arg4[%c0_4, %c0_5] : memref<1x128xf32, #tpu.memory_space<vmem>>, vector<1x128xf32>
    %cst = arith.constant dense<0.000000e+00> : vector<8xf32>
    %4 = vector.multi_reduction <add>, %1, %cst [1] : vector<8x128xf32> to vector<8xf32>
    %5 = vector.shape_cast %4 : vector<8xf32> to vector<8x1xf32>
    %cst_6 = arith.constant 1.280000e+02 : f32
    %6 = vector.broadcast %cst_6 : f32 to vector<8x1xf32>
    %7 = arith.divf %5, %6 : vector<8x1xf32>
    %8 = vector.broadcast %7 : vector<8x1xf32> to vector<8x128xf32>
    %9 = arith.subf %1, %8 : vector<8x128xf32>
    %10 = arith.mulf %9, %9 : vector<8x128xf32>
    %cst_7 = arith.constant dense<0.000000e+00> : vector<8xf32>
    %11 = vector.multi_reduction <add>, %10, %cst_7 [1] : vector<8x128xf32> to vector<8xf32>
    %12 = vector.shape_cast %11 : vector<8xf32> to vector<8x1xf32>
    %cst_8 = arith.constant 0.00787401571 : f32
    %13 = vector.broadcast %cst_8 : f32 to vector<8x1xf32>
    %14 = arith.mulf %12, %13 : vector<8x1xf32>
    %15 = math.sqrt %14 : vector<8x1xf32>
    %cst_9 = arith.constant 9.99999997E-7 : f32
    %16 = vector.broadcast %cst_9 : f32 to vector<8x1xf32>
    %17 = arith.addf %15, %16 : vector<8x1xf32>
    %18 = vector.broadcast %17 : vector<8x1xf32> to vector<8x128xf32>
    %19 = arith.divf %9, %18 : vector<8x128xf32>
    %20 = vector.broadcast %2 : vector<1x128xf32> to vector<8x128xf32>
    %21 = arith.mulf %20, %19 : vector<8x128xf32>
    %22 = vector.broadcast %3 : vector<1x128xf32> to vector<8x128xf32>
    %23 = arith.addf %21, %22 : vector<8x128xf32>
    %24 = arith.truncf %23 : vector<8x128xf32> to vector<8x128xbf16>
    %c0_10 = arith.constant 0 : index
    %c0_11 = arith.constant 0 : index
    %25 = vector.load %arg5[%c0_10, %c0_11] : memref<128x128xbf16, #tpu.memory_space<vmem>>, vector<128x128xbf16>
    %cst_12 = arith.constant dense<0.000000e+00> : vector<8x128xf32>
    %26 = tpu.matmul %24, %25, %cst_12 {dimension_numbers = #tpu.dot_dimension_numbers<[1], [0], [0], [1], [0, 0, 1, 1], [], []>} : vector<8x128xbf16>, vector<128x128xbf16>, vector<8x128xf32> -> vector<8x128xf32>
    %c0_13 = arith.constant 0 : index
    %c0_14 = arith.constant 0 : index
    %27 = vector.load %arg6[%c0_13, %c0_14] : memref<1x128xf32, #tpu.memory_space<vmem>>, vector<1x128xf32>
    %28 = vector.broadcast %27 : vector<1x128xf32> to vector<8x128xf32>
    %29 = arith.addf %26, %28 : vector<8x128xf32>
    %30 = arith.truncf %29 : vector<8x128xf32> to vector<8x128xbf16>
    %c0_15 = arith.constant 0 : index
    %c0_16 = arith.constant 0 : index
    %c0_17 = arith.constant 0 : index
    %31 = vector.load %arg8[%c0_15, %c0_16, %c0_17] : memref<1x1x16xf32, #tpu.memory_space<vmem>>, vector<1x1x16xf32>
    %32 = vector.shape_cast %31 : vector<1x1x16xf32> to vector<1x16xf32>
    %c0_18 = arith.constant 0 : index
    %c0_19 = arith.constant 0 : index
    %c0_20 = arith.constant 0 : index
    %33 = vector.load %arg7[%c0_18, %c0_19, %c0_20] : memref<1x16x256xbf16, #tpu.memory_space<vmem>>, vector<1x16x128xbf16>
    %34 = vector.shape_cast %33 : vector<1x16x128xbf16> to vector<16x128xbf16>
    %c0_21 = arith.constant 0 : index
    %c0_22 = arith.constant 0 : index
    %c128 = arith.constant 128 : index
    %35 = vector.load %arg7[%c0_21, %c0_22, %c128] : memref<1x16x256xbf16, #tpu.memory_space<vmem>>, vector<1x16x128xbf16>
    %36 = vector.shape_cast %35 : vector<1x16x128xbf16> to vector<16x128xbf16>
    %37 = vector.extract_strided_slice %30 {offsets = [0, 0], sizes = [8, 32], strides = [1, 1]} : vector<8x128xbf16> to vector<8x32xbf16>
    %38 = vector.extract_strided_slice %34 {offsets = [0, 0], sizes = [16, 32], strides = [1, 1]} : vector<16x128xbf16> to vector<16x32xbf16>
    %39 = vector.extract_strided_slice %36 {offsets = [0, 0], sizes = [16, 32], strides = [1, 1]} : vector<16x128xbf16> to vector<16x32xbf16>
    %cst_23 = arith.constant dense<0.000000e+00> : vector<8x16xf32>
    %40 = tpu.matmul %37, %38, %cst_23 {dimension_numbers = #tpu.dot_dimension_numbers<[1], [1], [0], [0], [0, 0, 1, 0], [], []>} : vector<8x32xbf16>, vector<16x32xbf16>, vector<8x16xf32> -> vector<8x16xf32>
    %41 = vector.broadcast %32 : vector<1x16xf32> to vector<8x16xf32>
    %42 = arith.addf %40, %41 : vector<8x16xf32>
    %cst_24 = arith.constant dense<0xFF800000> : vector<8xf32>
    %43 = vector.multi_reduction <maximumf>, %42, %cst_24 [1] : vector<8x16xf32> to vector<8xf32>
    %44 = vector.shape_cast %43 : vector<8xf32> to vector<8x1xf32>
    %45 = vector.broadcast %44 : vector<8x1xf32> to vector<8x16xf32>
    %46 = arith.subf %42, %45 : vector<8x16xf32>
    %47 = math.exp %46 : vector<8x16xf32>
    %cst_25 = arith.constant dense<0.000000e+00> : vector<8xf32>
    %48 = vector.multi_reduction <add>, %47, %cst_25 [1] : vector<8x16xf32> to vector<8xf32>
    %49 = vector.shape_cast %48 : vector<8xf32> to vector<8x1xf32>
    %50 = tpu.reciprocal %49 {approx = true} : vector<8x1xf32> -> vector<8x1xf32>
    %51 = vector.broadcast %50 : vector<8x1xf32> to vector<8x16xf32>
    %52 = arith.mulf %47, %51 : vector<8x16xf32>
    %53 = arith.truncf %52 : vector<8x16xf32> to vector<8x16xbf16>
    %cst_26 = arith.constant dense<0.000000e+00> : vector<8x32xf32>
    %54 = tpu.matmul %53, %39, %cst_26 {dimension_numbers = #tpu.dot_dimension_numbers<[1], [0], [0], [1], [0, 0, 1, 1], [], []>} : vector<8x16xbf16>, vector<16x32xbf16>, vector<8x32xf32> -> vector<8x32xf32>
    %55 = arith.truncf %54 : vector<8x32xf32> to vector<8x32xbf16>
    %c0_27 = arith.constant 0 : index
    %c0_28 = arith.constant 0 : index
    %56 = vector.load %arg12[%c0_27, %c0_28] : memref<8x128xbf16, #tpu.memory_space<vmem>>, vector<8x32xbf16>
    tpu.vector_store %arg12[%c0_27, %c0_28], %55 {strides = array<i32>} : memref<8x128xbf16, #tpu.memory_space<vmem>>, vector<8x32xbf16>,
    %57 = vector.extract_strided_slice %30 {offsets = [0, 32], sizes = [8, 32], strides = [1, 1]} : vector<8x128xbf16> to vector<8x32xbf16>
    %58 = vector.extract_strided_slice %34 {offsets = [0, 32], sizes = [16, 32], strides = [1, 1]} : vector<16x128xbf16> to vector<16x32xbf16>
    %59 = vector.extract_strided_slice %36 {offsets = [0, 32], sizes = [16, 32], strides = [1, 1]} : vector<16x128xbf16> to vector<16x32xbf16>
    %cst_29 = arith.constant dense<0.000000e+00> : vector<8x16xf32>
    %60 = tpu.matmul %57, %58, %cst_29 {dimension_numbers = #tpu.dot_dimension_numbers<[1], [1], [0], [0], [0, 0, 1, 0], [], []>} : vector<8x32xbf16>, vector<16x32xbf16>, vector<8x16xf32> -> vector<8x16xf32>
    %61 = vector.broadcast %32 : vector<1x16xf32> to vector<8x16xf32>
    %62 = arith.addf %60, %61 : vector<8x16xf32>
    %cst_30 = arith.constant dense<0xFF800000> : vector<8xf32>
    %63 = vector.multi_reduction <maximumf>, %62, %cst_30 [1] : vector<8x16xf32> to vector<8xf32>
    %64 = vector.shape_cast %63 : vector<8xf32> to vector<8x1xf32>
    %65 = vector.broadcast %64 : vector<8x1xf32> to vector<8x16xf32>
    %66 = arith.subf %62, %65 : vector<8x16xf32>
    %67 = math.exp %66 : vector<8x16xf32>
    %cst_31 = arith.constant dense<0.000000e+00> : vector<8xf32>
    %68 = vector.multi_reduction <add>, %67, %cst_31 [1] : vector<8x16xf32> to vector<8xf32>
    %69 = vector.shape_cast %68 : vector<8xf32> to vector<8x1xf32>
    %70 = tpu.reciprocal %69 {approx = true} : vector<8x1xf32> -> vector<8x1xf32>
    %71 = vector.broadcast %70 : vector<8x1xf32> to vector<8x16xf32>
    %72 = arith.mulf %67, %71 : vector<8x16xf32>
    %73 = arith.truncf %72 : vector<8x16xf32> to vector<8x16xbf16>
    %cst_32 = arith.constant dense<0.000000e+00> : vector<8x32xf32>
    %74 = tpu.matmul %73, %59, %cst_32 {dimension_numbers = #tpu.dot_dimension_numbers<[1], [0], [0], [1], [0, 0, 1, 1], [], []>} : vector<8x16xbf16>, vector<16x32xbf16>, vector<8x32xf32> -> vector<8x32xf32>
    %75 = arith.truncf %74 : vector<8x32xf32> to vector<8x32xbf16>
    %c0_33 = arith.constant 0 : index
    %c32 = arith.constant 32 : index
    %76 = vector.load %arg12[%c0_33, %c32] : memref<8x128xbf16, #tpu.memory_space<vmem>>, vector<8x32xbf16>
    tpu.vector_store %arg12[%c0_33, %c32], %75 {strides = array<i32>} : memref<8x128xbf16, #tpu.memory_space<vmem>>, vector<8x32xbf16>,
    %77 = vector.extract_strided_slice %30 {offsets = [0, 64], sizes = [8, 32], strides = [1, 1]} : vector<8x128xbf16> to vector<8x32xbf16>
    %78 = vector.extract_strided_slice %34 {offsets = [0, 64], sizes = [16, 32], strides = [1, 1]} : vector<16x128xbf16> to vector<16x32xbf16>
    %79 = vector.extract_strided_slice %36 {offsets = [0, 64], sizes = [16, 32], strides = [1, 1]} : vector<16x128xbf16> to vector<16x32xbf16>
    %cst_34 = arith.constant dense<0.000000e+00> : vector<8x16xf32>
    %80 = tpu.matmul %77, %78, %cst_34 {dimension_numbers = #tpu.dot_dimension_numbers<[1], [1], [0], [0], [0, 0, 1, 0], [], []>} : vector<8x32xbf16>, vector<16x32xbf16>, vector<8x16xf32> -> vector<8x16xf32>
    %81 = vector.broadcast %32 : vector<1x16xf32> to vector<8x16xf32>
    %82 = arith.addf %80, %81 : vector<8x16xf32>
    %cst_35 = arith.constant dense<0xFF800000> : vector<8xf32>
    %83 = vector.multi_reduction <maximumf>, %82, %cst_35 [1] : vector<8x16xf32> to vector<8xf32>
    %84 = vector.shape_cast %83 : vector<8xf32> to vector<8x1xf32>
    %85 = vector.broadcast %84 : vector<8x1xf32> to vector<8x16xf32>
    %86 = arith.subf %82, %85 : vector<8x16xf32>
    %87 = math.exp %86 : vector<8x16xf32>
    %cst_36 = arith.constant dense<0.000000e+00> : vector<8xf32>
    %88 = vector.multi_reduction <add>, %87, %cst_36 [1] : vector<8x16xf32> to vector<8xf32>
    %89 = vector.shape_cast %88 : vector<8xf32> to vector<8x1xf32>
    %90 = tpu.reciprocal %89 {approx = true} : vector<8x1xf32> -> vector<8x1xf32>
    %91 = vector.broadcast %90 : vector<8x1xf32> to vector<8x16xf32>
    %92 = arith.mulf %87, %91 : vector<8x16xf32>
    %93 = arith.truncf %92 : vector<8x16xf32> to vector<8x16xbf16>
    %cst_37 = arith.constant dense<0.000000e+00> : vector<8x32xf32>
    %94 = tpu.matmul %93, %79, %cst_37 {dimension_numbers = #tpu.dot_dimension_numbers<[1], [0], [0], [1], [0, 0, 1, 1], [], []>} : vector<8x16xbf16>, vector<16x32xbf16>, vector<8x32xf32> -> vector<8x32xf32>
    %95 = arith.truncf %94 : vector<8x32xf32> to vector<8x32xbf16>
    %c0_38 = arith.constant 0 : index
    %c64 = arith.constant 64 : index
    %96 = vector.load %arg12[%c0_38, %c64] : memref<8x128xbf16, #tpu.memory_space<vmem>>, vector<8x32xbf16>
    tpu.vector_store %arg12[%c0_38, %c64], %95 {strides = array<i32>} : memref<8x128xbf16, #tpu.memory_space<vmem>>, vector<8x32xbf16>,
    %97 = vector.extract_strided_slice %30 {offsets = [0, 96], sizes = [8, 32], strides = [1, 1]} : vector<8x128xbf16> to vector<8x32xbf16>
    %98 = vector.extract_strided_slice %34 {offsets = [0, 96], sizes = [16, 32], strides = [1, 1]} : vector<16x128xbf16> to vector<16x32xbf16>
    %99 = vector.extract_strided_slice %36 {offsets = [0, 96], sizes = [16, 32], strides = [1, 1]} : vector<16x128xbf16> to vector<16x32xbf16>
    %cst_39 = arith.constant dense<0.000000e+00> : vector<8x16xf32>
    %100 = tpu.matmul %97, %98, %cst_39 {dimension_numbers = #tpu.dot_dimension_numbers<[1], [1], [0], [0], [0, 0, 1, 0], [], []>} : vector<8x32xbf16>, vector<16x32xbf16>, vector<8x16xf32> -> vector<8x16xf32>
    %101 = vector.broadcast %32 : vector<1x16xf32> to vector<8x16xf32>
    %102 = arith.addf %100, %101 : vector<8x16xf32>
    %cst_40 = arith.constant dense<0xFF800000> : vector<8xf32>
    %103 = vector.multi_reduction <maximumf>, %102, %cst_40 [1] : vector<8x16xf32> to vector<8xf32>
    %104 = vector.shape_cast %103 : vector<8xf32> to vector<8x1xf32>
    %105 = vector.broadcast %104 : vector<8x1xf32> to vector<8x16xf32>
    %106 = arith.subf %102, %105 : vector<8x16xf32>
    %107 = math.exp %106 : vector<8x16xf32>
    %cst_41 = arith.constant dense<0.000000e+00> : vector<8xf32>
    %108 = vector.multi_reduction <add>, %107, %cst_41 [1] : vector<8x16xf32> to vector<8xf32>
    %109 = vector.shape_cast %108 : vector<8xf32> to vector<8x1xf32>
    %110 = tpu.reciprocal %109 {approx = true} : vector<8x1xf32> -> vector<8x1xf32>
    %111 = vector.broadcast %110 : vector<8x1xf32> to vector<8x16xf32>
    %112 = arith.mulf %107, %111 : vector<8x16xf32>
    %113 = arith.truncf %112 : vector<8x16xf32> to vector<8x16xbf16>
    %cst_42 = arith.constant dense<0.000000e+00> : vector<8x32xf32>
    %114 = tpu.matmul %113, %99, %cst_42 {dimension_numbers = #tpu.dot_dimension_numbers<[1], [0], [0], [1], [0, 0, 1, 1], [], []>} : vector<8x16xbf16>, vector<16x32xbf16>, vector<8x32xf32> -> vector<8x32xf32>
    %115 = arith.truncf %114 : vector<8x32xf32> to vector<8x32xbf16>
    %c0_43 = arith.constant 0 : index
    %c96 = arith.constant 96 : index
    %116 = vector.load %arg12[%c0_43, %c96] : memref<8x128xbf16, #tpu.memory_space<vmem>>, vector<8x32xbf16>
    tpu.vector_store %arg12[%c0_43, %c96], %115 {strides = array<i32>} : memref<8x128xbf16, #tpu.memory_space<vmem>>, vector<8x32xbf16>,
    %c0_44 = arith.constant 0 : index
    %c0_45 = arith.constant 0 : index
    %117 = vector.load %arg12[%c0_44, %c0_45] : memref<8x128xbf16, #tpu.memory_space<vmem>>, vector<8x128xbf16>
    %c0_46 = arith.constant 0 : index
    %c0_47 = arith.constant 0 : index
    %118 = vector.load %arg9[%c0_46, %c0_47] : memref<128x128xbf16, #tpu.memory_space<vmem>>, vector<128x128xbf16>
    %cst_48 = arith.constant dense<0.000000e+00> : vector<8x128xf32>
    %119 = tpu.matmul %117, %118, %cst_48 {dimension_numbers = #tpu.dot_dimension_numbers<[1], [0], [0], [1], [0, 0, 1, 1], [], []>} : vector<8x128xbf16>, vector<128x128xbf16>, vector<8x128xf32> -> vector<8x128xf32>
    %120 = arith.addf %1, %119 : vector<8x128xf32>
    %c0_49 = arith.constant 0 : index
    %c0_50 = arith.constant 0 : index
    %121 = vector.load %arg10[%c0_49, %c0_50] : memref<1x128xf32, #tpu.memory_space<vmem>>, vector<1x128xf32>
    %122 = vector.broadcast %121 : vector<1x128xf32> to vector<8x128xf32>
    %123 = arith.addf %120, %122 : vector<8x128xf32>
    %c0_51 = arith.constant 0 : index
    %c0_52 = arith.constant 0 : index
    %c0_53 = arith.constant 0 : index
    %124 = vector.load %arg11[%c0_51, %c0_52, %c0_53] : memref<1x8x128xf32, #tpu.memory_space<vmem>>, vector<1x8x128xf32>
    %125 = vector.shape_cast %124 : vector<1x8x128xf32> to vector<8x128xf32>
    %126 = vector.shape_cast %123 : vector<8x128xf32> to vector<1x8x128xf32>
    tpu.vector_store %arg11[%c0_51, %c0_52, %c0_53], %126 {strides = array<i32>} : memref<1x8x128xf32, #tpu.memory_space<vmem>>, vector<1x8x128xf32>,
    return
  }
  func.func @transform_0(%arg0: i32, %arg1: i32) -> (i32, i32, i32) {
    %c0_i32 = arith.constant 0 : i32
    %c0_i32_0 = arith.constant 0 : i32
    return %arg0, %arg1, %c0_i32 : i32, i32, i32
  }
  func.func @transform_1(%arg0: i32, %arg1: i32) -> (i32, i32) {
    %c0_i32 = arith.constant 0 : i32
    %c0_i32_0 = arith.constant 0 : i32
    %c0_i32_1 = arith.constant 0 : i32
    return %c0_i32, %c0_i32_0 : i32, i32
  }
  func.func @transform_2(%arg0: i32, %arg1: i32) -> (i32, i32) {
    %c0_i32 = arith.constant 0 : i32
    %c0_i32_0 = arith.constant 0 : i32
    %c0_i32_1 = arith.constant 0 : i32
    return %c0_i32, %c0_i32_0 : i32, i32
  }
  func.func @transform_3(%arg0: i32, %arg1: i32) -> (i32, i32) {
    %c0_i32 = arith.constant 0 : i32
    %c0_i32_0 = arith.constant 0 : i32
    %c0_i32_1 = arith.constant 0 : i32
    return %c0_i32, %c0_i32_0 : i32, i32
  }
  func.func @transform_4(%arg0: i32, %arg1: i32) -> (i32, i32) {
    %c0_i32 = arith.constant 0 : i32
    %c0_i32_0 = arith.constant 0 : i32
    %c0_i32_1 = arith.constant 0 : i32
    return %c0_i32, %c0_i32_0 : i32, i32
  }
  func.func @transform_5(%arg0: i32, %arg1: i32) -> (i32, i32, i32) {
    %c0_i32 = arith.constant 0 : i32
    %c0_i32_0 = arith.constant 0 : i32
    %c0_i32_1 = arith.constant 0 : i32
    return %arg0, %c0_i32, %c0_i32_0 : i32, i32, i32
  }
  func.func @transform_6(%arg0: i32, %arg1: i32) -> (i32, i32, i32) {
    %c0_i32 = arith.constant 0 : i32
    %c0_i32_0 = arith.constant 0 : i32
    %c0_i32_1 = arith.constant 0 : i32
    return %arg0, %c0_i32, %c0_i32_0 : i32, i32, i32
  }
  func.func @transform_7(%arg0: i32, %arg1: i32) -> (i32, i32) {
    %c0_i32 = arith.constant 0 : i32
    %c0_i32_0 = arith.constant 0 : i32
    %c0_i32_1 = arith.constant 0 : i32
    return %c0_i32, %c0_i32_0 : i32, i32
  }
  func.func @transform_8(%arg0: i32, %arg1: i32) -> (i32, i32) {
    %c0_i32 = arith.constant 0 : i32
    %c0_i32_0 = arith.constant 0 : i32
    %c0_i32_1 = arith.constant 0 : i32
    return %c0_i32, %c0_i32_0 : i32, i32
  }
  func.func @transform_9(%arg0: i32, %arg1: i32) -> (i32, i32, i32) {
    %c0_i32 = arith.constant 0 : i32
    %c0_i32_0 = arith.constant 0 : i32
    return %arg0, %arg1, %c0_i32 : i32, i32, i32
  }
}

module attributes {stable_mosaic.version = 11 : i64} {
  func.func @_ln_ffn_kernel(%arg0: i32, %arg1: i32, %arg2: memref<16x128xf32, #tpu.memory_space<vmem>>, %arg3: memref<1x128xf32, #tpu.memory_space<vmem>>, %arg4: memref<1x128xf32, #tpu.memory_space<vmem>>, %arg5: memref<128x256xbf16, #tpu.memory_space<vmem>>, %arg6: memref<1x256xf32, #tpu.memory_space<vmem>>, %arg7: memref<256x128xbf16, #tpu.memory_space<vmem>>, %arg8: memref<1x128xf32, #tpu.memory_space<vmem>>, %arg9: memref<16x128xf32, #tpu.memory_space<vmem>>, %arg10: memref<16x128xbf16, #tpu.memory_space<vmem>>, %arg11: memref<16x128xf32, #tpu.memory_space<vmem>>) attributes {dimension_semantics = [#tpu.dimension_semantics<parallel>, #tpu.dimension_semantics<arbitrary>], iteration_bounds = array<i64: 1, 1>, scalar_prefetch = 0 : i64, scratch_operands = 2 : i64, tpu.core_type = #tpu.core_type<tc>, window_params = [{transform_indices = @transform_0, window_bounds = array<i64: 16, 128>}, {pipeline_mode = #tpu.pipeline_mode<synchronous>, transform_indices = @transform_1, window_bounds = array<i64: 1, 128>}, {pipeline_mode = #tpu.pipeline_mode<synchronous>, transform_indices = @transform_2, window_bounds = array<i64: 1, 128>}, {transform_indices = @transform_3, window_bounds = array<i64: 128, 256>}, {transform_indices = @transform_4, window_bounds = array<i64: 1, 256>}, {transform_indices = @transform_5, window_bounds = array<i64: 256, 128>}, {pipeline_mode = #tpu.pipeline_mode<synchronous>, transform_indices = @transform_6, window_bounds = array<i64: 1, 128>}, {transform_indices = @transform_7, window_bounds = array<i64: 16, 128>}]} {
    %c0_i32 = arith.constant 0 : i32
    %0 = arith.cmpi eq, %arg1, %c0_i32 : i32
    %1 = arith.extui %0 : i1 to i32
    %c0_i32_0 = arith.constant 0 : i32
    %2 = arith.cmpi ne, %1, %c0_i32_0 : i32
    scf.if %2 {
      %c0_16 = arith.constant 0 : index
      %c0_17 = arith.constant 0 : index
      %20 = vector.load %arg2[%c0_16, %c0_17] : memref<16x128xf32, #tpu.memory_space<vmem>>, vector<16x128xf32>
      %c0_18 = arith.constant 0 : index
      %c0_19 = arith.constant 0 : index
      %21 = vector.load %arg3[%c0_18, %c0_19] : memref<1x128xf32, #tpu.memory_space<vmem>>, vector<1x128xf32>
      %c0_20 = arith.constant 0 : index
      %c0_21 = arith.constant 0 : index
      %22 = vector.load %arg4[%c0_20, %c0_21] : memref<1x128xf32, #tpu.memory_space<vmem>>, vector<1x128xf32>
      %cst_22 = arith.constant dense<0.000000e+00> : vector<16xf32>
      %23 = vector.multi_reduction <add>, %20, %cst_22 [1] : vector<16x128xf32> to vector<16xf32>
      %24 = vector.shape_cast %23 : vector<16xf32> to vector<16x1xf32>
      %cst_23 = arith.constant 1.280000e+02 : f32
      %25 = vector.broadcast %cst_23 : f32 to vector<16x1xf32>
      %26 = arith.divf %24, %25 : vector<16x1xf32>
      %27 = vector.broadcast %26 : vector<16x1xf32> to vector<16x128xf32>
      %28 = arith.subf %20, %27 : vector<16x128xf32>
      %29 = arith.mulf %28, %28 : vector<16x128xf32>
      %cst_24 = arith.constant dense<0.000000e+00> : vector<16xf32>
      %30 = vector.multi_reduction <add>, %29, %cst_24 [1] : vector<16x128xf32> to vector<16xf32>
      %31 = vector.shape_cast %30 : vector<16xf32> to vector<16x1xf32>
      %cst_25 = arith.constant 0.00787401571 : f32
      %32 = vector.broadcast %cst_25 : f32 to vector<16x1xf32>
      %33 = arith.mulf %31, %32 : vector<16x1xf32>
      %34 = math.sqrt %33 : vector<16x1xf32>
      %cst_26 = arith.constant 9.99999997E-7 : f32
      %35 = vector.broadcast %cst_26 : f32 to vector<16x1xf32>
      %36 = arith.addf %34, %35 : vector<16x1xf32>
      %37 = vector.broadcast %36 : vector<16x1xf32> to vector<16x128xf32>
      %38 = arith.divf %28, %37 : vector<16x128xf32>
      %39 = vector.broadcast %21 : vector<1x128xf32> to vector<16x128xf32>
      %40 = arith.mulf %39, %38 : vector<16x128xf32>
      %41 = vector.broadcast %22 : vector<1x128xf32> to vector<16x128xf32>
      %42 = arith.addf %40, %41 : vector<16x128xf32>
      %43 = arith.truncf %42 : vector<16x128xf32> to vector<16x128xbf16>
      %c0_27 = arith.constant 0 : index
      %c0_28 = arith.constant 0 : index
      %44 = vector.load %arg10[%c0_27, %c0_28] : memref<16x128xbf16, #tpu.memory_space<vmem>>, vector<16x128xbf16>
      tpu.vector_store %arg10[%c0_27, %c0_28], %43 {strides = array<i32>} : memref<16x128xbf16, #tpu.memory_space<vmem>>, vector<16x128xbf16>,
      %c0_29 = arith.constant 0 : index
      %c0_30 = arith.constant 0 : index
      %45 = vector.load %arg8[%c0_29, %c0_30] : memref<1x128xf32, #tpu.memory_space<vmem>>, vector<1x128xf32>
      %46 = vector.broadcast %45 : vector<1x128xf32> to vector<16x128xf32>
      %47 = arith.addf %20, %46 : vector<16x128xf32>
      %c0_31 = arith.constant 0 : index
      %c0_32 = arith.constant 0 : index
      %48 = vector.load %arg11[%c0_31, %c0_32] : memref<16x128xf32, #tpu.memory_space<vmem>>, vector<16x128xf32>
      tpu.vector_store %arg11[%c0_31, %c0_32], %47 {strides = array<i32>} : memref<16x128xf32, #tpu.memory_space<vmem>>, vector<16x128xf32>,
    } else {
    }
    %c0 = arith.constant 0 : index
    %c0_1 = arith.constant 0 : index
    %3 = vector.load %arg10[%c0, %c0_1] : memref<16x128xbf16, #tpu.memory_space<vmem>>, vector<16x128xbf16>
    %c0_2 = arith.constant 0 : index
    %c0_3 = arith.constant 0 : index
    %4 = vector.load %arg5[%c0_2, %c0_3] : memref<128x256xbf16, #tpu.memory_space<vmem>>, vector<128x256xbf16>
    %cst = arith.constant dense<0.000000e+00> : vector<16x256xf32>
    %5 = tpu.matmul %3, %4, %cst {dimension_numbers = #tpu.dot_dimension_numbers<[1], [0], [0], [1], [0, 0, 1, 1], [], []>} : vector<16x128xbf16>, vector<128x256xbf16>, vector<16x256xf32> -> vector<16x256xf32>
    %c0_4 = arith.constant 0 : index
    %c0_5 = arith.constant 0 : index
    %6 = vector.load %arg6[%c0_4, %c0_5] : memref<1x256xf32, #tpu.memory_space<vmem>>, vector<1x256xf32>
    %7 = vector.broadcast %6 : vector<1x256xf32> to vector<16x256xf32>
    %8 = arith.addf %5, %7 : vector<16x256xf32>
    %cst_6 = arith.constant 0.000000e+00 : f32
    %9 = vector.broadcast %cst_6 : f32 to vector<16x256xf32>
    %10 = arith.maximumf %8, %9 : vector<16x256xf32>
    %11 = arith.truncf %10 : vector<16x256xf32> to vector<16x256xbf16>
    %c0_7 = arith.constant 0 : index
    %c0_8 = arith.constant 0 : index
    %12 = vector.load %arg11[%c0_7, %c0_8] : memref<16x128xf32, #tpu.memory_space<vmem>>, vector<16x128xf32>
    %c0_9 = arith.constant 0 : index
    %c0_10 = arith.constant 0 : index
    %13 = vector.load %arg7[%c0_9, %c0_10] : memref<256x128xbf16, #tpu.memory_space<vmem>>, vector<256x128xbf16>
    %cst_11 = arith.constant dense<0.000000e+00> : vector<16x128xf32>
    %14 = tpu.matmul %11, %13, %cst_11 {dimension_numbers = #tpu.dot_dimension_numbers<[1], [0], [0], [1], [0, 0, 1, 1], [], []>} : vector<16x256xbf16>, vector<256x128xbf16>, vector<16x128xf32> -> vector<16x128xf32>
    %15 = arith.addf %12, %14 : vector<16x128xf32>
    %c0_12 = arith.constant 0 : index
    %c0_13 = arith.constant 0 : index
    %16 = vector.load %arg11[%c0_12, %c0_13] : memref<16x128xf32, #tpu.memory_space<vmem>>, vector<16x128xf32>
    tpu.vector_store %arg11[%c0_12, %c0_13], %15 {strides = array<i32>} : memref<16x128xf32, #tpu.memory_space<vmem>>, vector<16x128xf32>,
    %c0_i32_14 = arith.constant 0 : i32
    %17 = arith.cmpi eq, %arg1, %c0_i32_14 : i32
    %18 = arith.extui %17 : i1 to i32
    %c0_i32_15 = arith.constant 0 : i32
    %19 = arith.cmpi ne, %18, %c0_i32_15 : i32
    scf.if %19 {
      %c0_16 = arith.constant 0 : index
      %c0_17 = arith.constant 0 : index
      %20 = vector.load %arg11[%c0_16, %c0_17] : memref<16x128xf32, #tpu.memory_space<vmem>>, vector<16x128xf32>
      %c0_18 = arith.constant 0 : index
      %c0_19 = arith.constant 0 : index
      %21 = vector.load %arg9[%c0_18, %c0_19] : memref<16x128xf32, #tpu.memory_space<vmem>>, vector<16x128xf32>
      tpu.vector_store %arg9[%c0_18, %c0_19], %20 {strides = array<i32>} : memref<16x128xf32, #tpu.memory_space<vmem>>, vector<16x128xf32>,
    } else {
    }
    return
  }
  func.func @transform_0(%arg0: i32, %arg1: i32) -> (i32, i32) {
    %c0_i32 = arith.constant 0 : i32
    %c0_i32_0 = arith.constant 0 : i32
    return %arg0, %c0_i32 : i32, i32
  }
  func.func @transform_1(%arg0: i32, %arg1: i32) -> (i32, i32) {
    %c0_i32 = arith.constant 0 : i32
    %c0_i32_0 = arith.constant 0 : i32
    %c0_i32_1 = arith.constant 0 : i32
    return %c0_i32, %c0_i32_0 : i32, i32
  }
  func.func @transform_2(%arg0: i32, %arg1: i32) -> (i32, i32) {
    %c0_i32 = arith.constant 0 : i32
    %c0_i32_0 = arith.constant 0 : i32
    %c0_i32_1 = arith.constant 0 : i32
    return %c0_i32, %c0_i32_0 : i32, i32
  }
  func.func @transform_3(%arg0: i32, %arg1: i32) -> (i32, i32) {
    %c0_i32 = arith.constant 0 : i32
    %c0_i32_0 = arith.constant 0 : i32
    return %c0_i32, %arg1 : i32, i32
  }
  func.func @transform_4(%arg0: i32, %arg1: i32) -> (i32, i32) {
    %c0_i32 = arith.constant 0 : i32
    %c0_i32_0 = arith.constant 0 : i32
    return %c0_i32, %arg1 : i32, i32
  }
  func.func @transform_5(%arg0: i32, %arg1: i32) -> (i32, i32) {
    %c0_i32 = arith.constant 0 : i32
    %c0_i32_0 = arith.constant 0 : i32
    return %arg1, %c0_i32 : i32, i32
  }
  func.func @transform_6(%arg0: i32, %arg1: i32) -> (i32, i32) {
    %c0_i32 = arith.constant 0 : i32
    %c0_i32_0 = arith.constant 0 : i32
    %c0_i32_1 = arith.constant 0 : i32
    return %c0_i32, %c0_i32_0 : i32, i32
  }
  func.func @transform_7(%arg0: i32, %arg1: i32) -> (i32, i32) {
    %c0_i32 = arith.constant 0 : i32
    %c0_i32_0 = arith.constant 0 : i32
    return %arg0, %c0_i32 : i32, i32
  }
}

module attributes {stable_mosaic.version = 11 : i64} {
  func.func @_layernorm_kernel(%arg0: i32, %arg1: memref<16x128xf32, #tpu.memory_space<vmem>>, %arg2: memref<1x128xf32, #tpu.memory_space<vmem>>, %arg3: memref<1x128xf32, #tpu.memory_space<vmem>>, %arg4: memref<16x128xf32, #tpu.memory_space<vmem>>) attributes {dimension_semantics = [#tpu.dimension_semantics<parallel>], iteration_bounds = array<i64: 1>, scalar_prefetch = 0 : i64, scratch_operands = 0 : i64, tpu.core_type = #tpu.core_type<tc>, window_params = [{transform_indices = @transform_0, window_bounds = array<i64: 16, 128>}, {pipeline_mode = #tpu.pipeline_mode<synchronous>, transform_indices = @transform_1, window_bounds = array<i64: 1, 128>}, {pipeline_mode = #tpu.pipeline_mode<synchronous>, transform_indices = @transform_2, window_bounds = array<i64: 1, 128>}, {transform_indices = @transform_3, window_bounds = array<i64: 16, 128>}]} {
    %c0 = arith.constant 0 : index
    %c0_0 = arith.constant 0 : index
    %0 = vector.load %arg1[%c0, %c0_0] : memref<16x128xf32, #tpu.memory_space<vmem>>, vector<16x128xf32>
    %c0_1 = arith.constant 0 : index
    %c0_2 = arith.constant 0 : index
    %1 = vector.load %arg2[%c0_1, %c0_2] : memref<1x128xf32, #tpu.memory_space<vmem>>, vector<1x128xf32>
    %c0_3 = arith.constant 0 : index
    %c0_4 = arith.constant 0 : index
    %2 = vector.load %arg3[%c0_3, %c0_4] : memref<1x128xf32, #tpu.memory_space<vmem>>, vector<1x128xf32>
    %cst = arith.constant dense<0.000000e+00> : vector<16xf32>
    %3 = vector.multi_reduction <add>, %0, %cst [1] : vector<16x128xf32> to vector<16xf32>
    %4 = vector.shape_cast %3 : vector<16xf32> to vector<16x1xf32>
    %cst_5 = arith.constant 1.280000e+02 : f32
    %5 = vector.broadcast %cst_5 : f32 to vector<16x1xf32>
    %6 = arith.divf %4, %5 : vector<16x1xf32>
    %7 = vector.broadcast %6 : vector<16x1xf32> to vector<16x128xf32>
    %8 = arith.subf %0, %7 : vector<16x128xf32>
    %9 = arith.mulf %8, %8 : vector<16x128xf32>
    %cst_6 = arith.constant dense<0.000000e+00> : vector<16xf32>
    %10 = vector.multi_reduction <add>, %9, %cst_6 [1] : vector<16x128xf32> to vector<16xf32>
    %11 = vector.shape_cast %10 : vector<16xf32> to vector<16x1xf32>
    %cst_7 = arith.constant 0.00787401571 : f32
    %12 = vector.broadcast %cst_7 : f32 to vector<16x1xf32>
    %13 = arith.mulf %11, %12 : vector<16x1xf32>
    %14 = math.sqrt %13 : vector<16x1xf32>
    %cst_8 = arith.constant 9.99999997E-7 : f32
    %15 = vector.broadcast %cst_8 : f32 to vector<16x1xf32>
    %16 = arith.addf %14, %15 : vector<16x1xf32>
    %17 = vector.broadcast %16 : vector<16x1xf32> to vector<16x128xf32>
    %18 = arith.divf %8, %17 : vector<16x128xf32>
    %19 = vector.broadcast %1 : vector<1x128xf32> to vector<16x128xf32>
    %20 = arith.mulf %19, %18 : vector<16x128xf32>
    %21 = vector.broadcast %2 : vector<1x128xf32> to vector<16x128xf32>
    %22 = arith.addf %20, %21 : vector<16x128xf32>
    %c0_9 = arith.constant 0 : index
    %c0_10 = arith.constant 0 : index
    %23 = vector.load %arg4[%c0_9, %c0_10] : memref<16x128xf32, #tpu.memory_space<vmem>>, vector<16x128xf32>
    tpu.vector_store %arg4[%c0_9, %c0_10], %22 {strides = array<i32>} : memref<16x128xf32, #tpu.memory_space<vmem>>, vector<16x128xf32>,
    return
  }
  func.func @transform_0(%arg0: i32) -> (i32, i32) {
    %c0_i32 = arith.constant 0 : i32
    %c0_i32_0 = arith.constant 0 : i32
    return %arg0, %c0_i32 : i32, i32
  }
  func.func @transform_1(%arg0: i32) -> (i32, i32) {
    %c0_i32 = arith.constant 0 : i32
    %c0_i32_0 = arith.constant 0 : i32
    %c0_i32_1 = arith.constant 0 : i32
    return %c0_i32, %c0_i32_0 : i32, i32
  }
  func.func @transform_2(%arg0: i32) -> (i32, i32) {
    %c0_i32 = arith.constant 0 : i32
    %c0_i32_0 = arith.constant 0 : i32
    %c0_i32_1 = arith.constant 0 : i32
    return %c0_i32, %c0_i32_0 : i32, i32
  }
  func.func @transform_3(%arg0: i32) -> (i32, i32) {
    %c0_i32 = arith.constant 0 : i32
    %c0_i32_0 = arith.constant 0 : i32
    return %arg0, %c0_i32 : i32, i32
  }
}

</mosaic_0001>

<bundles_post_ra>
// kernel: cross_attention_forward.6
= control target key start
LH: loop header
LB: loop body
LE: loop exit
PB: predicated region body
PF: predicated region fallthrough
CT: control target
= control target key end

     0   :  { %10 = vsyncpa [#allocation3], 0  ;;  %s343_s18 = smov [#allocation2]   ;;  %s411_s0 = inlined_call_operand.vmem [shape: f32[16,128], index: 0, kind: input, shape index: {}]   ;;  %s412_s1 = inlined_call_operand.vmem [shape: f32[1,128], index: 1, kind: input, shape index: {}]   ;;  %s413_s2 = inlined_call_operand.vmem [shape: f32[1,128], index: 2, kind: input, shape index: {}]   ;;  %s414_s3 = inlined_call_operand.hbm [shape: bf16[128,256], index: 3, kind: input, shape index: {}]   ;;  %s415_s4 = inlined_call_operand.vmem [shape: f32[1,256], index: 4, kind: input, shape index: {}]   ;;  %s416_s5 = inlined_call_operand.vmem [shape: bf16[16,256], index: 5, kind: output, shape index: {}]  }
   0x1   :  { %s22_s19 = sshll.u32 %s343_s18, 4  ;;  %s23_s19 = int_to_ptr.vmem [resolvable:$true] %s22_s19 }
   0x2   :  { %s329_s20 = scalar_lea.vmem %s23_s19, 2048  ;;  %p334_p1 = scmp.lt.s32.totalorder %s23_s19, %s23_s19 }
   0x3   :  { %p330_p0 = scmp.ne.s32.totalorder %s23_s19, %s329_s20  ;;  %p335_p2 = scmp.lt.s32.totalorder %s329_s20, %s329_s20 }
   0x5   :  { %p336_p3 = por %p335_p2, %p334_p1 }
   0x7   :  { %p337_p4 = pnand %p336_p3, %p330_p0 }
   0x9   :  { %340 = shalt.err (!%p337_p4)
}
   0xa   :  { %s344_s21 = smov 128   ;;  %s345_s22 = smov 8  }
   0xb   :  { %28 = dma.hbm_to_vmem [thread:$0]  %s414_s3, 2048, %s23_s19, [#allocation3], %s344_s21, %s344_s21, %s345_s22  }
   0xc   :  { %341 = dma.done.wait [#allocation3], 2048  }
   0xd   :  { %342 = vsyncadd [#allocation3], 4294965248  ;;  %v35_v0 = vld [vmem:[%s411_s0] sm:$0xff]  ;;  %v36_v1 = vld [vmem:[%s411_s0 + $0x8] sm:$0xff]  ;;  %v346_v21 = vmov 0   ;;  %v111_v54 = vlaneseq }
   0xe   :  { %39 = vadd.xlane.f32.xlu0 %v35_v0  ;;  %v289_v10 = vld [vmem:[#allocation2 + $0x74] ss:$8 sps:$4 sm:$0xff]   ;;  %v291_v11 = vld [vmem:[#allocation2 + $0x70] ss:$8 sps:$4 sm:$0xff]   ;;  %v292_v12 = vld [vmem:[#allocation2 + $0x64] ss:$8 sps:$4 sm:$0xff]   ;;  %233 = vmatprep.mubr.bf16.mxu0 %v346_v21 }
   0xf   :  { %201 = vmatprep.subr.bf16.mxu0 %v289_v10  ;;  %v294_v13 = vld [vmem:[#allocation2 + $0x60] ss:$8 sps:$4 sm:$0xff]   ;;  %v295_v14 = vld [vmem:[#allocation2 + $0x54] ss:$8 sps:$4 sm:$0xff]   ;;  %v297_v15 = vld [vmem:[#allocation2 + $0x50] ss:$8 sps:$4 sm:$0xff]  }
  0x10   :  { %202 = vmatpush1.bf16.msra.mxu0 %v291_v11  ;;  %v298_v16 = vld [vmem:[#allocation2 + $0x44] ss:$8 sps:$4 sm:$0xff]   ;;  %v300_v17 = vld [vmem:[#allocation2 + $0x40] ss:$8 sps:$4 sm:$0xff]   ;;  %v301_v18 = vld [vmem:[#allocation2 + $0x34] ss:$8 sps:$4 sm:$0xff]  }
  0x11   :  { %203 = vmatprep.subr.bf16.mxu0 %v292_v12  ;;  %v303_v19 = vld [vmem:[#allocation2 + $0x30] ss:$8 sps:$4 sm:$0xff]   ;;  %v304_v20 = vld [vmem:[#allocation2 + $0x24] ss:$8 sps:$4 sm:$0xff]   ;;  %v306_v22 = vld [vmem:[#allocation2 + $0x20] ss:$8 sps:$4 sm:$0xff]  }
  0x12   :  { %41 = vadd.xlane.f32.xlu0 %v36_v1  ;;  %v307_v23 = vld [vmem:[#allocation2 + $0x14] ss:$8 sps:$4 sm:$0xff]   ;;  %v309_v24 = vld [vmem:[#allocation2 + $0x10] ss:$8 sps:$4 sm:$0xff]   ;;  %v310_v25 = vld [vmem:[#allocation2 + $0x4] ss:$8 sps:$4 sm:$0xff]  }
  0x13   :  { %v312_v26 = vld [vmem:[#allocation2] ss:$8 sps:$4 sm:$0xff]   ;;  %v112_v55 = vshrl.u32 %v111_v54, 7 }
  0x14   :  { %204 = vmatpush1.bf16.msra.mxu0 %v294_v13  ;;  %v263_v45 = vld [vmem:[%s412_s1] ss:$0 sm:$0xff] }
  0x15   :  { %205 = vmatprep.subr.bf16.mxu0 %v295_v14  ;;  %v264_v49 = vld [vmem:[%s413_s2] ss:$0 sm:$0xff]  ;;  %v113_v56 = vsub.s32 0, %v112_v55  ;;  %v117_v57 = vsub.s32 1, %v112_v55 }
  0x16   :  { %v109_v58 = vld [vmem:[%s415_s4] sm:$0x3] }
  0x17   :  { %v114_v59 = vrot.slane %v109_v58, %v113_v56  ;;  %v118_v60 = vrot.slane %v109_v58, %v117_v57 }
  0x18   :  { %206 = vmatpush1.bf16.msra.mxu0 %v297_v15 }
  0x19   :  { %207 = vmatprep.subr.bf16.mxu0 %v298_v16 }
  0x1c   :  { %208 = vmatpush1.bf16.msra.mxu0 %v300_v17 }
  0x1d   :  { %209 = vmatprep.subr.bf16.mxu0 %v301_v18 }
  0x20   :  { %210 = vmatpush1.bf16.msra.mxu0 %v303_v19 }
  0x21   :  { %211 = vmatprep.subr.bf16.mxu0 %v304_v20 }
  0x24   :  { %212 = vmatpush1.bf16.msra.mxu0 %v306_v22 }
  0x25   :  { %213 = vmatprep.subr.bf16.mxu0 %v307_v23 }
  0x28   :  { %214 = vmatpush1.bf16.msra.mxu0 %v309_v24 }
  0x29   :  { %215 = vmatprep.subr.bf16.mxu0 %v310_v25 }
  0x2c   :  { %216 = vmatpush1.bf16.msra.mxu0 %v312_v26 }
  0x97   :  { %v40_v2 = vpop.xlane.xlu0 %39 }
  0x98   :  { %v44_v3 = vmul.f32 0.0078125, %v40_v2 }
  0x9a   :  { %v386_v4 = vsub.f32 %v35_v0, %v44_v3 }
  0x9b   :  { %v42_v5 = vpop.xlane.xlu0 %41 }
  0x9c   :  { %v45_v6 = vmul.f32 0.0078125, %v42_v5  ;;  %v48_v7 = vmul.f32 %v386_v4, %v386_v4 }
  0x9e   :  { %v390_v8 = vsub.f32 %v36_v1, %v45_v6  ;;  %50 = vadd.xlane.f32.xlu1 %v48_v7 }
  0xa0   :  { %v49_v9 = vmul.f32 %v390_v8, %v390_v8 }
  0xa2   :  { %52 = vadd.xlane.f32.xlu1 %v49_v9 }
 0x127   :  { %v51_v27 = vpop.xlane.xlu1 %50 }
 0x128   :  { %v54_v28 = vmul.f32 0.007874016, %v51_v27 }
 0x12a   :  { %313 = vrsqrt.f32 %v54_v28  ;;  %vm58_vm0 = vcmp.eq.f32.partialorder %v54_v28, inf  ;;  %v61_v33 = vand.u32 2147483648, %v54_v28  ;;  %vm60_vm1 = vcmp.eq.f32.partialorder %v54_v28, 0.0 }
 0x12b   :  { %v53_v29 = vpop.xlane.xlu1 %52 }
 0x12c   :  { %v55_v30 = vmul.f32 0.007874016, %v53_v29 }
 0x12e   :  { %315 = vrsqrt.f32 %v55_v30  ;;  %vm65_vm2 = vcmp.eq.f32.partialorder %v55_v30, inf  ;;  %v68_v39 = vand.u32 2147483648, %v55_v30  ;;  %vm67_vm3 = vcmp.eq.f32.partialorder %v55_v30, 0.0 }
 0x137   :  { %v314_v31 = vpop.eup %313 }
 0x138   :  { %v57_v32 = vmul.f32 %v314_v31, %v54_v28 }
 0x13a   :  { %v59_v34 = vsel %vm58_vm0, %v54_v28, %v57_v32 }
 0x13b   :  { %v316_v35 = vpop.eup %315  ;;  %v62_v36 = vsel %vm60_vm1, %v61_v33, %v59_v34 }
 0x13c   :  { %v70_v37 = vadd.f32 1e-06, %v62_v36  ;;  %v64_v38 = vmul.f32 %v316_v35, %v55_v30 }
 0x13e   :  { %317 = vrcp.f32 %v70_v37  ;;  %v66_v40 = vsel %vm65_vm2, %v55_v30, %v64_v38 }
 0x13f   :  { %v69_v41 = vsel %vm67_vm3, %v68_v39, %v66_v40 }
 0x140   :  { %v71_v42 = vadd.f32 1e-06, %v69_v41 }
 0x142   :  { %319 = vrcp.f32 %v71_v42 }
 0x14b   :  { %v318_v43 = vpop.eup %317 }
 0x14c   :  { %v73_v44 = vmul.f32 %v318_v43, %v386_v4 }
 0x14e   :  { %v82_v48 = vmul.f32 %v263_v45, %v73_v44 }
 0x14f   :  { %v320_v46 = vpop.eup %319 }
 0x150   :  { %v75_v47 = vmul.f32 %v320_v46, %v390_v8  ;;  %v90_v51 = vadd.f32 %v264_v49, %v82_v48 }
 0x152   :  { %v83_v50 = vmul.f32 %v263_v45, %v75_v47 }
 0x154   :  { %v91_v52 = vadd.f32 %v264_v49, %v83_v50 }
 0x156   :  { %v92_v53 = vpack.c.bf16 %v91_v52, %v90_v51 }
 0x158   :  { %234 = vmatmul.mubr.bf16.vlgmr.msra.gmra.mxu0 %v92_v53 }
 0x218   :  { %v235_v61 = vpop.f32.mrf.mxu0 }
 0x219   :  { %v236_v63 = vadd.f32 %v235_v61, %v114_v59 }
 0x21a   :  { %v237_v62 = vpop.f32.mrf.mxu0 }
 0x21b   :  { %v238_v0 = vadd.f32 %v237_v62, %v118_v60 }
 0x21c   :  { %v239_v1 = vpop.f32.mrf.mxu0 }
 0x21d   :  { %v283_v2 = vpack.c.bf16 %v238_v0, %v236_v63  ;;  %v240_v4 = vadd.f32 %v239_v1, %v114_v59 }
 0x21e   :  { %v241_v3 = vpop.f32.mrf.mxu0 }
 0x21f   :  { %256 = vst [vmem:[%s416_s5] sm:$0xff] %v283_v2  ;;  %v242_v5 = vadd.f32 %v241_v3, %v118_v60 }
 0x221   :  { %v284_v6 = vpack.c.bf16 %v242_v5, %v240_v4 }
 0x223   :  { %257 = vst [vmem:[%s416_s5 + $0x8] sm:$0xff] %v284_v6 }
 0x224   :  { %262 = vsyncpa [#allocation3], 1 }

// kernel: cross_attention_forward.8
= control target key start
LH: loop header
LB: loop body
LE: loop exit
PB: predicated region body
PF: predicated region fallthrough
CT: control target
= control target key end

     0   :  { %v293_v1 = vmov 0   ;;  %v37_v19 = vlaneseq  ;;  %s383_s1 = inlined_call_operand.vmem [shape: bf16[128,256], index: 1, kind: input, shape index: {}]   ;;  %s384_s0 = inlined_call_operand.vmem [shape: bf16[32,128], index: 0, kind: input, shape index: {}]   ;;  %s385_s2 = inlined_call_operand.vmem [shape: f32[1,256], index: 2, kind: input, shape index: {}]   ;;  %s386_s3 = inlined_call_operand.vmem [shape: bf16[32,256], index: 3, kind: output, shape index: {}]  }
   0x1   :  { %v267_v0 = vld [vmem:[%s383_s1 + $0x74] ss:$8 sps:$4 sm:$0xff]   ;;  %171 = vmatprep.mubr.bf16.mxu0 %v293_v1  ;;  %181 = vmatprep.mubr.bf16.mxu1 %v293_v1  ;;  %v269_v2 = vld [vmem:[%s383_s1 + $0x70] ss:$8 sps:$4 sm:$0xff]   ;;  %v270_v3 = vld [vmem:[%s383_s1 + $0x64] ss:$8 sps:$4 sm:$0xff]  }
   0x2   :  { %139 = vmatprep.subr.bf16.mxu0 %v267_v0  ;;  %250 = vmatprep.subr.bf16.mxu1 %v267_v0  ;;  %v272_v4 = vld [vmem:[%s383_s1 + $0x60] ss:$8 sps:$4 sm:$0xff]   ;;  %v273_v5 = vld [vmem:[%s383_s1 + $0x54] ss:$8 sps:$4 sm:$0xff]   ;;  %v275_v6 = vld [vmem:[%s383_s1 + $0x50] ss:$8 sps:$4 sm:$0xff]  }
   0x3   :  { %140 = vmatpush1.bf16.msra.mxu0 %v269_v2  ;;  %258 = vmatpush1.bf16.msra.mxu1 %v269_v2  ;;  %v276_v7 = vld [vmem:[%s383_s1 + $0x44] ss:$8 sps:$4 sm:$0xff]   ;;  %v278_v8 = vld [vmem:[%s383_s1 + $0x40] ss:$8 sps:$4 sm:$0xff]   ;;  %v279_v9 = vld [vmem:[%s383_s1 + $0x34] ss:$8 sps:$4 sm:$0xff]  }
   0x4   :  { %141 = vmatprep.subr.bf16.mxu0 %v270_v3  ;;  %251 = vmatprep.subr.bf16.mxu1 %v270_v3  ;;  %v281_v10 = vld [vmem:[%s383_s1 + $0x30] ss:$8 sps:$4 sm:$0xff]   ;;  %v282_v11 = vld [vmem:[%s383_s1 + $0x24] ss:$8 sps:$4 sm:$0xff]   ;;  %v284_v12 = vld [vmem:[%s383_s1 + $0x20] ss:$8 sps:$4 sm:$0xff]  }
   0x5   :  { %v285_v13 = vld [vmem:[%s383_s1 + $0x14] ss:$8 sps:$4 sm:$0xff]   ;;  %v287_v14 = vld [vmem:[%s383_s1 + $0x10] ss:$8 sps:$4 sm:$0xff]   ;;  %v288_v15 = vld [vmem:[%s383_s1 + $0x4] ss:$8 sps:$4 sm:$0xff]  }
   0x6   :  { %v290_v16 = vld [vmem:[%s383_s1] ss:$8 sps:$4 sm:$0xff]   ;;  %v38_v20 = vshrl.u32 %v37_v19, 7 }
   0x7   :  { %142 = vmatpush1.bf16.msra.mxu0 %v272_v4  ;;  %259 = vmatpush1.bf16.msra.mxu1 %v272_v4  ;;  %v291_v17 = vld [vmem:[%s384_s0] sm:$0xff]   ;;  %v292_v18 = vld [vmem:[%s384_s0 + $0x8] sm:$0xff]  }
   0x8   :  { %143 = vmatprep.subr.bf16.mxu0 %v273_v5  ;;  %252 = vmatprep.subr.bf16.mxu1 %v273_v5  ;;  %v39_v21 = vsub.s32 0, %v38_v20  ;;  %v43_v22 = vsub.s32 1, %v38_v20  ;;  %v35_v23 = vld [vmem:[%s385_s2] sm:$0x3] }
   0xa   :  { %v40_v24 = vrot.slane %v35_v23, %v39_v21  ;;  %v44_v25 = vrot.slane %v35_v23, %v43_v22 }
   0xb   :  { %144 = vmatpush1.bf16.msra.mxu0 %v275_v6  ;;  %260 = vmatpush1.bf16.msra.mxu1 %v275_v6 }
   0xc   :  { %145 = vmatprep.subr.bf16.mxu0 %v276_v7  ;;  %253 = vmatprep.subr.bf16.mxu1 %v276_v7 }
   0xf   :  { %146 = vmatpush1.bf16.msra.mxu0 %v278_v8  ;;  %261 = vmatpush1.bf16.msra.mxu1 %v278_v8 }
  0x10   :  { %147 = vmatprep.subr.bf16.mxu0 %v279_v9  ;;  %254 = vmatprep.subr.bf16.mxu1 %v279_v9 }
  0x13   :  { %148 = vmatpush1.bf16.msra.mxu0 %v281_v10  ;;  %262 = vmatpush1.bf16.msra.mxu1 %v281_v10 }
  0x14   :  { %149 = vmatprep.subr.bf16.mxu0 %v282_v11  ;;  %255 = vmatprep.subr.bf16.mxu1 %v282_v11 }
  0x17   :  { %150 = vmatpush1.bf16.msra.mxu0 %v284_v12  ;;  %263 = vmatpush1.bf16.msra.mxu1 %v284_v12 }
  0x18   :  { %151 = vmatprep.subr.bf16.mxu0 %v285_v13  ;;  %256 = vmatprep.subr.bf16.mxu1 %v285_v13 }
  0x1b   :  { %152 = vmatpush1.bf16.msra.mxu0 %v287_v14  ;;  %264 = vmatpush1.bf16.msra.mxu1 %v287_v14 }
  0x1c   :  { %153 = vmatprep.subr.bf16.mxu0 %v288_v15  ;;  %257 = vmatprep.subr.bf16.mxu1 %v288_v15 }
  0x1f   :  { %154 = vmatpush1.bf16.msra.mxu0 %v290_v16  ;;  %265 = vmatpush1.bf16.msra.mxu1 %v290_v16 }
  0x22   :  { %172 = vmatmul.mubr.bf16.vlgmr.msra.gmra.mxu0 %v291_v17  ;;  %182 = vmatmul.mubr.bf16.vlgmr.msra.gmra.mxu1 %v292_v18 }
  0xe2   :  { %v173_v26 = vpop.f32.mrf.mxu0  ;;  %v183_v27 = vpop.f32.mrf.mxu1 }
  0xe3   :  { %v174_v30 = vadd.f32 %v173_v26, %v40_v24  ;;  %v184_v31 = vadd.f32 %v183_v27, %v40_v24 }
  0xe4   :  { %v175_v28 = vpop.f32.mrf.mxu0  ;;  %v185_v29 = vpop.f32.mrf.mxu1 }
  0xe5   :  { %v176_v32 = vadd.f32 %v175_v28, %v44_v25  ;;  %v186_v33 = vadd.f32 %v185_v29, %v44_v25 }
  0xe6   :  { %v177_v34 = vpop.f32.mrf.mxu0  ;;  %v187_v35 = vpop.f32.mrf.mxu1 }
  0xe7   :  { %v246_v36 = vpack.c.bf16 %v176_v32, %v174_v30  ;;  %v248_v37 = vpack.c.bf16 %v186_v33, %v184_v31  ;;  %v178_v40 = vadd.f32 %v177_v34, %v40_v24  ;;  %v188_v41 = vadd.f32 %v187_v35, %v40_v24 }
  0xe8   :  { %v179_v38 = vpop.f32.mrf.mxu0  ;;  %v189_v39 = vpop.f32.mrf.mxu1 }
  0xe9   :  { %216 = vst [vmem:[%s386_s3] sm:$0xff] %v246_v36  ;;  %218 = vst [vmem:[%s386_s3 + $0x10] sm:$0xff] %v248_v37  ;;  %v180_v42 = vadd.f32 %v179_v38, %v44_v25  ;;  %v190_v43 = vadd.f32 %v189_v39, %v44_v25 }
  0xeb   :  { %v247_v44 = vpack.c.bf16 %v180_v42, %v178_v40  ;;  %v249_v45 = vpack.c.bf16 %v190_v43, %v188_v41 }
  0xed   :  { %217 = vst [vmem:[%s386_s3 + $0x8] sm:$0xff] %v247_v44  ;;  %219 = vst [vmem:[%s386_s3 + $0x18] sm:$0xff] %v249_v45 }

// kernel: cross_attention_forward.7
= control target key start
LH: loop header
LB: loop body
LE: loop exit
PB: predicated region body
PF: predicated region fallthrough
CT: control target
= control target key end

     0   :  { %s1552_s30 = smov 0   ;;  %s1554_s10 = smov 0   ;;  %s1775_s0 = inlined_call_operand.vmem [shape: f32[2,8,128], index: 0, kind: input, shape index: {}]   ;;  %s1776_s1 = inlined_call_operand.vmem [shape: f32[1,128], index: 1, kind: input, shape index: {}]   ;;  %s1777_s2 = inlined_call_operand.vmem [shape: f32[1,128], index: 2, kind: input, shape index: {}]   ;;  %s1778_s3 = inlined_call_operand.vmem [shape: bf16[128,128], index: 3, kind: input, shape index: {}]   ;;  %s1779_s4 = inlined_call_operand.vmem [shape: f32[1,128], index: 4, kind: input, shape index: {}]   ;;  %s1780_s5 = inlined_call_operand.vmem [shape: bf16[2,8,256], index: 5, kind: input, shape index: {}]   ;;  %s1781_s6 = inlined_call_operand.vmem [shape: f32[2,1,8], index: 6, kind: input, shape index: {}]   ;;  %s1782_s7 = inlined_call_operand.vmem [shape: bf16[128,128], index: 7, kind: input, shape index: {}]   ;;  %s1783_s8 = inlined_call_operand.vmem [shape: f32[1,128], index: 8, kind: input, shape index: {}]   ;;  %s1784_s9 = inlined_call_operand.vmem [shape: f32[2,8,128], index: 9, kind: output, shape index: {}]  }
   0x1   :  { %s1556_s11 = smov 0  }
   0x2 LB: > { %s31_s12 = sadd.s32 1, %s1491_s10  ;;  %p1240_p0 = scmp.ge.s32.totalorder %s1495_s11, 1  ;;  %s1495_s11 = sphi %s1556_s11, %s19_s11   ;;  %s1491_s10 = sphi %s1554_s10, %s1786_s10   ;;  %s1487_s30 = sphi %s1552_s30, %s1785_s30  }
   0x3   : > { %p33_p1 = scmp.ge.s32.totalorder %s31_s12, 2  ;;  %p323_p2 = scmp.lt.s32.totalorder %s1495_s11, 3 }
   0x5   : > { %s1788_s12 = smov (%p33_p1, %s31_s12), 0  ;;  %p324_p3 = pnand %p1240_p0, %p323_p2 }
   0x6   : > { %p371_p4 = scmp.lt.s32.totalorder (!%p324_p3), %s1487_s30, 1  ;;  %s1499_s29 = smov (!%p324_p3), 96  }
   0x7   : > { %327 = sbr.rel (%p324_p3) target bundleno = 3116 (0xc2c), region = 56  ;;  %s1501_s14 = smov (!%p324_p3), 32  }
   0xc   : > { %s1790_s30 = smov (!%p371_p4, %s1487_s30), 1  ;;  %v1436_v5 = vld [vmem:[%s1778_s3 + $0x38] sm:$0xff]   ;;  %v1497_v6 = vmov 0.0   ;;  %v1437_v7 = vld [vmem:[%s1778_s3 + $0x30] sm:$0xff]   ;;  %v1438_v8 = vld [vmem:[%s1778_s3 + $0x28] sm:$0xff]   ;;  %vm1498_vm0 = vmmov 0  }
   0xd   : > { %s1573_s13 = sshll.u32 %s1790_s30, 3  ;;  %1319 = vmatprep.subr.bf16.mxu0 %v1497_v6  ;;  %1339 = vmatprep.subr.bf16.mxu1 %v1497_v6  ;;  %v1439_v9 = vld [vmem:[%s1778_s3 + $0x20] sm:$0xff]   ;;  %v1440_v10 = vld [vmem:[%s1778_s3 + $0x18] sm:$0xff]   ;;  %v1441_v11 = vld [vmem:[%s1778_s3 + $0x10] sm:$0xff]   ;;  %vm552_vm1 = vcmask 261120   ;;  %s385_s28 = scalar_lea.vmem %s1781_s6, %s1790_s30  ;;  %vm599_vm4 = vcmask 64512  }
   0xe   : > { %s377_s16 = scalar_lea.vmem %s1775_s0, %s1573_s13  ;;  %1320 = vmatpush3.bf16.msra.mxu0 %v1436_v5  ;;  %1335 = vmatprep.mubr.msk.bf16.mxu0 %vm1498_vm0, %v1497_v6  ;;  %v1442_v12 = vld [vmem:[%s1778_s3 + $0x8] sm:$0xff]   ;;  %v1443_v13 = vld [vmem:[%s1778_s3] sm:$0xff]   ;;  %s1625_s19 = scalar_lea.vmem %s1780_s5, %s1573_s13  ;;  %vm615_vm5 = vcmask 1043456   ;;  %vm660_vm6 = vcmask 257024   ;;  %vm786_vm7 = vcmask 519424   ;;  %vm905_vm8 = vcmask 781824  }
   0xf   : > { %v1579_v0 = vld [vmem:[%s377_s16] sm:$0xff]  ;;  %1321 = vmatprep.subr.bf16.mxu0 %v1497_v6  ;;  %1341 = vmatprep.mubr.msk.bf16.mxu1 %vm1498_vm0, %v1497_v6  ;;  %s1500_s30 = smov 64   ;;  %vm1024_vm9 = vcmask 1044224  }
  0x10   : > { %397 = vadd.xlane.f32.xlu0 %v1579_v0  ;;  %v544_v14 = vld [vmem:[%s1625_s19] sm:$0xf]  ;;  %v545_v51 = vld [vmem:[%s1625_s19 + $0x4] sm:$0xf]  ;;  %s392_s19 = scalar_lea.vmem %s1784_s9, %s1573_s13 }
  0x11   : > { %v557_v15 = vsel %vm552_vm1, %v544_v14, 0  ;;  %v1245_v25 = vld [vmem:[%s1776_s1] ss:$0 sm:$0xff]  ;;  %v1655_v45 = vcombine.low %v544_v14, %v544_v14  ;;  %v617_v52 = vsel %vm615_vm5, %v545_v51, 0  ;;  %v1680_v14 = vcombine.low %v545_v51, %v545_v51 }
  0x12   : > { %1322 = vmatpush3.bf16.msra.mxu0 %v1437_v7  ;;  %1340 = vmatpush3.bf16.xpose.msra.mxu1 %v557_v15  ;;  %v1246_v27 = vld [vmem:[%s1777_s2] ss:$0 sm:$0xff] }
  0x13   : > { %1323 = vmatprep.subr.bf16.mxu0 %v1497_v6  ;;  %1345 = vmatprep.subr.bf16.mxu1 %v1497_v6  ;;  %v1247_v31 = vld [vmem:[%s1779_s4] ss:$0 sm:$0xff] }
  0x14   : > { %v1651_v38 = vld [vmem:[%s385_s28] ss:$0 sm:$0xff] }
  0x16   : > { %1324 = vmatpush3.bf16.msra.mxu0 %v1438_v8 }
  0x17   : > { %1325 = vmatprep.subr.bf16.mxu0 %v1497_v6 }
  0x1a   : > { %1326 = vmatpush3.bf16.msra.mxu0 %v1439_v9 }
  0x1b   : > { %1327 = vmatprep.subr.bf16.mxu0 %v1497_v6 }
  0x1e   : > { %1328 = vmatpush3.bf16.msra.mxu0 %v1440_v10 }
  0x1f   : > { %1329 = vmatprep.subr.bf16.mxu0 %v1497_v6 }
  0x22   : > { %1330 = vmatpush3.bf16.msra.mxu0 %v1441_v11 }
  0x23   : > { %1331 = vmatprep.subr.bf16.mxu0 %v1497_v6 }
  0x26   : > { %1332 = vmatpush3.bf16.msra.mxu0 %v1442_v12 }
  0x27   : > { %1333 = vmatprep.subr.bf16.mxu0 %v1497_v6 }
  0x2a   : > { %1334 = vmatpush3.bf16.msra.mxu0 %v1443_v13 }
  0x2b   : > { %1387 = vmatprep.subr.bf16.mxu0 %v1497_v6 }
  0x99   : > { %v398_v1 = vpop.xlane.xlu0 %397 }
  0x9a   : > { %v400_v2 = vmul.f32 0.0078125, %v398_v1 }
  0x9c   : > { %v401_v3 = vsub.f32 %v1579_v0, %v400_v2 }
  0x9e   : > { %v402_v4 = vmul.f32 %v401_v3, %v401_v3 }
  0xa0   : > { %403 = vadd.xlane.f32.xlu0 %v402_v4 }
  0xb6   : > { %668 = vrot.lane.b32.xlu0 %v1655_v45, %s1499_s29 }
 0x129   : > { %v404_v16 = vpop.xlane.xlu0 %403 }
 0x12a   : > { %v405_v17 = vmul.f32 0.007874016, %v404_v16 }
 0x12c   : > { %1453 = vrsqrt.f32 %v405_v17  ;;  %vm408_vm2 = vcmp.eq.f32.partialorder %v405_v17, inf  ;;  %v411_v20 = vand.u32 2147483648, %v405_v17  ;;  %vm410_vm3 = vcmp.eq.f32.partialorder %v405_v17, 0.0 }
 0x12d   : > { %v669_v55 = vpop.permute.xlu0 %668 }
 0x12e   : > { %v674_v57 = vsel %vm552_vm1, %v669_v55, 0 }
 0x139   : > { %v1454_v18 = vpop.eup %1453 }
 0x13a   : > { %v407_v19 = vmul.f32 %v1454_v18, %v405_v17 }
 0x13c   : > { %v409_v21 = vsel %vm408_vm2, %v405_v17, %v407_v19 }
 0x13d   : > { %v412_v22 = vsel %vm410_vm3, %v411_v20, %v409_v21 }
 0x13e   : > { %v413_v23 = vadd.f32 1e-06, %v412_v22 }
 0x140   : > { %1455 = vrcp.f32 %v413_v23 }
 0x14d   : > { %v1456_v24 = vpop.eup %1455 }
 0x14e   : > { %v415_v26 = vmul.f32 %v1456_v24, %v401_v3 }
 0x150   : > { %v422_v28 = vmul.f32 %v1245_v25, %v415_v26 }
 0x152   : > { %v429_v29 = vadd.f32 %v1246_v27, %v422_v28 }
 0x154   : > { %v430_v30 = vpack.c.bf16 %v429_v29, %v429_v29 }
 0x156   : > { %1336 = vmatmul.mubr.bf16.vlgmr.msra.gmra.mxu0 %v430_v30 }
 0x157   : > { %1403 = vmatprep.mubr.msk.bf16.mxu0 %vm1498_vm0, %v1497_v6 }
 0x216   : > { %v536_v32 = vpop.f32.mrf.mxu0 }
 0x217   : > { %v537_v33 = vadd.f32 %v1247_v31, %v536_v32 }
 0x218   : > { %v1337_v34 = vpop.f32.mrf.mxu0 }
 0x219   : > { %v1641_v35 = vpack.c.bf16 %v537_v33, %v537_v33 }
 0x21a   : > { %v539_v36 = vpop.f32.mrf.mxu0 }
 0x21b   : > { %1342 = vmatmul.mubr.msk.bf16.vlgmr.msra.gmra.mxu1 %vm552_vm1, %v1641_v35 }
 0x21c   : > { %v1338_v37 = vpop.f32.mrf.mxu0  ;;  %1347 = vmatprep.mubr.msk.bf16.mxu1 %vm1498_vm0, %v1497_v6  ;;  %1346 = vmatpush3.bf16.msra.mxu1 %v617_v52 }
 0x21d   : > { %1351 = vmatprep.subr.bf16.mxu1 %v1497_v6 }
 0x2db   : > { %v593_v39 = vpop.f32.mrf.mxu1 }
 0x2dc   : > { %v594_v40 = vadd.f32 %v1651_v38, %v593_v39 }
 0x2dd   : > { %v1343_v41 = vpop.f32.mrf.mxu1 }
 0x2de   : > { %v600_v42 = vsel %vm599_vm4, %v594_v40, -inf }
 0x2df   : > { %601 = vmax.xlane.f32.xlu1 %v600_v42  ;;  %v596_v43 = vpop.f32.mrf.mxu1 }
 0x2e1   : > { %v1344_v44 = vpop.f32.mrf.mxu1 }
 0x368   : > { %v602_v46 = vpop.xlane.xlu1 %601 }
 0x369   : > { %v603_v47 = vsub.f32 %v594_v40, %v602_v46 }
 0x36b   : > { %v604_v48 = vmul.f32 1.442695, %v603_v47 }
 0x36d   : > { %1457 = vpow2.f32 %v604_v48 }
 0x37a   : > { %v1458_v49 = vpop.eup %1457 }
 0x37b   : > { %v606_v50 = vsel %vm599_vm4, %v1458_v49, 0.0 }
 0x37c   : > { %607 = vadd.xlane.f32.xlu1 %v606_v50 }
 0x38d   : > { %663 = vrot.lane.b32.xlu1 %v1641_v35, %s1499_s29 }
 0x405   : > { %v608_v53 = vpop.xlane.xlu1 %607 }
 0x406   : > { %1459 = vrcp.f32 %v608_v53 }
 0x409   : > { %v664_v59 = vpop.permute.xlu1 %663 }
 0x413   : > { %v1460_v54 = vpop.eup %1459 }
 0x414   : > { %v610_v56 = vmul.f32 %v1460_v54, %v1458_v49 }
 0x416   : > { %v611_v58 = vpack.c.bf16 %v610_v56, %v610_v56 }
 0x418   : > { %1348 = vmatmul.mubr.msk.bf16.vlgmr.msra.gmra.mxu1 %vm599_vm4, %v611_v58 }
 0x419   : > { %1352 = vmatpush3.bf16.xpose.msra.mxu1 %v674_v57  ;;  %1353 = vmatprep.mubr.msk.bf16.mxu1 %vm1498_vm0, %v1497_v6 }
 0x41a   : > { %1357 = vmatprep.subr.bf16.mxu1 %v1497_v6 }
 0x420   : > { %1354 = vmatmul.mubr.msk.bf16.vlgmr.msra.gmra.mxu1 %vm552_vm1, %v664_v59 }
 0x421   : > { %1359 = vmatprep.mubr.msk.bf16.mxu1 %vm1498_vm0, %v1497_v6 }
 0x4d8   : > { %v653_v60 = vpop.f32.mrf.mxu1 }
 0x4d9   : > { %v659_v61 = vpack.c.bf16 %v653_v60, %v653_v60 }
 0x4da   : > { %v1349_v62 = vpop.f32.mrf.mxu1 }
 0x4db   : > { %661 = vst.msk [vmem:[#allocation2] sm:$0xf] %vm660_vm6, %v659_v61 }
 0x4dc   : > { %v656_v63 = vpop.f32.mrf.mxu1 }
 0x4de   : > { %v1350_v1 = vpop.f32.mrf.mxu1 }
 0x4e0   : > { %v710_v2 = vpop.f32.mrf.mxu1 }
 0x4e1   : > { %v711_v3 = vadd.f32 %v1651_v38, %v710_v2 }
 0x4e2   : > { %v1355_v4 = vpop.f32.mrf.mxu1 }
 0x4e3   : > { %v716_v5 = vsel %vm599_vm4, %v711_v3, -inf }
 0x4e4   : > { %717 = vmax.xlane.f32.xlu1 %v716_v5  ;;  %v713_v7 = vpop.f32.mrf.mxu1 }
 0x4e6   : > { %v1356_v8 = vpop.f32.mrf.mxu1 }
 0x4f5   : > { %790 = vrot.lane.b32.xlu1 %v1655_v45, %s1500_s30 }
 0x4f9   : > { %788 = vrot.lane.b32.xlu1 %v1641_v35, %s1500_s30 }
 0x56d   : > { %v718_v9 = vpop.xlane.xlu1 %717 }
 0x56e   : > { %v719_v10 = vsub.f32 %v711_v3, %v718_v9 }
 0x570   : > { %v720_v11 = vmul.f32 1.442695, %v719_v10 }
 0x571   : > { %v791_v20 = vpop.permute.xlu1 %790 }
 0x572   : > { %1461 = vpow2.f32 %v720_v11  ;;  %v796_v21 = vsel %vm552_vm1, %v791_v20, 0  ;;  %v1445_v11 = vld [vmem:[%s1782_s7 + $0x38] sm:$0xff]  }
 0x573   : > { %1388 = vmatpush3.bf16.msra.mxu0 %v1445_v11 }
 0x574   : > { %1389 = vmatprep.subr.bf16.mxu0 %v1497_v6 }
 0x575   : > { %v789_v23 = vpop.permute.xlu1 %788 }
 0x57f   : > { %v1462_v12 = vpop.eup %1461 }
 0x580   : > { %v722_v13 = vsel %vm599_vm4, %v1462_v12, 0.0 }
 0x581   : > { %723 = vadd.xlane.f32.xlu0 %v722_v13  ;;  %v1447_v13 = vld [vmem:[%s1782_s7 + $0x28] sm:$0xff]  }
 0x597   : > { %731 = vrot.lane.b32.xlu0 %v1680_v14, %s1499_s29 }
 0x60a   : > { %v724_v15 = vpop.xlane.xlu0 %723 }
 0x60b   : > { %1463 = vrcp.f32 %v724_v15  ;;  %v1449_v15 = vld [vmem:[%s1782_s7 + $0x18] sm:$0xff]  }
 0x60e   : > { %v732_v16 = vpop.permute.xlu0 %731 }
 0x60f   : > { %v737_v17 = vsel %vm615_vm5, %v732_v16, 0  ;;  %v1450_v16 = vld [vmem:[%s1782_s7 + $0x10] sm:$0xff]  }
 0x610   : > { %1358 = vmatpush3.bf16.msra.mxu1 %v737_v17  ;;  %v1451_v17 = vld [vmem:[%s1782_s7 + $0x8] sm:$0xff]  }
 0x611   : > { %1363 = vmatprep.subr.bf16.mxu1 %v1497_v6 }
 0x618   : > { %v1464_v18 = vpop.eup %1463 }
 0x619   : > { %v726_v19 = vmul.f32 %v1464_v18, %v1462_v12  ;;  %v1446_v12 = vld [vmem:[%s1782_s7 + $0x30] sm:$0xff]   ;;  %v1452_v18 = vld [vmem:[%s1782_s7] sm:$0xff]  }
 0x61a   : > { %1390 = vmatpush3.bf16.msra.mxu0 %v1446_v12 }
 0x61b   : > { %v727_v22 = vpack.c.bf16 %v726_v19, %v726_v19  ;;  %1391 = vmatprep.subr.bf16.mxu0 %v1497_v6 }
 0x61d   : > { %1360 = vmatmul.mubr.msk.bf16.vlgmr.msra.gmra.mxu1 %vm599_vm4, %v727_v22 }
 0x61e   : > { %1364 = vmatpush3.bf16.xpose.msra.mxu1 %v796_v21  ;;  %1365 = vmatprep.mubr.msk.bf16.mxu1 %vm1498_vm0, %v1497_v6 }
 0x61f   : > { %1369 = vmatprep.subr.bf16.mxu1 %v1497_v6  ;;  %1392 = vmatpush3.bf16.msra.mxu0 %v1447_v13 }
 0x620   : > { %1393 = vmatprep.subr.bf16.mxu0 %v1497_v6 }
 0x625   : > { %1366 = vmatmul.mubr.msk.bf16.vlgmr.msra.gmra.mxu1 %vm552_vm1, %v789_v23 }
 0x626   : > { %1371 = vmatprep.mubr.msk.bf16.mxu1 %vm1498_vm0, %v1497_v6 }
 0x6dd   : > { %v1694_v24 = vpop.f32.mrf.mxu1 }
 0x6de   : > { %v1282_v3 = vpack.c.bf16 %v1694_v24, %v1694_v24 }
 0x6df   : > { %v1361_v25 = vpop.f32.mrf.mxu1 }
 0x6e1   : > { %v776_v26 = vpop.f32.mrf.mxu1 }
 0x6e3   : > { %v1362_v27 = vpop.f32.mrf.mxu1 }
 0x6e4   : > { %v1278_v27 = vld [vmem:[%s1783_s8] ss:$0 sm:$0xff] }
 0x6e5   : > { %v832_v28 = vpop.f32.mrf.mxu1 }
 0x6e6   : > { %v833_v29 = vadd.f32 %v1651_v38, %v832_v28 }
 0x6e7   : > { %v1367_v30 = vpop.f32.mrf.mxu1 }
 0x6e8   : > { %v838_v31 = vsel %vm599_vm4, %v833_v29, -inf }
 0x6e9   : > { %839 = vmax.xlane.f32.xlu1 %v838_v31  ;;  %v835_v32 = vpop.f32.mrf.mxu1 }
 0x6eb   : > { %v1368_v33 = vpop.f32.mrf.mxu1 }
 0x6fa   : > { %909 = vrot.lane.b32.xlu1 %v1655_v45, %s1501_s14 }
 0x6fe   : > { %907 = vrot.lane.b32.xlu1 %v1641_v35, %s1501_s14 }
 0x772   : > { %v840_v34 = vpop.xlane.xlu1 %839 }
 0x773   : > { %v841_v36 = vsub.f32 %v833_v29, %v840_v34 }
 0x775   : > { %v842_v37 = vmul.f32 1.442695, %v841_v36 }
 0x776   : > { %v910_v45 = vpop.permute.xlu1 %909 }
 0x777   : > { %1465 = vpow2.f32 %v842_v37  ;;  %v915_v46 = vsel %vm552_vm1, %v910_v45, 0 }
 0x77a   : > { %v908_v48 = vpop.permute.xlu1 %907 }
 0x784   : > { %v1466_v39 = vpop.eup %1465 }
 0x785   : > { %v844_v40 = vsel %vm599_vm4, %v1466_v39, 0.0 }
 0x786   : > { %845 = vadd.xlane.f32.xlu0 %v844_v40 }
 0x79c   : > { %850 = vrot.lane.b32.xlu0 %v1680_v14, %s1500_s30 }
 0x80f   : > { %v846_v41 = vpop.xlane.xlu0 %845 }
 0x810   : > { %1467 = vrcp.f32 %v846_v41 }
 0x813   : > { %v851_v42 = vpop.permute.xlu0 %850 }
 0x814   : > { %v856_v43 = vsel %vm615_vm5, %v851_v42, 0 }
 0x815   : > { %1370 = vmatpush3.bf16.msra.mxu1 %v856_v43 }
 0x816   : > { %1375 = vmatprep.subr.bf16.mxu1 %v1497_v6 }
 0x81d   : > { %v1468_v35 = vpop.eup %1467 }
 0x81e   : > { %v848_v44 = vmul.f32 %v1468_v35, %v1466_v39 }
 0x820   : > { %v849_v47 = vpack.c.bf16 %v848_v44, %v848_v44 }
 0x822   : > { %1372 = vmatmul.mubr.msk.bf16.vlgmr.msra.gmra.mxu1 %vm599_vm4, %v849_v47 }
 0x823   : > { %1376 = vmatpush3.bf16.xpose.msra.mxu1 %v915_v46  ;;  %1377 = vmatprep.mubr.msk.bf16.mxu1 %vm1498_vm0, %v1497_v6 }
 0x824   : > { %1381 = vmatprep.subr.bf16.mxu1 %v1497_v6 }
 0x82a   : > { %1378 = vmatmul.mubr.msk.bf16.vlgmr.msra.gmra.mxu1 %vm552_vm1, %v908_v48 }
 0x82b   : > { %1383 = vmatprep.mubr.msk.bf16.mxu1 %vm1498_vm0, %v1497_v6 }
 0x8e2   : > { %v892_v49 = vpop.f32.mrf.mxu1 }
 0x8e3   : > { %v1283_v59 = vpack.c.bf16 %v892_v49, %v892_v49 }
 0x8e4   : > { %v1373_v50 = vpop.f32.mrf.mxu1 }
 0x8e6   : > { %v895_v51 = vpop.f32.mrf.mxu1 }
 0x8e8   : > { %v1374_v52 = vpop.f32.mrf.mxu1 }
 0x8ea   : > { %v951_v53 = vpop.f32.mrf.mxu1 }
 0x8eb   : > { %v952_v54 = vadd.f32 %v1651_v38, %v951_v53 }
 0x8ec   : > { %v1379_v55 = vpop.f32.mrf.mxu1 }
 0x8ed   : > { %v957_v56 = vsel %vm599_vm4, %v952_v54, -inf }
 0x8ee   : > { %958 = vmax.xlane.f32.xlu0 %v957_v56  ;;  %v954_v57 = vpop.f32.mrf.mxu1 }
 0x8f0   : > { %v1380_v58 = vpop.f32.mrf.mxu1 }
 0x904   : > { %969 = vrot.lane.b32.xlu0 %v1680_v14, %s1501_s14  ;;  %v1448_v14 = vld [vmem:[%s1782_s7 + $0x20] sm:$0xff]  }
 0x905   : > { %1394 = vmatpush3.bf16.msra.mxu0 %v1448_v14 }
 0x906   : > { %1395 = vmatprep.subr.bf16.mxu0 %v1497_v6 }
 0x908   : > { %902 = vrot.lane.b32.xlu0 %v1283_v59, %s1500_s30 }
 0x909   : > { %1396 = vmatpush3.bf16.msra.mxu0 %v1449_v15 }
 0x90a   : > { %1397 = vmatprep.subr.bf16.mxu0 %v1497_v6 }
 0x90d   : > { %1398 = vmatpush3.bf16.msra.mxu0 %v1450_v16 }
 0x90e   : > { %1399 = vmatprep.subr.bf16.mxu0 %v1497_v6 }
 0x911   : > { %1400 = vmatpush3.bf16.msra.mxu0 %v1451_v17 }
 0x912   : > { %1401 = vmatprep.subr.bf16.mxu0 %v1497_v6 }
 0x915   : > { %1402 = vmatpush3.bf16.msra.mxu0 %v1452_v18 }
 0x977   : > { %v959_v60 = vpop.xlane.xlu0 %958 }
 0x978   : > { %v960_v61 = vsub.f32 %v952_v54, %v959_v60 }
 0x97a   : > { %v961_v62 = vmul.f32 1.442695, %v960_v61 }
 0x97b   : > { %v970_v63 = vpop.permute.xlu0 %969 }
 0x97c   : > { %1469 = vpow2.f32 %v961_v62  ;;  %v975_v1 = vsel %vm615_vm5, %v970_v63, 0 }
 0x97d   : > { %1382 = vmatpush3.bf16.msra.mxu1 %v975_v1 }
 0x97f   : > { %v903_v7 = vpop.permute.xlu0 %902 }
 0x989   : > { %v1470_v38 = vpop.eup %1469 }
 0x98a   : > { %v963_v2 = vsel %vm599_vm4, %v1470_v38, 0.0 }
 0x98b   : > { %964 = vadd.xlane.f32.xlu1 %v963_v2 }
 0x99c   : > { %783 = vrot.lane.b32.xlu1 %v1282_v3, %s1501_s14 }
 0xa14   : > { %v965_v4 = vpop.xlane.xlu1 %964 }
 0xa15   : > { %1471 = vrcp.f32 %v965_v4 }
 0xa18   : > { %v784_v5 = vpop.permute.xlu1 %783 }
 0xa19   : > { %787 = vst.msk [vmem:[#allocation2] sm:$0xf] %vm786_vm7, %v784_v5 }
 0xa1a   : > { %906 = vst.msk [vmem:[#allocation2] sm:$0xf] %vm905_vm8, %v903_v7 }
 0xa22   : > { %v1472_v8 = vpop.eup %1471 }
 0xa23   : > { %v967_v9 = vmul.f32 %v1472_v8, %v1470_v38 }
 0xa25   : > { %v968_v10 = vpack.c.bf16 %v967_v9, %v967_v9 }
 0xa27   : > { %1384 = vmatmul.mubr.msk.bf16.vlgmr.msra.gmra.mxu1 %vm599_vm4, %v968_v10 }
 0xae7   : > { %v1011_v19 = vpop.f32.mrf.mxu1 }
 0xae8   : > { %v1284_v20 = vpack.c.bf16 %v1011_v19, %v1011_v19 }
 0xae9   : > { %v1385_v21 = vpop.f32.mrf.mxu1 }
 0xaea   : > { %1021 = vrot.lane.b32.xlu1 %v1284_v20, %s1499_s29 }
 0xaeb   : > { %v1014_v22 = vpop.f32.mrf.mxu1 }
 0xaed   : > { %v1386_v23 = vpop.f32.mrf.mxu1 }
 0xb5c   : > { %v1022_v24 = vpop.permute.xlu1 %1021 }
 0xb5d   : > { %1025 = vst.msk [vmem:[#allocation2] sm:$0xf] %vm1024_vm9, %v1022_v24 }
 0xb64   : > { %v1026_v25 = vld [vmem:[#allocation2] sm:$0xf] }
 0xb65   : > { %1404 = vmatmul.mubr.bf16.vlgmr.msra.gmra.mxu0 %v1026_v25 }
 0xc25   : > { %v1125_v26 = vpop.f32.mrf.mxu0 }
 0xc26   : > { %v1131_v6 = vadd.f32 %v1125_v26, %v1579_v0 }
 0xc27   : > { %v1405_v28 = vpop.f32.mrf.mxu0 }
 0xc28   : > { %v1139_v29 = vadd.f32 %v1278_v27, %v1131_v6 }
 0xc29   : > { %v1128_v30 = vpop.f32.mrf.mxu0 }
 0xc2a   : > { %1140 = vst [vmem:[%s392_s19] sm:$0xff] %v1139_v29 }
 0xc2b   : > { %v1406_v31 = vpop.f32.mrf.mxu0 }
 0xc2c PF: > { %s19_s11 = sadd.s32 1, %s1495_s11   ;;  %s1785_s30 = smov %s1491_s10 }
 0xc2d   : > { %p16_p5 = scmp.ge.s32.totalorder %s19_s11, 4   ;;  %s1786_s10 = smov %s1788_s12 }
 0xc2f   :  { %18 = sbr.rel (!%p16_p5) target bundleno = 2 (0x2), region = 92 }

// kernel: cross_attention_forward.9
= control target key start
LH: loop header
LB: loop body
LE: loop exit
PB: predicated region body
PF: predicated region fallthrough
CT: control target
= control target key end

     0   :  { %s1550_s30 = smov 0   ;;  %s1552_s10 = smov 0   ;;  %s1771_s0 = inlined_call_operand.vmem [shape: f32[2,8,128], index: 0, kind: input, shape index: {}]   ;;  %s1772_s1 = inlined_call_operand.vmem [shape: f32[1,128], index: 1, kind: input, shape index: {}]   ;;  %s1773_s2 = inlined_call_operand.vmem [shape: f32[1,128], index: 2, kind: input, shape index: {}]   ;;  %s1774_s3 = inlined_call_operand.vmem [shape: bf16[128,128], index: 3, kind: input, shape index: {}]   ;;  %s1775_s4 = inlined_call_operand.vmem [shape: f32[1,128], index: 4, kind: input, shape index: {}]   ;;  %s1776_s5 = inlined_call_operand.vmem [shape: bf16[2,16,256], index: 5, kind: input, shape index: {}]   ;;  %s1777_s6 = inlined_call_operand.vmem [shape: f32[2,1,16], index: 6, kind: input, shape index: {}]   ;;  %s1778_s7 = inlined_call_operand.vmem [shape: bf16[128,128], index: 7, kind: input, shape index: {}]   ;;  %s1779_s8 = inlined_call_operand.vmem [shape: f32[1,128], index: 8, kind: input, shape index: {}]   ;;  %s1780_s9 = inlined_call_operand.vmem [shape: f32[2,8,128], index: 9, kind: output, shape index: {}]  }
   0x1   :  { %s1554_s11 = smov 0  }
   0x2 LB: > { %s31_s12 = sadd.s32 1, %s1489_s10  ;;  %p1237_p0 = scmp.ge.s32.totalorder %s1493_s11, 1  ;;  %s1493_s11 = sphi %s1554_s11, %s19_s11   ;;  %s1489_s10 = sphi %s1552_s10, %s1782_s10   ;;  %s1485_s30 = sphi %s1550_s30, %s1781_s30  }
   0x3   : > { %p33_p1 = scmp.ge.s32.totalorder %s31_s12, 2  ;;  %p323_p2 = scmp.lt.s32.totalorder %s1493_s11, 3 }
   0x5   : > { %s1784_s12 = smov (%p33_p1, %s31_s12), 0  ;;  %p324_p3 = pnand %p1237_p0, %p323_p2 }
   0x6   : > { %p371_p4 = scmp.lt.s32.totalorder (!%p324_p3), %s1485_s30, 1  ;;  %s1497_s15 = smov (!%p324_p3), 96  }
   0x7   : > { %327 = sbr.rel (%p324_p3) target bundleno = 3116 (0xc2c), region = 56  ;;  %s1499_s16 = smov (!%p324_p3), 32  }
   0xc   : > { %s1786_s30 = smov (!%p371_p4, %s1485_s30), 1  ;;  %v1433_v5 = vld [vmem:[%s1774_s3 + $0x38] sm:$0xff]   ;;  %v1495_v6 = vmov 0.0   ;;  %v1434_v7 = vld [vmem:[%s1774_s3 + $0x30] sm:$0xff]   ;;  %v1435_v8 = vld [vmem:[%s1774_s3 + $0x28] sm:$0xff]   ;;  %vm1496_vm0 = vmmov 0  }
   0xd   : > { %s1238_s13 = sshll.u32 %s1786_s30, 3  ;;  %s1278_s14 = sshll.u32 %s1786_s30, 4  ;;  %1316 = vmatprep.subr.bf16.mxu0 %v1495_v6  ;;  %1336 = vmatprep.subr.bf16.mxu1 %v1495_v6  ;;  %v1436_v9 = vld [vmem:[%s1774_s3 + $0x20] sm:$0xff]   ;;  %v1437_v10 = vld [vmem:[%s1774_s3 + $0x18] sm:$0xff]   ;;  %v1438_v11 = vld [vmem:[%s1774_s3 + $0x10] sm:$0xff]   ;;  %vm559_vm1 = vcmask 261120  }
   0xe   : > { %s377_s17 = scalar_lea.vmem %s1771_s0, %s1238_s13  ;;  %s1580_s20 = scalar_lea.vmem %s1776_s5, %s1278_s14  ;;  %1317 = vmatpush3.bf16.msra.mxu0 %v1433_v5  ;;  %1332 = vmatprep.mubr.msk.bf16.mxu0 %vm1496_vm0, %v1495_v6  ;;  %v1439_v12 = vld [vmem:[%s1774_s3 + $0x8] sm:$0xff]   ;;  %v1440_v13 = vld [vmem:[%s1774_s3] sm:$0xff]   ;;  %vm606_vm4 = vcmask 130048   ;;  %vm669_vm5 = vcmask 257024   ;;  %vm787_vm6 = vcmask 519424   ;;  %vm904_vm7 = vcmask 781824  }
   0xf   : > { %v1582_v0 = vld [vmem:[%s377_s17] sm:$0xff]  ;;  %1318 = vmatprep.subr.bf16.mxu0 %v1495_v6  ;;  %1338 = vmatprep.mubr.msk.bf16.mxu1 %vm1496_vm0, %v1495_v6  ;;  %s385_s14 = scalar_lea.vmem %s1777_s6, %s1786_s30  ;;  %vm1021_vm8 = vcmask 1044224   ;;  %s392_s23 = scalar_lea.vmem %s1780_s9, %s1238_s13 }
  0x10   : > { %397 = vadd.xlane.f32.xlu0 %v1582_v0  ;;  %v1625_v14 = vld [vmem:[%s1580_s20] ss:$8 sps:$4 sm:$0xff]   ;;  %v1659_v50 = vld [vmem:[%s1580_s20 + $0x4] ss:$8 sps:$4 sm:$0xff]   ;;  %s1498_s20 = smov 64  }
  0x11   : > { %v564_v15 = vsel %vm559_vm1, %v1625_v14, 0  ;;  %v1242_v25 = vld [vmem:[%s1772_s1] ss:$0 sm:$0xff] }
  0x12   : > { %1319 = vmatpush3.bf16.msra.mxu0 %v1434_v7  ;;  %1337 = vmatpush3.bf16.xpose.msra.mxu1 %v564_v15  ;;  %v1243_v27 = vld [vmem:[%s1773_s2] ss:$0 sm:$0xff] }
  0x13   : > { %1320 = vmatprep.subr.bf16.mxu0 %v1495_v6  ;;  %1342 = vmatprep.subr.bf16.mxu1 %v1495_v6  ;;  %v1244_v31 = vld [vmem:[%s1775_s4] ss:$0 sm:$0xff] }
  0x14   : > { %v1651_v38 = vld [vmem:[%s385_s14] ss:$0 sm:$0xff] }
  0x16   : > { %1321 = vmatpush3.bf16.msra.mxu0 %v1435_v8 }
  0x17   : > { %1322 = vmatprep.subr.bf16.mxu0 %v1495_v6 }
  0x1a   : > { %1323 = vmatpush3.bf16.msra.mxu0 %v1436_v9 }
  0x1b   : > { %1324 = vmatprep.subr.bf16.mxu0 %v1495_v6 }
  0x1e   : > { %1325 = vmatpush3.bf16.msra.mxu0 %v1437_v10 }
  0x1f   : > { %1326 = vmatprep.subr.bf16.mxu0 %v1495_v6 }
  0x22   : > { %1327 = vmatpush3.bf16.msra.mxu0 %v1438_v11 }
  0x23   : > { %1328 = vmatprep.subr.bf16.mxu0 %v1495_v6 }
  0x26   : > { %1329 = vmatpush3.bf16.msra.mxu0 %v1439_v12 }
  0x27   : > { %1330 = vmatprep.subr.bf16.mxu0 %v1495_v6 }
  0x2a   : > { %1331 = vmatpush3.bf16.msra.mxu0 %v1440_v13 }
  0x2b   : > { %1384 = vmatprep.subr.bf16.mxu0 %v1495_v6 }
  0x99   : > { %v398_v1 = vpop.xlane.xlu0 %397 }
  0x9a   : > { %v400_v2 = vmul.f32 0.0078125, %v398_v1 }
  0x9c   : > { %v401_v3 = vsub.f32 %v1582_v0, %v400_v2 }
  0x9e   : > { %v402_v4 = vmul.f32 %v401_v3, %v401_v3 }
  0xa0   : > { %403 = vadd.xlane.f32.xlu0 %v402_v4 }
  0xb6   : > { %674 = vrot.lane.b32.xlu0 %v1625_v14, %s1497_s15 }
 0x129   : > { %v404_v16 = vpop.xlane.xlu0 %403 }
 0x12a   : > { %v405_v17 = vmul.f32 0.007874016, %v404_v16 }
 0x12c   : > { %1451 = vrsqrt.f32 %v405_v17  ;;  %vm408_vm2 = vcmp.eq.f32.partialorder %v405_v17, inf  ;;  %v411_v20 = vand.u32 2147483648, %v405_v17  ;;  %vm410_vm3 = vcmp.eq.f32.partialorder %v405_v17, 0.0 }
 0x12d   : > { %v675_v53 = vpop.permute.xlu0 %674 }
 0x12e   : > { %v680_v55 = vsel %vm559_vm1, %v675_v53, 0 }
 0x139   : > { %v1452_v18 = vpop.eup %1451 }
 0x13a   : > { %v407_v19 = vmul.f32 %v1452_v18, %v405_v17 }
 0x13c   : > { %v409_v21 = vsel %vm408_vm2, %v405_v17, %v407_v19 }
 0x13d   : > { %v412_v22 = vsel %vm410_vm3, %v411_v20, %v409_v21 }
 0x13e   : > { %v413_v23 = vadd.f32 1e-06, %v412_v22 }
 0x140   : > { %1453 = vrcp.f32 %v413_v23 }
 0x14d   : > { %v1454_v24 = vpop.eup %1453 }
 0x14e   : > { %v415_v26 = vmul.f32 %v1454_v24, %v401_v3 }
 0x150   : > { %v422_v28 = vmul.f32 %v1242_v25, %v415_v26 }
 0x152   : > { %v429_v29 = vadd.f32 %v1243_v27, %v422_v28 }
 0x154   : > { %v430_v30 = vpack.c.bf16 %v429_v29, %v429_v29 }
 0x156   : > { %1333 = vmatmul.mubr.bf16.vlgmr.msra.gmra.mxu0 %v430_v30 }
 0x157   : > { %1400 = vmatprep.mubr.msk.bf16.mxu0 %vm1496_vm0, %v1495_v6 }
 0x216   : > { %v536_v32 = vpop.f32.mrf.mxu0 }
 0x217   : > { %v537_v33 = vadd.f32 %v1244_v31, %v536_v32 }
 0x218   : > { %v1334_v34 = vpop.f32.mrf.mxu0 }
 0x219   : > { %v1641_v35 = vpack.c.bf16 %v537_v33, %v537_v33 }
 0x21a   : > { %v539_v36 = vpop.f32.mrf.mxu0 }
 0x21b   : > { %1339 = vmatmul.mubr.msk.bf16.vlgmr.msra.gmra.mxu1 %vm559_vm1, %v1641_v35 }
 0x21c   : > { %v1335_v37 = vpop.f32.mrf.mxu0  ;;  %1344 = vmatprep.mubr.msk.bf16.mxu1 %vm1496_vm0, %v1495_v6  ;;  %1343 = vmatpush3.bf16.msra.mxu1 %v1659_v50 }
 0x21d   : > { %1348 = vmatprep.subr.bf16.mxu1 %v1495_v6 }
 0x2db   : > { %v600_v39 = vpop.f32.mrf.mxu1 }
 0x2dc   : > { %v601_v40 = vadd.f32 %v1651_v38, %v600_v39 }
 0x2dd   : > { %v1340_v41 = vpop.f32.mrf.mxu1 }
 0x2de   : > { %v607_v42 = vsel %vm606_vm4, %v601_v40, -inf }
 0x2df   : > { %608 = vmax.xlane.f32.xlu1 %v607_v42  ;;  %v603_v43 = vpop.f32.mrf.mxu1 }
 0x2e1   : > { %v1341_v44 = vpop.f32.mrf.mxu1 }
 0x368   : > { %v609_v45 = vpop.xlane.xlu1 %608 }
 0x369   : > { %v610_v46 = vsub.f32 %v601_v40, %v609_v45 }
 0x36b   : > { %v611_v47 = vmul.f32 1.442695, %v610_v46 }
 0x36d   : > { %1455 = vpow2.f32 %v611_v47 }
 0x37a   : > { %v1456_v48 = vpop.eup %1455 }
 0x37b   : > { %v613_v49 = vsel %vm606_vm4, %v1456_v48, 0.0 }
 0x37c   : > { %614 = vadd.xlane.f32.xlu1 %v613_v49 }
 0x38d   : > { %672 = vrot.lane.b32.xlu1 %v1641_v35, %s1497_s15 }
 0x405   : > { %v615_v51 = vpop.xlane.xlu1 %614 }
 0x406   : > { %1457 = vrcp.f32 %v615_v51 }
 0x409   : > { %v673_v57 = vpop.permute.xlu1 %672 }
 0x413   : > { %v1458_v52 = vpop.eup %1457 }
 0x414   : > { %v617_v54 = vmul.f32 %v1458_v52, %v1456_v48 }
 0x416   : > { %v618_v56 = vpack.c.bf16 %v617_v54, %v617_v54 }
 0x418   : > { %1345 = vmatmul.mubr.msk.bf16.vlgmr.msra.gmra.mxu1 %vm606_vm4, %v618_v56 }
 0x419   : > { %1349 = vmatpush3.bf16.xpose.msra.mxu1 %v680_v55  ;;  %1350 = vmatprep.mubr.msk.bf16.mxu1 %vm1496_vm0, %v1495_v6 }
 0x41a   : > { %1354 = vmatprep.subr.bf16.mxu1 %v1495_v6 }
 0x420   : > { %1351 = vmatmul.mubr.msk.bf16.vlgmr.msra.gmra.mxu1 %vm559_vm1, %v673_v57 }
 0x421   : > { %1356 = vmatprep.mubr.msk.bf16.mxu1 %vm1496_vm0, %v1495_v6 }
 0x4d8   : > { %v662_v58 = vpop.f32.mrf.mxu1 }
 0x4d9   : > { %v668_v59 = vpack.c.bf16 %v662_v58, %v662_v58 }
 0x4da   : > { %v1346_v60 = vpop.f32.mrf.mxu1 }
 0x4db   : > { %670 = vst.msk [vmem:[#allocation2] sm:$0xf] %vm669_vm5, %v668_v59 }
 0x4dc   : > { %v665_v61 = vpop.f32.mrf.mxu1 }
 0x4de   : > { %v1347_v62 = vpop.f32.mrf.mxu1 }
 0x4e0   : > { %v716_v63 = vpop.f32.mrf.mxu1 }
 0x4e1   : > { %v717_v1 = vadd.f32 %v1651_v38, %v716_v63 }
 0x4e2   : > { %v1352_v2 = vpop.f32.mrf.mxu1 }
 0x4e3   : > { %v722_v3 = vsel %vm606_vm4, %v717_v1, -inf }
 0x4e4   : > { %723 = vmax.xlane.f32.xlu1 %v722_v3  ;;  %v719_v4 = vpop.f32.mrf.mxu1 }
 0x4e5   : > { %v1443_v4 = vld [vmem:[%s1778_s7 + $0x38] sm:$0xff]  }
 0x4e6   : > { %v1353_v5 = vpop.f32.mrf.mxu1  ;;  %1385 = vmatpush3.bf16.msra.mxu0 %v1443_v4 }
 0x4e7   : > { %v1444_v5 = vld [vmem:[%s1778_s7 + $0x30] sm:$0xff]   ;;  %1386 = vmatprep.subr.bf16.mxu0 %v1495_v6 }
 0x4ea   : > { %1387 = vmatpush3.bf16.msra.mxu0 %v1444_v5 }
 0x4eb   : > { %1388 = vmatprep.subr.bf16.mxu0 %v1495_v6 }
 0x4f5   : > { %791 = vrot.lane.b32.xlu1 %v1625_v14, %s1498_s20 }
 0x4f9   : > { %789 = vrot.lane.b32.xlu1 %v1641_v35, %s1498_s20 }
 0x56d   : > { %v724_v7 = vpop.xlane.xlu1 %723 }
 0x56e   : > { %v725_v8 = vsub.f32 %v717_v1, %v724_v7  ;;  %v1445_v7 = vld [vmem:[%s1778_s7 + $0x28] sm:$0xff]  }
 0x56f   : > { %1389 = vmatpush3.bf16.msra.mxu0 %v1445_v7 }
 0x570   : > { %v726_v9 = vmul.f32 1.442695, %v725_v8  ;;  %v1446_v8 = vld [vmem:[%s1778_s7 + $0x20] sm:$0xff]   ;;  %1390 = vmatprep.subr.bf16.mxu0 %v1495_v6 }
 0x571   : > { %v792_v17 = vpop.permute.xlu1 %791 }
 0x572   : > { %1459 = vpow2.f32 %v726_v9  ;;  %v797_v18 = vsel %vm559_vm1, %v792_v17, 0  ;;  %v1447_v9 = vld [vmem:[%s1778_s7 + $0x18] sm:$0xff]  }
 0x573   : > { %1391 = vmatpush3.bf16.msra.mxu0 %v1446_v8 }
 0x574   : > { %1392 = vmatprep.subr.bf16.mxu0 %v1495_v6 }
 0x575   : > { %v790_v20 = vpop.permute.xlu1 %789 }
 0x577   : > { %1393 = vmatpush3.bf16.msra.mxu0 %v1447_v9 }
 0x578   : > { %1394 = vmatprep.subr.bf16.mxu0 %v1495_v6 }
 0x57f   : > { %v1460_v10 = vpop.eup %1459 }
 0x580   : > { %v728_v11 = vsel %vm606_vm4, %v1460_v10, 0.0 }
 0x581   : > { %729 = vadd.xlane.f32.xlu0 %v728_v11  ;;  %v1449_v11 = vld [vmem:[%s1778_s7 + $0x8] sm:$0xff]  }
 0x597   : > { %734 = vrot.lane.b32.xlu0 %v1659_v50, %s1497_s15 }
 0x60a   : > { %v730_v12 = vpop.xlane.xlu0 %729 }
 0x60b   : > { %1461 = vrcp.f32 %v730_v12  ;;  %v1450_v12 = vld [vmem:[%s1778_s7] sm:$0xff]  }
 0x60e   : > { %v735_v13 = vpop.permute.xlu0 %734 }
 0x60f   : > { %1355 = vmatpush3.bf16.msra.mxu1 %v735_v13 }
 0x610   : > { %1360 = vmatprep.subr.bf16.mxu1 %v1495_v6 }
 0x618   : > { %v1462_v15 = vpop.eup %1461 }
 0x619   : > { %v732_v16 = vmul.f32 %v1462_v15, %v1460_v10  ;;  %v1448_v10 = vld [vmem:[%s1778_s7 + $0x10] sm:$0xff]  }
 0x61a   : > { %1395 = vmatpush3.bf16.msra.mxu0 %v1448_v10 }
 0x61b   : > { %v733_v19 = vpack.c.bf16 %v732_v16, %v732_v16  ;;  %1396 = vmatprep.subr.bf16.mxu0 %v1495_v6 }
 0x61d   : > { %1357 = vmatmul.mubr.msk.bf16.vlgmr.msra.gmra.mxu1 %vm606_vm4, %v733_v19 }
 0x61e   : > { %1361 = vmatpush3.bf16.xpose.msra.mxu1 %v797_v18  ;;  %1362 = vmatprep.mubr.msk.bf16.mxu1 %vm1496_vm0, %v1495_v6 }
 0x61f   : > { %1366 = vmatprep.subr.bf16.mxu1 %v1495_v6  ;;  %1397 = vmatpush3.bf16.msra.mxu0 %v1449_v11 }
 0x620   : > { %1398 = vmatprep.subr.bf16.mxu0 %v1495_v6 }
 0x623   : > { %1399 = vmatpush3.bf16.msra.mxu0 %v1450_v12 }
 0x625   : > { %1363 = vmatmul.mubr.msk.bf16.vlgmr.msra.gmra.mxu1 %vm559_vm1, %v790_v20 }
 0x626   : > { %1368 = vmatprep.mubr.msk.bf16.mxu1 %vm1496_vm0, %v1495_v6 }
 0x6dd   : > { %v1691_v21 = vpop.f32.mrf.mxu1 }
 0x6de   : > { %v1279_v61 = vpack.c.bf16 %v1691_v21, %v1691_v21 }
 0x6df   : > { %v1358_v22 = vpop.f32.mrf.mxu1 }
 0x6e0   : > { %v1275_v22 = vld [vmem:[%s1779_s8] ss:$0 sm:$0xff] }
 0x6e1   : > { %v777_v23 = vpop.f32.mrf.mxu1 }
 0x6e3   : > { %v1359_v24 = vpop.f32.mrf.mxu1 }
 0x6e5   : > { %v833_v25 = vpop.f32.mrf.mxu1 }
 0x6e6   : > { %v834_v26 = vadd.f32 %v1651_v38, %v833_v25 }
 0x6e7   : > { %v1364_v27 = vpop.f32.mrf.mxu1 }
 0x6e8   : > { %v839_v28 = vsel %vm606_vm4, %v834_v26, -inf }
 0x6e9   : > { %840 = vmax.xlane.f32.xlu1 %v839_v28  ;;  %v836_v29 = vpop.f32.mrf.mxu1 }
 0x6eb   : > { %v1365_v30 = vpop.f32.mrf.mxu1 }
 0x6fa   : > { %908 = vrot.lane.b32.xlu1 %v1625_v14, %s1499_s16 }
 0x6fe   : > { %906 = vrot.lane.b32.xlu1 %v1641_v35, %s1499_s16 }
 0x772   : > { %v841_v31 = vpop.xlane.xlu1 %840 }
 0x773   : > { %v842_v32 = vsub.f32 %v834_v26, %v841_v31 }
 0x775   : > { %v843_v33 = vmul.f32 1.442695, %v842_v32 }
 0x776   : > { %v909_v35 = vpop.permute.xlu1 %908 }
 0x777   : > { %1463 = vpow2.f32 %v843_v33  ;;  %v914_v41 = vsel %vm559_vm1, %v909_v35, 0 }
 0x77a   : > { %v907_v43 = vpop.permute.xlu1 %906 }
 0x784   : > { %v1464_v34 = vpop.eup %1463 }
 0x785   : > { %v845_v36 = vsel %vm606_vm4, %v1464_v34, 0.0 }
 0x786   : > { %846 = vadd.xlane.f32.xlu0 %v845_v36 }
 0x79c   : > { %851 = vrot.lane.b32.xlu0 %v1659_v50, %s1498_s20 }
 0x80f   : > { %v847_v37 = vpop.xlane.xlu0 %846 }
 0x810   : > { %1465 = vrcp.f32 %v847_v37 }
 0x813   : > { %v852_v39 = vpop.permute.xlu0 %851 }
 0x814   : > { %1367 = vmatpush3.bf16.msra.mxu1 %v852_v39 }
 0x815   : > { %1372 = vmatprep.subr.bf16.mxu1 %v1495_v6 }
 0x81d   : > { %v1466_v14 = vpop.eup %1465 }
 0x81e   : > { %v849_v40 = vmul.f32 %v1466_v14, %v1464_v34 }
 0x820   : > { %v850_v42 = vpack.c.bf16 %v849_v40, %v849_v40 }
 0x822   : > { %1369 = vmatmul.mubr.msk.bf16.vlgmr.msra.gmra.mxu1 %vm606_vm4, %v850_v42 }
 0x823   : > { %1373 = vmatpush3.bf16.xpose.msra.mxu1 %v914_v41  ;;  %1374 = vmatprep.mubr.msk.bf16.mxu1 %vm1496_vm0, %v1495_v6 }
 0x824   : > { %1378 = vmatprep.subr.bf16.mxu1 %v1495_v6 }
 0x82a   : > { %1375 = vmatmul.mubr.msk.bf16.vlgmr.msra.gmra.mxu1 %vm559_vm1, %v907_v43 }
 0x82b   : > { %1380 = vmatprep.mubr.msk.bf16.mxu1 %vm1496_vm0, %v1495_v6 }
 0x8e2   : > { %v891_v44 = vpop.f32.mrf.mxu1 }
 0x8e3   : > { %v1280_v55 = vpack.c.bf16 %v891_v44, %v891_v44 }
 0x8e4   : > { %v1370_v45 = vpop.f32.mrf.mxu1 }
 0x8e6   : > { %v894_v46 = vpop.f32.mrf.mxu1 }
 0x8e8   : > { %v1371_v47 = vpop.f32.mrf.mxu1 }
 0x8ea   : > { %v950_v48 = vpop.f32.mrf.mxu1 }
 0x8eb   : > { %v951_v49 = vadd.f32 %v1651_v38, %v950_v48 }
 0x8ec   : > { %v1376_v51 = vpop.f32.mrf.mxu1 }
 0x8ed   : > { %v956_v52 = vsel %vm606_vm4, %v951_v49, -inf }
 0x8ee   : > { %957 = vmax.xlane.f32.xlu0 %v956_v52  ;;  %v953_v53 = vpop.f32.mrf.mxu1 }
 0x8f0   : > { %v1377_v54 = vpop.f32.mrf.mxu1 }
 0x904   : > { %968 = vrot.lane.b32.xlu0 %v1659_v50, %s1499_s16 }
 0x908   : > { %901 = vrot.lane.b32.xlu0 %v1280_v55, %s1498_s20 }
 0x977   : > { %v958_v56 = vpop.xlane.xlu0 %957 }
 0x978   : > { %v959_v57 = vsub.f32 %v951_v49, %v958_v56 }
 0x97a   : > { %v960_v58 = vmul.f32 1.442695, %v959_v57 }
 0x97b   : > { %v969_v59 = vpop.permute.xlu0 %968 }
 0x97c   : > { %1467 = vpow2.f32 %v960_v58  ;;  %1379 = vmatpush3.bf16.msra.mxu1 %v969_v59 }
 0x97f   : > { %v902_v63 = vpop.permute.xlu0 %901 }
 0x989   : > { %v1468_v60 = vpop.eup %1467 }
 0x98a   : > { %v962_v38 = vsel %vm606_vm4, %v1468_v60, 0.0 }
 0x98b   : > { %963 = vadd.xlane.f32.xlu1 %v962_v38 }
 0x99c   : > { %784 = vrot.lane.b32.xlu1 %v1279_v61, %s1499_s16 }
 0xa14   : > { %v964_v62 = vpop.xlane.xlu1 %963 }
 0xa15   : > { %1469 = vrcp.f32 %v964_v62 }
 0xa18   : > { %v785_v50 = vpop.permute.xlu1 %784 }
 0xa19   : > { %788 = vst.msk [vmem:[#allocation2] sm:$0xf] %vm787_vm6, %v785_v50 }
 0xa1a   : > { %905 = vst.msk [vmem:[#allocation2] sm:$0xf] %vm904_vm7, %v902_v63 }
 0xa22   : > { %v1470_v1 = vpop.eup %1469 }
 0xa23   : > { %v966_v2 = vmul.f32 %v1470_v1, %v1468_v60 }
 0xa25   : > { %v967_v3 = vpack.c.bf16 %v966_v2, %v966_v2 }
 0xa27   : > { %1381 = vmatmul.mubr.msk.bf16.vlgmr.msra.gmra.mxu1 %vm606_vm4, %v967_v3 }
 0xae7   : > { %v1008_v13 = vpop.f32.mrf.mxu1 }
 0xae8   : > { %v1281_v15 = vpack.c.bf16 %v1008_v13, %v1008_v13 }
 0xae9   : > { %v1382_v16 = vpop.f32.mrf.mxu1 }
 0xaea   : > { %1018 = vrot.lane.b32.xlu1 %v1281_v15, %s1497_s15 }
 0xaeb   : > { %v1011_v17 = vpop.f32.mrf.mxu1 }
 0xaed   : > { %v1383_v18 = vpop.f32.mrf.mxu1 }
 0xb5c   : > { %v1019_v19 = vpop.permute.xlu1 %1018 }
 0xb5d   : > { %1022 = vst.msk [vmem:[#allocation2] sm:$0xf] %vm1021_vm8, %v1019_v19 }
 0xb64   : > { %v1023_v20 = vld [vmem:[#allocation2] sm:$0xf] }
 0xb65   : > { %1401 = vmatmul.mubr.bf16.vlgmr.msra.gmra.mxu0 %v1023_v20 }
 0xc25   : > { %v1122_v21 = vpop.f32.mrf.mxu0 }
 0xc26   : > { %v1128_v6 = vadd.f32 %v1122_v21, %v1582_v0 }
 0xc27   : > { %v1402_v23 = vpop.f32.mrf.mxu0 }
 0xc28   : > { %v1136_v24 = vadd.f32 %v1275_v22, %v1128_v6 }
 0xc29   : > { %v1125_v25 = vpop.f32.mrf.mxu0 }
 0xc2a   : > { %1137 = vst [vmem:[%s392_s23] sm:$0xff] %v1136_v24 }
 0xc2b   : > { %v1403_v26 = vpop.f32.mrf.mxu0 }
 0xc2c PF: > { %s19_s11 = sadd.s32 1, %s1493_s11   ;;  %s1781_s30 = smov %s1489_s10 }
 0xc2d   : > { %p16_p5 = scmp.ge.s32.totalorder %s19_s11, 4   ;;  %s1782_s10 = smov %s1784_s12 }
 0xc2f   :  { %18 = sbr.rel (!%p16_p5) target bundleno = 2 (0x2), region = 92 }

// kernel: cross_attention_forward.11
= control target key start
LH: loop header
LB: loop body
LE: loop exit
PB: predicated region body
PF: predicated region fallthrough
CT: control target
= control target key end

     0   :  { %s163_s0 = inlined_call_operand.vmem [shape: f32[16,128], index: 0, kind: input, shape index: {}]   ;;  %s164_s1 = inlined_call_operand.vmem [shape: f32[1,128], index: 1, kind: input, shape index: {}]   ;;  %s165_s2 = inlined_call_operand.vmem [shape: f32[1,128], index: 2, kind: input, shape index: {}]   ;;  %s166_s3 = inlined_call_operand.hbm [shape: f32[16,128], index: 3, kind: output, shape index: {}]  }
   0x1   :  { %v15_v0 = vld [vmem:[%s163_s0] sm:$0xff] }
   0x2   :  { %8 = vsyncpa [#allocation3], 0  ;;  %19 = vadd.xlane.f32.xlu0 %v15_v0  ;;  %v16_v1 = vld [vmem:[%s163_s0 + $0x8] sm:$0xff]  ;;  %v90_v27 = vld [vmem:[%s164_s1] ss:$0 sm:$0xff]  ;;  %s125_s19 = smov [#allocation2]  }
   0x3   :  { %v91_v29 = vld [vmem:[%s165_s2] ss:$0 sm:$0xff]  ;;  %s79_s20 = sshll.u32 %s125_s19, 4  ;;  %s80_s20 = int_to_ptr.vmem [resolvable:$true] %s79_s20 }
   0x4   :  { %s103_s21 = scalar_lea.vmem %s80_s20, 256  ;;  %p108_p1 = scmp.lt.s32.totalorder %s80_s20, %s80_s20 }
   0x5   :  { %p104_p0 = scmp.ne.s32.totalorder %s80_s20, %s103_s21  ;;  %p109_p2 = scmp.lt.s32.totalorder %s103_s21, %s103_s21 }
   0x6   :  { %21 = vadd.xlane.f32.xlu0 %v16_v1 }
   0x7   :  { %p110_p3 = por %p109_p2, %p108_p1 }
   0x9   :  { %p111_p4 = pnand %p110_p3, %p104_p0 }
  0x8b   :  { %v20_v2 = vpop.xlane.xlu0 %19 }
  0x8c   :  { %v24_v3 = vmul.f32 0.0078125, %v20_v2 }
  0x8e   :  { %v26_v4 = vsub.f32 %v15_v0, %v24_v3 }
  0x8f   :  { %v22_v5 = vpop.xlane.xlu0 %21 }
  0x90   :  { %v25_v6 = vmul.f32 0.0078125, %v22_v5  ;;  %v28_v7 = vmul.f32 %v26_v4, %v26_v4 }
  0x92   :  { %v27_v8 = vsub.f32 %v16_v1, %v25_v6  ;;  %30 = vadd.xlane.f32.xlu1 %v28_v7 }
  0x94   :  { %v29_v9 = vmul.f32 %v27_v8, %v27_v8 }
  0x96   :  { %32 = vadd.xlane.f32.xlu1 %v29_v9 }
 0x11b   :  { %v31_v10 = vpop.xlane.xlu1 %30 }
 0x11c   :  { %v34_v11 = vmul.f32 0.007874016, %v31_v10 }
 0x11e   :  { %95 = vrsqrt.f32 %v34_v11  ;;  %vm38_vm0 = vcmp.eq.f32.partialorder %v34_v11, inf  ;;  %v41_v16 = vand.u32 2147483648, %v34_v11  ;;  %vm40_vm1 = vcmp.eq.f32.partialorder %v34_v11, 0.0 }
 0x11f   :  { %v33_v12 = vpop.xlane.xlu1 %32 }
 0x120   :  { %v35_v13 = vmul.f32 0.007874016, %v33_v12 }
 0x122   :  { %97 = vrsqrt.f32 %v35_v13  ;;  %vm45_vm2 = vcmp.eq.f32.partialorder %v35_v13, inf  ;;  %v48_v22 = vand.u32 2147483648, %v35_v13  ;;  %vm47_vm3 = vcmp.eq.f32.partialorder %v35_v13, 0.0 }
 0x12b   :  { %v96_v14 = vpop.eup %95 }
 0x12c   :  { %v37_v15 = vmul.f32 %v96_v14, %v34_v11 }
 0x12e   :  { %v39_v17 = vsel %vm38_vm0, %v34_v11, %v37_v15 }
 0x12f   :  { %v98_v18 = vpop.eup %97  ;;  %v42_v19 = vsel %vm40_vm1, %v41_v16, %v39_v17 }
 0x130   :  { %v50_v20 = vadd.f32 1e-06, %v42_v19  ;;  %v44_v21 = vmul.f32 %v98_v18, %v35_v13 }
 0x132   :  { %99 = vrcp.f32 %v50_v20  ;;  %v46_v23 = vsel %vm45_vm2, %v35_v13, %v44_v21 }
 0x133   :  { %v49_v24 = vsel %vm47_vm3, %v48_v22, %v46_v23 }
 0x134   :  { %v51_v25 = vadd.f32 1e-06, %v49_v24 }
 0x136   :  { %101 = vrcp.f32 %v51_v25 }
 0x13f   :  { %v100_v26 = vpop.eup %99 }
 0x140   :  { %v53_v28 = vmul.f32 %v100_v26, %v26_v4 }
 0x142   :  { %v62_v30 = vmul.f32 %v90_v27, %v53_v28 }
 0x143   :  { %v102_v31 = vpop.eup %101 }
 0x144   :  { %v55_v32 = vmul.f32 %v102_v31, %v27_v8  ;;  %v70_v33 = vadd.f32 %v91_v29, %v62_v30 }
 0x146   :  { %v63_v34 = vmul.f32 %v90_v27, %v55_v32  ;;  %72 = vst [vmem:[#allocation2] sm:$0xff] %v70_v33 }
 0x148   :  { %v71_v35 = vadd.f32 %v91_v29, %v63_v34 }
 0x14a   :  { %73 = vst [vmem:[#allocation2 + $0x8] sm:$0xff] %v71_v35 }
 0x14b   :  { %114 = shalt.err (!%p111_p4)
}
 0x14c   :  { %s126_s1 = smov 128   ;;  %s127_s2 = smov 8  }
 0x14d   :  { %85 = dma.vmem_to_hbm [thread:$0]  %s80_s20, 256, %s166_s3, [#allocation3], %s126_s1, %s126_s1, %s127_s2  }
 0x14e   :  { %123 = dma.done.wait [#allocation3], 256  }
 0x14f   :  { %124 = vsyncadd [#allocation3], 4294967040 }
 0x150   :  { %89 = vsyncpa [#allocation3], 1 }

// kernel: cross_attention_forward.10
= control target key start
LH: loop header
LB: loop body
LE: loop exit
PB: predicated region body
PF: predicated region fallthrough
CT: control target
= control target key end

     0   :  { %v577_v24 = vmov 0   ;;  %s758_s0 = inlined_call_operand.vmem [shape: f32[16,128], index: 0, kind: input, shape index: {}]   ;;  %s759_s3 = inlined_call_operand.vmem [shape: bf16[128,256], index: 3, kind: input, shape index: {}]   ;;  %s760_s5 = inlined_call_operand.vmem [shape: bf16[256,128], index: 5, kind: input, shape index: {}]   ;;  %s761_s1 = inlined_call_operand.vmem [shape: f32[1,128], index: 1, kind: input, shape index: {}]   ;;  %s762_s2 = inlined_call_operand.vmem [shape: f32[1,128], index: 2, kind: input, shape index: {}]   ;;  %s763_s4 = inlined_call_operand.vmem [shape: f32[1,256], index: 4, kind: input, shape index: {}]   ;;  %s764_s6 = inlined_call_operand.vmem [shape: f32[1,128], index: 6, kind: input, shape index: {}]   ;;  %s765_s7 = inlined_call_operand.vmem [shape: f32[16,128], index: 7, kind: output, shape index: {}]  }
   0x1   :  { %v621_v0 = vld [vmem:[%s758_s0] sm:$0xff]  ;;  %v627_v1 = vld [vmem:[%s758_s0 + $0x8] sm:$0xff]  ;;  %v528_v10 = vld [vmem:[%s759_s3 + $0x74] ss:$8 sps:$4 sm:$0xff]   ;;  %257 = vmatprep.mubr.bf16.mxu0 %v577_v24 }
   0x2   :  { %35 = vadd.xlane.f32.xlu0 %v621_v0  ;;  %v530_v11 = vld [vmem:[%s759_s3 + $0x70] ss:$8 sps:$4 sm:$0xff]   ;;  %225 = vmatprep.subr.bf16.mxu0 %v528_v10  ;;  %v531_v12 = vld [vmem:[%s759_s3 + $0x64] ss:$8 sps:$4 sm:$0xff]   ;;  %v533_v13 = vld [vmem:[%s759_s3 + $0x60] ss:$8 sps:$4 sm:$0xff]  }
   0x3   :  { %226 = vmatpush1.bf16.msra.mxu0 %v530_v11  ;;  %v534_v14 = vld [vmem:[%s759_s3 + $0x54] ss:$8 sps:$4 sm:$0xff]   ;;  %v536_v15 = vld [vmem:[%s759_s3 + $0x50] ss:$8 sps:$4 sm:$0xff]   ;;  %v537_v16 = vld [vmem:[%s759_s3 + $0x44] ss:$8 sps:$4 sm:$0xff]  }
   0x4   :  { %227 = vmatprep.subr.bf16.mxu0 %v531_v12  ;;  %v539_v17 = vld [vmem:[%s759_s3 + $0x40] ss:$8 sps:$4 sm:$0xff]   ;;  %v540_v18 = vld [vmem:[%s759_s3 + $0x34] ss:$8 sps:$4 sm:$0xff]   ;;  %v542_v19 = vld [vmem:[%s759_s3 + $0x30] ss:$8 sps:$4 sm:$0xff]  }
   0x5   :  { %v543_v20 = vld [vmem:[%s759_s3 + $0x24] ss:$8 sps:$4 sm:$0xff]   ;;  %v545_v21 = vld [vmem:[%s759_s3 + $0x20] ss:$8 sps:$4 sm:$0xff]   ;;  %v546_v22 = vld [vmem:[%s759_s3 + $0x14] ss:$8 sps:$4 sm:$0xff]  }
   0x6   :  { %37 = vadd.xlane.f32.xlu0 %v627_v1  ;;  %v548_v23 = vld [vmem:[%s759_s3 + $0x10] ss:$8 sps:$4 sm:$0xff]   ;;  %v549_v25 = vld [vmem:[%s759_s3 + $0x4] ss:$8 sps:$4 sm:$0xff]   ;;  %v551_v26 = vld [vmem:[%s759_s3] ss:$8 sps:$4 sm:$0xff]  }
   0x7   :  { %228 = vmatpush1.bf16.msra.mxu0 %v533_v13  ;;  %v553_v27 = vld [vmem:[%s760_s5 + $0x78] sm:$0xff]   ;;  %v555_v29 = vld [vmem:[%s760_s5 + $0x70] sm:$0xff]   ;;  %v557_v31 = vld [vmem:[%s760_s5 + $0x68] sm:$0xff]  }
   0x8   :  { %229 = vmatprep.subr.bf16.mxu0 %v534_v14  ;;  %v554_v28 = vld [vmem:[%s760_s5 + $0x38] sm:$0xff]   ;;  %505 = vmatprep.subr.bf16.mxu1 %v553_v27  ;;  %v556_v30 = vld [vmem:[%s760_s5 + $0x30] sm:$0xff]   ;;  %v558_v32 = vld [vmem:[%s760_s5 + $0x28] sm:$0xff]  }
   0x9   :  { %506 = vmatpush3.bf16.msra.mxu1 %v554_v28  ;;  %v559_v33 = vld [vmem:[%s760_s5 + $0x60] sm:$0xff]   ;;  %v561_v35 = vld [vmem:[%s760_s5 + $0x58] sm:$0xff]  }
   0xa   :  { %507 = vmatprep.subr.bf16.mxu1 %v555_v29  ;;  %v560_v34 = vld [vmem:[%s760_s5 + $0x20] sm:$0xff]   ;;  %v562_v36 = vld [vmem:[%s760_s5 + $0x18] sm:$0xff]  }
   0xb   :  { %230 = vmatpush1.bf16.msra.mxu0 %v536_v15  ;;  %v460_v55 = vld [vmem:[%s761_s1] ss:$0 sm:$0xff] }
   0xc   :  { %231 = vmatprep.subr.bf16.mxu0 %v537_v16  ;;  %v461_v59 = vld [vmem:[%s762_s2] ss:$0 sm:$0xff] }
   0xd   :  { %508 = vmatpush3.bf16.msra.mxu1 %v556_v30  ;;  %v127_v13 = vld [vmem:[%s763_s4] sm:$0x3] }
   0xe   :  { %509 = vmatprep.subr.bf16.mxu1 %v557_v31  ;;  %v464_v30 = vld [vmem:[%s764_s6] ss:$0 sm:$0xff] }
   0xf   :  { %232 = vmatpush1.bf16.msra.mxu0 %v539_v17 }
  0x10   :  { %233 = vmatprep.subr.bf16.mxu0 %v540_v18 }
  0x11   :  { %510 = vmatpush3.bf16.msra.mxu1 %v558_v32  ;;  %v105_v32 = vadd.f32 %v464_v30, %v621_v0 }
  0x12   :  { %511 = vmatprep.subr.bf16.mxu1 %v559_v33 }
  0x13   :  { %234 = vmatpush1.bf16.msra.mxu0 %v542_v19 }
  0x14   :  { %235 = vmatprep.subr.bf16.mxu0 %v543_v20 }
  0x15   :  { %512 = vmatpush3.bf16.msra.mxu1 %v560_v34 }
  0x16   :  { %513 = vmatprep.subr.bf16.mxu1 %v561_v35 }
  0x17   :  { %236 = vmatpush1.bf16.msra.mxu0 %v545_v21 }
  0x18   :  { %237 = vmatprep.subr.bf16.mxu0 %v546_v22 }
  0x19   :  { %514 = vmatpush3.bf16.msra.mxu1 %v562_v36  ;;  %v106_v36 = vadd.f32 %v464_v30, %v627_v1 }
  0x1b   :  { %238 = vmatpush1.bf16.msra.mxu0 %v548_v23 }
  0x1c   :  { %239 = vmatprep.subr.bf16.mxu0 %v549_v25 }
  0x1f   :  { %240 = vmatpush1.bf16.msra.mxu0 %v551_v26 }
  0x8b   :  { %v36_v2 = vpop.xlane.xlu0 %35 }
  0x8c   :  { %v40_v3 = vmul.f32 0.0078125, %v36_v2 }
  0x8e   :  { %v631_v4 = vsub.f32 %v621_v0, %v40_v3  ;;  %v563_v3 = vld [vmem:[%s760_s5 + $0x50] sm:$0xff]  }
  0x8f   :  { %v38_v5 = vpop.xlane.xlu0 %37  ;;  %515 = vmatprep.subr.bf16.mxu1 %v563_v3 }
  0x90   :  { %v41_v6 = vmul.f32 0.0078125, %v38_v5  ;;  %v44_v7 = vmul.f32 %v631_v4, %v631_v4  ;;  %v565_v5 = vld [vmem:[%s760_s5 + $0x48] sm:$0xff]  }
  0x92   :  { %v636_v8 = vsub.f32 %v627_v1, %v41_v6  ;;  %46 = vadd.xlane.f32.xlu1 %v44_v7  ;;  %v566_v6 = vld [vmem:[%s760_s5 + $0x8] sm:$0xff]   ;;  %v567_v7 = vld [vmem:[%s760_s5 + $0x40] sm:$0xff]  }
  0x94   :  { %v45_v9 = vmul.f32 %v636_v8, %v636_v8 }
  0x96   :  { %48 = vadd.xlane.f32.xlu1 %v45_v9  ;;  %v129_v9 = vlaneseq }
  0x98   :  { %v130_v10 = vshrl.u32 %v129_v9, 7 }
  0x9a   :  { %v135_v11 = vsub.s32 1, %v130_v10  ;;  %v131_v12 = vsub.s32 0, %v130_v10 }
  0x9c   :  { %v136_v15 = vrot.slane %v127_v13, %v135_v11  ;;  %v132_v16 = vrot.slane %v127_v13, %v131_v12 }
 0x11b   :  { %v47_v37 = vpop.xlane.xlu1 %46 }
 0x11c   :  { %v50_v38 = vmul.f32 0.007874016, %v47_v37 }
 0x11e   :  { %569 = vrsqrt.f32 %v50_v38  ;;  %vm54_vm0 = vcmp.eq.f32.partialorder %v50_v38, inf  ;;  %v57_v43 = vand.u32 2147483648, %v50_v38  ;;  %vm56_vm1 = vcmp.eq.f32.partialorder %v50_v38, 0.0 }
 0x11f   :  { %v49_v39 = vpop.xlane.xlu1 %48 }
 0x120   :  { %v51_v40 = vmul.f32 0.007874016, %v49_v39 }
 0x122   :  { %571 = vrsqrt.f32 %v51_v40  ;;  %vm61_vm2 = vcmp.eq.f32.partialorder %v51_v40, inf  ;;  %v64_v49 = vand.u32 2147483648, %v51_v40  ;;  %vm63_vm3 = vcmp.eq.f32.partialorder %v51_v40, 0.0 }
 0x12b   :  { %v570_v41 = vpop.eup %569 }
 0x12c   :  { %v53_v42 = vmul.f32 %v570_v41, %v50_v38 }
 0x12e   :  { %v55_v44 = vsel %vm54_vm0, %v50_v38, %v53_v42 }
 0x12f   :  { %v572_v45 = vpop.eup %571  ;;  %v58_v46 = vsel %vm56_vm1, %v57_v43, %v55_v44 }
 0x130   :  { %v66_v47 = vadd.f32 1e-06, %v58_v46  ;;  %v60_v48 = vmul.f32 %v572_v45, %v51_v40 }
 0x132   :  { %573 = vrcp.f32 %v66_v47  ;;  %v62_v50 = vsel %vm61_vm2, %v51_v40, %v60_v48 }
 0x133   :  { %v65_v51 = vsel %vm63_vm3, %v64_v49, %v62_v50 }
 0x134   :  { %v67_v52 = vadd.f32 1e-06, %v65_v51 }
 0x136   :  { %575 = vrcp.f32 %v67_v52 }
 0x13f   :  { %v574_v53 = vpop.eup %573 }
 0x140   :  { %v69_v54 = vmul.f32 %v574_v53, %v631_v4  ;;  %v564_v4 = vld [vmem:[%s760_s5 + $0x10] sm:$0xff]  }
 0x141   :  { %516 = vmatpush3.bf16.msra.mxu1 %v564_v4 }
 0x142   :  { %v78_v57 = vmul.f32 %v460_v55, %v69_v54  ;;  %517 = vmatprep.subr.bf16.mxu1 %v565_v5 }
 0x143   :  { %v576_v56 = vpop.eup %575 }
 0x144   :  { %v71_v58 = vmul.f32 %v576_v56, %v636_v8  ;;  %v86_v62 = vadd.f32 %v461_v59, %v78_v57  ;;  %v568_v8 = vld [vmem:[%s760_s5] sm:$0xff]  }
 0x145   :  { %518 = vmatpush3.bf16.msra.mxu1 %v566_v6 }
 0x146   :  { %v79_v60 = vmul.f32 %v460_v55, %v71_v58  ;;  %519 = vmatprep.subr.bf16.mxu1 %v567_v7 }
 0x148   :  { %v87_v61 = vadd.f32 %v461_v59, %v79_v60 }
 0x149   :  { %520 = vmatpush3.bf16.msra.mxu1 %v568_v8 }
 0x14a   :  { %v503_v63 = vpack.c.bf16 %v87_v61, %v86_v62 }
 0x14c   :  { %504 = vst [vmem:[#allocation2] sm:$0xff] %v503_v63  }
 0x153   :  { %v552_v2 = vld [vmem:[#allocation2] sm:$0xff]  }
 0x154   :  { %258 = vmatmul.mubr.bf16.vlgmr.msra.gmra.mxu0 %v552_v2 }
 0x214   :  { %v259_v14 = vpop.f32.mrf.mxu0 }
 0x215   :  { %v260_v21 = vadd.f32 %v259_v14, %v132_v16 }
 0x216   :  { %v261_v17 = vpop.f32.mrf.mxu0 }
 0x217   :  { %v262_v19 = vadd.f32 %v261_v17, %v136_v15  ;;  %v268_v27 = vmax.f32 %v260_v21, 0.0 }
 0x218   :  { %v263_v18 = vpop.f32.mrf.mxu0 }
 0x219   :  { %v264_v20 = vadd.f32 %v263_v18, %v132_v16  ;;  %v269_v25 = vmax.f32 %v262_v19, 0.0 }
 0x21a   :  { %v265_v22 = vpop.f32.mrf.mxu0 }
 0x21b   :  { %v266_v23 = vadd.f32 %v265_v22, %v136_v15  ;;  %v270_v24 = vmax.f32 %v264_v20, 0.0 }
 0x21d   :  { %v271_v26 = vmax.f32 %v266_v23, 0.0  ;;  %v272_v29 = vpack.c.bf16 %v270_v24, %v268_v27 }
 0x21f   :  { %v273_v28 = vpack.c.bf16 %v271_v26, %v269_v25 }
 0x221   :  { %436 = vmatprep.mubr.bf16.mxu1 %v273_v28 }
 0x222   :  { %437 = vmatmul.mubr.bf16.vlgmr.msra.gmra.mxu1 %v272_v29 }
 0x2e2   :  { %v521_v31 = vpop.f32.mrf.mxu1 }
 0x2e4   :  { %v522_v33 = vpop.f32.mrf.mxu1 }
 0x2e5   :  { %v523_v34 = vadd.f32 %v522_v33, %v521_v31 }
 0x2e6   :  { %v524_v35 = vpop.f32.mrf.mxu1 }
 0x2e7   :  { %v445_v37 = vadd.f32 %v523_v34, %v105_v32 }
 0x2e8   :  { %v525_v38 = vpop.f32.mrf.mxu1 }
 0x2e9   :  { %454 = vst [vmem:[%s765_s7] sm:$0xff] %v445_v37  ;;  %v526_v39 = vadd.f32 %v525_v38, %v524_v35 }
 0x2eb   :  { %v446_v40 = vadd.f32 %v526_v39, %v106_v36 }
 0x2ed   :  { %455 = vst [vmem:[%s765_s7 + $0x8] sm:$0xff] %v446_v40 }

</bundles_post_ra>
